<compile_context>
chip_gen: v7x
topology: tpu7x:2x2x1
jax: 0.10.0
libtpu: 0.0.40
codegen_flags: <defaults>
</compile_context>

<pallas_src>
import functools

import jax
import jax.numpy as jnp
from jax.experimental import pallas as pl
from jax.experimental.pallas import tpu as pltpu

EPS = 1e-5  # PyTorch InstanceNorm2d default


# --------------------------------- kernel ----------------------------------

def resnet_block_kernel(x_ref, w1_ref, w2_ref, o_ref, *, compute_dtype):
    H, W, C = x_ref.shape
    N = H * W
    inv_n = 1.0 / N

    def reflect_pad(img):
        """ReflectionPad2d(1) of (H, W, C) -> (H+2, W+2, C), pure value ops.

        Every source is the `img` value (top/bottom rows, then left/right
        columns taken from the row-extended value), so there is no scratch
        buffer and no read-after-write dependency in the pad phase.
        """
        rows = jnp.concatenate([img[1:2], img, img[H - 2:H - 1]], axis=0)
        left = rows[:, 1:2, :]
        right = rows[:, W - 2:W - 1, :]
        return jnp.concatenate([left, rows, right], axis=1)

    def conv3x3(img, w_ref):
        """3x3 'VALID' conv over the reflect-padded image as ONE MXU matmul.

        The 9 taps are static slices of the padded value, fused along the
        channel (lane) axis into an (H*W, 9C) patch matrix; contraction depth
        is 9C instead of 9 separate K=C matmuls with accumulator RMWs.
        Cast to the MXU compute dtype happens once, before padding.
        """
        padded = reflect_pad(img.astype(compute_dtype))        # (H+2, W+2, C)
        taps = [padded[dy:dy + H, dx:dx + W, :]
                for dy in range(3) for dx in range(3)]          # (dy, dx) order
        patches = jnp.concatenate(taps, axis=-1).reshape(N, 9 * C)
        out = jnp.dot(patches, w_ref[...],
                      preferred_element_type=jnp.float32)       # (N, C) f32
        return out.reshape(H, W, C)

    def instance_norm(h):
        """InstanceNorm2d(affine=False, eps=1e-5); two-pass variance in f32."""
        mean = jnp.sum(h, axis=(0, 1), keepdims=True) * inv_n
        d = h - mean
        var = jnp.sum(d * d, axis=(0, 1), keepdims=True) * inv_n
        return d * jax.lax.rsqrt(var + EPS)

    x = x_ref[...].astype(jnp.float32)                          # (H, W, C)

    # conv1 -> InstanceNorm -> ReLU   (bias omitted: cancelled by the norm)
    y = jnp.maximum(instance_norm(conv3x3(x, w1_ref)), 0.0)

    # conv2 -> InstanceNorm -> residual add, all without leaving VMEM.
    h2 = instance_norm(conv3x3(y, w2_ref))
    o_ref[...] = (x + h2).astype(o_ref.dtype)


# ------------------------------- pallas glue --------------------------------

def resnet_block_forward(x_nchw, w1, b1, w2, b2, *, compute_dtype=jnp.bfloat16):
    """x_nchw: (B, C, H, W). w1/w2: HWIO (3, 3, C, C). b1/b2: (C,).

    b1/b2 are accepted for interface parity but unused: with
    InstanceNorm2d(affine=False) directly after each conv, a per-channel bias
    is removed exactly by the per-(batch, channel) mean subtraction.
    """
    del b1, b2
    x = jnp.transpose(x_nchw, (0, 2, 3, 1)).astype(jnp.float32)  # NCHW -> NHWC
    B, H, W, C = x.shape

    # Weights: HWIO (3,3,Cin,Cout) -> (9*Cin, Cout), row index = (dy*3+dx)*Cin+cin
    # (matches the tap concatenation order in the kernel).  Cast to the MXU
    # compute dtype ONCE here -- hoisted out of the kernel hot path.
    w1m = jnp.reshape(w1, (9 * C, C)).astype(compute_dtype)
    w2m = jnp.reshape(w2, (9 * C, C)).astype(compute_dtype)

    # Explicit VMEM budget (important on v7x: 64 MiB physical, 32 MiB default
    # scoped limit; on v5e the default is only 16 MiB).  Estimate the big live
    # values plus double-buffered in/out blocks and weight blocks, then clamp.
    itemsize = jnp.dtype(compute_dtype).itemsize
    live_bytes = ((H + 2) * (W + 2) * C * itemsize      # reflect-padded image
                  + H * W * 9 * C * itemsize            # fused im2col patch matrix
                  + 3 * H * W * C * 4)                  # f32 conv-out / y / residual
    blk_bytes = 2 * 2 * H * W * C * 4                   # x + out blocks, double-buffered
    w_bytes = 2 * 2 * 9 * C * C * itemsize              # two weight mats, double-buffered
    vmem_limit = int(min(64 << 20, max(16 << 20,
                                       2 * (live_bytes + blk_bytes + w_bytes))))

    kernel = functools.partial(resnet_block_kernel, compute_dtype=compute_dtype)
    out = pl.pallas_call(
        kernel,
        out_shape=jax.ShapeDtypeStruct((B, H, W, C), jnp.float32),
        grid=(B,),
        in_specs=[
            # Per-batch activation block (channels on lanes).
            pl.BlockSpec((None, H, W, C), lambda b: (b, 0, 0, 0)),
            # Weight mats: constant index map -> fetched once, stay resident.
            # (At large C these could be single-buffered via
            #  pipeline_mode=pl.Buffered(1) to halve their VMEM footprint.)
            pl.BlockSpec((9 * C, C), lambda b: (0, 0)),
            pl.BlockSpec((9 * C, C), lambda b: (0, 0)),
        ],
        out_specs=pl.BlockSpec((None, H, W, C), lambda b: (b, 0, 0, 0)),
        compiler_params=pltpu.CompilerParams(
            dimension_semantics=("parallel",),
            vmem_limit_bytes=vmem_limit,
        ),
    )(x, w1m, w2m)
    return jnp.transpose(out, (0, 3, 1, 2))  # NHWC -> NCHW


# ----------------------------- pure-JAX reference ---------------------------

def _ref_forward(x_nchw, w1, b1, w2, b2):
    def conv(h, w, b):
        hp = jnp.pad(h, ((0, 0), (1, 1), (1, 1), (0, 0)), mode="reflect")
        y = jax.lax.conv_general_dilated(
            hp, w, (1, 1), "VALID",
            dimension_numbers=("NHWC", "HWIO", "NHWC"))
        return y + b[None, None, None, :]

    def inorm(h):
        m = jnp.mean(h, axis=(1, 2), keepdims=True)
        v = jnp.mean((h - m) ** 2, axis=(1, 2), keepdims=True)
        return (h - m) * jax.lax.rsqrt(v + EPS)

    x = jnp.transpose(x_nchw, (0, 2, 3, 1)).astype(jnp.float32)
    h = jnp.maximum(inorm(conv(x, w1, b1)), 0.0)
    h = inorm(conv(h, w2, b2))
    return jnp.transpose(x + h, (0, 3, 1, 2))


# ------------------------------------ main ----------------------------------

if __name__ == "__main__":
    key = jax.random.PRNGKey(0)
    # B=4 (even, >=2 grid steps per TensorCore on v7x megacore), dim=4.
    B, C, H, W = 4, 4, 16, 16

    kx, kw1, kb1, kw2, kb2 = jax.random.split(key, 5)
    x = jax.random.normal(kx, (B, C, H, W), jnp.float32)
    w1 = jax.random.normal(kw1, (3, 3, C, C), jnp.float32) * 0.2
    b1 = jax.random.normal(kb1, (C,), jnp.float32) * 0.1
    w2 = jax.random.normal(kw2, (3, 3, C, C), jnp.float32) * 0.2
    b2 = jax.random.normal(kb2, (C,), jnp.float32) * 0.1

    ref = _ref_forward(x, w1, b1, w2, b2)

    # Tight check with f32 MXU operands.
    out_f32 = jax.block_until_ready(
        resnet_block_forward(x, w1, b1, w2, b2, compute_dtype=jnp.float32))
    assert out_f32.shape == (B, C, H, W) and out_f32.dtype == jnp.float32
    err_f32 = float(jnp.max(jnp.abs(out_f32 - ref)))
    assert jnp.allclose(out_f32, ref, rtol=2e-4, atol=2e-4), err_f32

    # Default path: bf16 MXU operands (norm/ReLU/residual stay f32) - relaxed check.
    out_bf16 = jax.block_until_ready(resnet_block_forward(x, w1, b1, w2, b2))
    err_bf16 = float(jnp.max(jnp.abs(out_bf16 - ref)))
    assert jnp.allclose(out_bf16, ref, rtol=1e-1, atol=1e-1), err_bf16

    print("KERNEL_OK")
</pallas_src>

<mosaic_0001>
module attributes {stable_mosaic.version = 11 : i64} {
  func.func @resnet_block_kernel(%arg0: i32, %arg1: memref<1x16x16x4xf32, #tpu.memory_space<vmem>>, %arg2: memref<36x4xf32, #tpu.memory_space<vmem>>, %arg3: memref<36x4xf32, #tpu.memory_space<vmem>>, %arg4: memref<1x16x16x4xf32, #tpu.memory_space<vmem>>) attributes {dimension_semantics = [#tpu.dimension_semantics<parallel>], iteration_bounds = array<i64: 4>, scalar_prefetch = 0 : i64, scratch_operands = 0 : i64, tpu.core_type = #tpu.core_type<tc>, window_params = [{transform_indices = @transform_0, window_bounds = array<i64: 1, 16, 16, 4>}, {pipeline_mode = #tpu.pipeline_mode<synchronous>, transform_indices = @transform_1, window_bounds = array<i64: 36, 4>}, {pipeline_mode = #tpu.pipeline_mode<synchronous>, transform_indices = @transform_2, window_bounds = array<i64: 36, 4>}, {transform_indices = @transform_3, window_bounds = array<i64: 1, 16, 16, 4>}]} {
    %c0 = arith.constant 0 : index
    %c0_0 = arith.constant 0 : index
    %c0_1 = arith.constant 0 : index
    %c0_2 = arith.constant 0 : index
    %0 = vector.load %arg1[%c0, %c0_0, %c0_1, %c0_2] : memref<1x16x16x4xf32, #tpu.memory_space<vmem>>, vector<1x16x16x4xf32>
    %1 = vector.shape_cast %0 : vector<1x16x16x4xf32> to vector<16x16x4xf32>
    %2 = vector.extract_strided_slice %1 {offsets = [1, 0, 0], sizes = [1, 16, 4], strides = [1, 1, 1]} : vector<16x16x4xf32> to vector<1x16x4xf32>
    %3 = vector.extract_strided_slice %1 {offsets = [14, 0, 0], sizes = [1, 16, 4], strides = [1, 1, 1]} : vector<16x16x4xf32> to vector<1x16x4xf32>
    %4 = tpu.concatenate %2, %1, %3 in 0 : vector<1x16x4xf32>, vector<16x16x4xf32>, vector<1x16x4xf32> -> vector<18x16x4xf32>
    %5 = vector.extract_strided_slice %4 {offsets = [0, 1, 0], sizes = [18, 1, 4], strides = [1, 1, 1]} : vector<18x16x4xf32> to vector<18x1x4xf32>
    %6 = vector.extract_strided_slice %4 {offsets = [0, 14, 0], sizes = [18, 1, 4], strides = [1, 1, 1]} : vector<18x16x4xf32> to vector<18x1x4xf32>
    %7 = tpu.concatenate %5, %4, %6 in 1 : vector<18x1x4xf32>, vector<18x16x4xf32>, vector<18x1x4xf32> -> vector<18x18x4xf32>
    %8 = vector.extract_strided_slice %7 {offsets = [0, 0, 0], sizes = [16, 16, 4], strides = [1, 1, 1]} : vector<18x18x4xf32> to vector<16x16x4xf32>
    %9 = vector.extract_strided_slice %7 {offsets = [0, 1, 0], sizes = [16, 16, 4], strides = [1, 1, 1]} : vector<18x18x4xf32> to vector<16x16x4xf32>
    %10 = vector.extract_strided_slice %7 {offsets = [0, 2, 0], sizes = [16, 16, 4], strides = [1, 1, 1]} : vector<18x18x4xf32> to vector<16x16x4xf32>
    %11 = vector.extract_strided_slice %7 {offsets = [1, 0, 0], sizes = [16, 16, 4], strides = [1, 1, 1]} : vector<18x18x4xf32> to vector<16x16x4xf32>
    %12 = vector.extract_strided_slice %7 {offsets = [1, 1, 0], sizes = [16, 16, 4], strides = [1, 1, 1]} : vector<18x18x4xf32> to vector<16x16x4xf32>
    %13 = vector.extract_strided_slice %7 {offsets = [1, 2, 0], sizes = [16, 16, 4], strides = [1, 1, 1]} : vector<18x18x4xf32> to vector<16x16x4xf32>
    %14 = vector.extract_strided_slice %7 {offsets = [2, 0, 0], sizes = [16, 16, 4], strides = [1, 1, 1]} : vector<18x18x4xf32> to vector<16x16x4xf32>
    %15 = vector.extract_strided_slice %7 {offsets = [2, 1, 0], sizes = [16, 16, 4], strides = [1, 1, 1]} : vector<18x18x4xf32> to vector<16x16x4xf32>
    %16 = vector.extract_strided_slice %7 {offsets = [2, 2, 0], sizes = [16, 16, 4], strides = [1, 1, 1]} : vector<18x18x4xf32> to vector<16x16x4xf32>
    %17 = tpu.concatenate %8, %9, %10, %11, %12, %13, %14, %15, %16 in 2 : vector<16x16x4xf32>, vector<16x16x4xf32>, vector<16x16x4xf32>, vector<16x16x4xf32>, vector<16x16x4xf32>, vector<16x16x4xf32>, vector<16x16x4xf32>, vector<16x16x4xf32>, vector<16x16x4xf32> -> vector<16x16x36xf32>
    %18 = vector.shape_cast %17 : vector<16x16x36xf32> to vector<256x36xf32>
    %c0_3 = arith.constant 0 : index
    %c0_4 = arith.constant 0 : index
    %19 = vector.load %arg2[%c0_3, %c0_4] : memref<36x4xf32, #tpu.memory_space<vmem>>, vector<36x4xf32>
    %cst = arith.constant dense<0.000000e+00> : vector<256x4xf32>
    %20 = tpu.matmul %18, %19, %cst {dimension_numbers = #tpu.dot_dimension_numbers<[1], [0], [0], [1], [0, 0, 1, 1], [], []>} : vector<256x36xf32>, vector<36x4xf32>, vector<256x4xf32> -> vector<256x4xf32>
    %21 = vector.shape_cast %20 : vector<256x4xf32> to vector<16x16x4xf32>
    %cst_5 = arith.constant dense<0.000000e+00> : vector<4xf32>
    %22 = vector.multi_reduction <add>, %21, %cst_5 [0, 1] : vector<16x16x4xf32> to vector<4xf32>
    %23 = vector.shape_cast %22 : vector<4xf32> to vector<1x1x4xf32>
    %cst_6 = arith.constant 3.906250e-03 : f32
    %24 = vector.broadcast %cst_6 : f32 to vector<1x1x4xf32>
    %25 = arith.mulf %23, %24 : vector<1x1x4xf32>
    %26 = vector.broadcast %25 : vector<1x1x4xf32> to vector<16x16x4xf32>
    %27 = arith.subf %21, %26 : vector<16x16x4xf32>
    %28 = arith.mulf %27, %27 : vector<16x16x4xf32>
    %cst_7 = arith.constant dense<0.000000e+00> : vector<4xf32>
    %29 = vector.multi_reduction <add>, %28, %cst_7 [0, 1] : vector<16x16x4xf32> to vector<4xf32>
    %30 = vector.shape_cast %29 : vector<4xf32> to vector<1x1x4xf32>
    %cst_8 = arith.constant 3.906250e-03 : f32
    %31 = vector.broadcast %cst_8 : f32 to vector<1x1x4xf32>
    %32 = arith.mulf %30, %31 : vector<1x1x4xf32>
    %cst_9 = arith.constant 9.99999974E-6 : f32
    %33 = vector.broadcast %cst_9 : f32 to vector<1x1x4xf32>
    %34 = arith.addf %32, %33 : vector<1x1x4xf32>
    %35 = math.rsqrt %34 : vector<1x1x4xf32>
    %36 = vector.broadcast %35 : vector<1x1x4xf32> to vector<16x16x4xf32>
    %37 = arith.mulf %27, %36 : vector<16x16x4xf32>
    %cst_10 = arith.constant 0.000000e+00 : f32
    %38 = vector.broadcast %cst_10 : f32 to vector<16x16x4xf32>
    %39 = arith.maximumf %37, %38 : vector<16x16x4xf32>
    %40 = vector.extract_strided_slice %39 {offsets = [1, 0, 0], sizes = [1, 16, 4], strides = [1, 1, 1]} : vector<16x16x4xf32> to vector<1x16x4xf32>
    %41 = vector.extract_strided_slice %39 {offsets = [14, 0, 0], sizes = [1, 16, 4], strides = [1, 1, 1]} : vector<16x16x4xf32> to vector<1x16x4xf32>
    %42 = tpu.concatenate %40, %39, %41 in 0 : vector<1x16x4xf32>, vector<16x16x4xf32>, vector<1x16x4xf32> -> vector<18x16x4xf32>
    %43 = vector.extract_strided_slice %42 {offsets = [0, 1, 0], sizes = [18, 1, 4], strides = [1, 1, 1]} : vector<18x16x4xf32> to vector<18x1x4xf32>
    %44 = vector.extract_strided_slice %42 {offsets = [0, 14, 0], sizes = [18, 1, 4], strides = [1, 1, 1]} : vector<18x16x4xf32> to vector<18x1x4xf32>
    %45 = tpu.concatenate %43, %42, %44 in 1 : vector<18x1x4xf32>, vector<18x16x4xf32>, vector<18x1x4xf32> -> vector<18x18x4xf32>
    %46 = vector.extract_strided_slice %45 {offsets = [0, 0, 0], sizes = [16, 16, 4], strides = [1, 1, 1]} : vector<18x18x4xf32> to vector<16x16x4xf32>
    %47 = vector.extract_strided_slice %45 {offsets = [0, 1, 0], sizes = [16, 16, 4], strides = [1, 1, 1]} : vector<18x18x4xf32> to vector<16x16x4xf32>
    %48 = vector.extract_strided_slice %45 {offsets = [0, 2, 0], sizes = [16, 16, 4], strides = [1, 1, 1]} : vector<18x18x4xf32> to vector<16x16x4xf32>
    %49 = vector.extract_strided_slice %45 {offsets = [1, 0, 0], sizes = [16, 16, 4], strides = [1, 1, 1]} : vector<18x18x4xf32> to vector<16x16x4xf32>
    %50 = vector.extract_strided_slice %45 {offsets = [1, 1, 0], sizes = [16, 16, 4], strides = [1, 1, 1]} : vector<18x18x4xf32> to vector<16x16x4xf32>
    %51 = vector.extract_strided_slice %45 {offsets = [1, 2, 0], sizes = [16, 16, 4], strides = [1, 1, 1]} : vector<18x18x4xf32> to vector<16x16x4xf32>
    %52 = vector.extract_strided_slice %45 {offsets = [2, 0, 0], sizes = [16, 16, 4], strides = [1, 1, 1]} : vector<18x18x4xf32> to vector<16x16x4xf32>
    %53 = vector.extract_strided_slice %45 {offsets = [2, 1, 0], sizes = [16, 16, 4], strides = [1, 1, 1]} : vector<18x18x4xf32> to vector<16x16x4xf32>
    %54 = vector.extract_strided_slice %45 {offsets = [2, 2, 0], sizes = [16, 16, 4], strides = [1, 1, 1]} : vector<18x18x4xf32> to vector<16x16x4xf32>
    %55 = tpu.concatenate %46, %47, %48, %49, %50, %51, %52, %53, %54 in 2 : vector<16x16x4xf32>, vector<16x16x4xf32>, vector<16x16x4xf32>, vector<16x16x4xf32>, vector<16x16x4xf32>, vector<16x16x4xf32>, vector<16x16x4xf32>, vector<16x16x4xf32>, vector<16x16x4xf32> -> vector<16x16x36xf32>
    %56 = vector.shape_cast %55 : vector<16x16x36xf32> to vector<256x36xf32>
    %c0_11 = arith.constant 0 : index
    %c0_12 = arith.constant 0 : index
    %57 = vector.load %arg3[%c0_11, %c0_12] : memref<36x4xf32, #tpu.memory_space<vmem>>, vector<36x4xf32>
    %cst_13 = arith.constant dense<0.000000e+00> : vector<256x4xf32>
    %58 = tpu.matmul %56, %57, %cst_13 {dimension_numbers = #tpu.dot_dimension_numbers<[1], [0], [0], [1], [0, 0, 1, 1], [], []>} : vector<256x36xf32>, vector<36x4xf32>, vector<256x4xf32> -> vector<256x4xf32>
    %59 = vector.shape_cast %58 : vector<256x4xf32> to vector<16x16x4xf32>
    %cst_14 = arith.constant dense<0.000000e+00> : vector<4xf32>
    %60 = vector.multi_reduction <add>, %59, %cst_14 [0, 1] : vector<16x16x4xf32> to vector<4xf32>
    %61 = vector.shape_cast %60 : vector<4xf32> to vector<1x1x4xf32>
    %cst_15 = arith.constant 3.906250e-03 : f32
    %62 = vector.broadcast %cst_15 : f32 to vector<1x1x4xf32>
    %63 = arith.mulf %61, %62 : vector<1x1x4xf32>
    %64 = vector.broadcast %63 : vector<1x1x4xf32> to vector<16x16x4xf32>
    %65 = arith.subf %59, %64 : vector<16x16x4xf32>
    %66 = arith.mulf %65, %65 : vector<16x16x4xf32>
    %cst_16 = arith.constant dense<0.000000e+00> : vector<4xf32>
    %67 = vector.multi_reduction <add>, %66, %cst_16 [0, 1] : vector<16x16x4xf32> to vector<4xf32>
    %68 = vector.shape_cast %67 : vector<4xf32> to vector<1x1x4xf32>
    %cst_17 = arith.constant 3.906250e-03 : f32
    %69 = vector.broadcast %cst_17 : f32 to vector<1x1x4xf32>
    %70 = arith.mulf %68, %69 : vector<1x1x4xf32>
    %cst_18 = arith.constant 9.99999974E-6 : f32
    %71 = vector.broadcast %cst_18 : f32 to vector<1x1x4xf32>
    %72 = arith.addf %70, %71 : vector<1x1x4xf32>
    %73 = math.rsqrt %72 : vector<1x1x4xf32>
    %74 = vector.broadcast %73 : vector<1x1x4xf32> to vector<16x16x4xf32>
    %75 = arith.mulf %65, %74 : vector<16x16x4xf32>
    %76 = arith.addf %1, %75 : vector<16x16x4xf32>
    %c0_19 = arith.constant 0 : index
    %c0_20 = arith.constant 0 : index
    %c0_21 = arith.constant 0 : index
    %c0_22 = arith.constant 0 : index
    %77 = vector.load %arg4[%c0_19, %c0_20, %c0_21, %c0_22] : memref<1x16x16x4xf32, #tpu.memory_space<vmem>>, vector<1x16x16x4xf32>
    %78 = vector.shape_cast %77 : vector<1x16x16x4xf32> to vector<16x16x4xf32>
    %79 = vector.shape_cast %76 : vector<16x16x4xf32> to vector<1x16x16x4xf32>
    tpu.vector_store %arg4[%c0_19, %c0_20, %c0_21, %c0_22], %79 {strides = array<i32>} : memref<1x16x16x4xf32, #tpu.memory_space<vmem>>, vector<1x16x16x4xf32>,
    return
  }
  func.func @transform_0(%arg0: i32) -> (i32, i32, i32, i32) {
    %c0_i32 = arith.constant 0 : i32
    %c0_i32_0 = arith.constant 0 : i32
    %c0_i32_1 = arith.constant 0 : i32
    %c0_i32_2 = arith.constant 0 : i32
    return %arg0, %c0_i32, %c0_i32_0, %c0_i32_1 : i32, i32, i32, i32
  }
  func.func @transform_1(%arg0: i32) -> (i32, i32) {
    %c0_i32 = arith.constant 0 : i32
    %c0_i32_0 = arith.constant 0 : i32
    %c0_i32_1 = arith.constant 0 : i32
    return %c0_i32, %c0_i32_0 : i32, i32
  }
  func.func @transform_2(%arg0: i32) -> (i32, i32) {
    %c0_i32 = arith.constant 0 : i32
    %c0_i32_0 = arith.constant 0 : i32
    %c0_i32_1 = arith.constant 0 : i32
    return %c0_i32, %c0_i32_0 : i32, i32
  }
  func.func @transform_3(%arg0: i32) -> (i32, i32, i32, i32) {
    %c0_i32 = arith.constant 0 : i32
    %c0_i32_0 = arith.constant 0 : i32
    %c0_i32_1 = arith.constant 0 : i32
    %c0_i32_2 = arith.constant 0 : i32
    return %arg0, %c0_i32, %c0_i32_0, %c0_i32_1 : i32, i32, i32, i32
  }
}

</mosaic_0001>

<bundles_post_ra>
// kernel: tpu_custom_call.1
= control target key start
LH: loop header
LB: loop body
LE: loop exit
PB: predicated region body
PF: predicated region fallthrough
CT: control target
= control target key end

     0   :  { %s4684_s12 = smov 0   ;;  %s8132_s0 = inlined_call_operand.vmem [shape: f32[4,16,16,4], index: 0, kind: input, shape index: {}]   ;;  %s8133_s1 = inlined_call_operand.vmem [shape: f32[36,4], index: 1, kind: input, shape index: {}]   ;;  %s8134_s2 = inlined_call_operand.vmem [shape: f32[36,4], index: 2, kind: input, shape index: {}]   ;;  %s8135_s3 = inlined_call_operand.vmem [shape: f32[4,16,16,4], index: 3, kind: output, shape index: {}]  }
   0x1 LB: > { %s4311_s13 = sadd.s32 4294967295, %s4654_s12   ;;  %p4315_p0 = scmp.ge.s32.totalorder %s4654_s12, 1  ;;  %s4654_s12 = sphi %s4684_s12, %s13_s12  }
   0x2   : > { %p137_p1 = scmp.lt.s32.totalorder %s4654_s12, 5 }
   0x4   : > { %p138_p2 = pnand %p4315_p0, %p137_p1 }
   0x6   : > { %141 = sbr.rel (%p138_p2) target bundleno = 1943 (0x797), region = 32 }
   0xd   : > { %p161_p3 = scmp.lt.s32.totalorder %s4311_s13, 3  ;;  %vm267_vm0 = vcmask 1040384   ;;  %vm457_vm1 = vcmask 1046528   ;;  %s4656_s18 = smov 4   ;;  %vm623_vm2 = vcmask 1045504   ;;  %vm1721_vm3 = vcmask 1043456  }
   0xe   : > { %s4657_s19 = smov 8   ;;  %s4658_s20 = smov 12   ;;  %vm1359_vm4 = vcmask 31744   ;;  %vm1390_vm5 = vcmask 64512   ;;  %vm1421_vm6 = vcmask 97280   ;;  %vm1454_vm7 = vcmask 130048  }
   0xf   : > { %s8340_s13 = smov (!%p161_p3, %s4311_s13), 3  ;;  %s4659_s21 = smov 16   ;;  %vm1487_vm8 = vcmask 162816   ;;  %vm1520_vm9 = vcmask 195584   ;;  %vm1553_vm10 = vcmask 228352   ;;  %vm1586_vm11 = vcmask 261120  }
  0x10   : > { %s4388_s14 = sshll.u32 %s8340_s13, 8  ;;  %s4660_s22 = smov 20   ;;  %vm1624_vm12 = vcmask 293888  }
  0x11   : > { %s4700_s17 = scalar_lea.vmem %s8132_s0, %s4388_s14  ;;  %s4661_s27 = smov 24  }
  0x12   : > { %v173_v0 = vld [vmem:[%s4700_s17 + $0x10] sm:$0xff]  ;;  %v174_v1 = vld [vmem:[%s4700_s17 + $0x18] sm:$0xff]  ;;  %v171_v2 = vld [vmem:[%s4700_s17] sm:$0xff]  ;;  %s4662_s5 = smov 28   ;;  %s4663_s8 = smov 32  }
  0x13   : > { %v219_v3 = vrot.slane %v173_v0, 1  ;;  %v268_v4 = vrot.slane %v173_v0, 7  ;;  %v269_v5 = vrot.slane %v174_v1, 7  ;;  %v172_v6 = vld [vmem:[%s4700_s17 + $0x8] sm:$0xff]  ;;  %v220_v7 = vrot.slane %v171_v2, 1  ;;  %v175_v8 = vld [vmem:[%s4700_s17 + $0x20] sm:$0xff] }
  0x14   : > { %v271_v9 = vrot.slane %v171_v2, 7  ;;  %v272_v10 = vrot.slane %v172_v6, 7  ;;  %v363_v11 = vrot.slane %v174_v1, 5  ;;  %v364_v12 = vrot.slane %v172_v6, 5  ;;  %v176_v15 = vld [vmem:[%s4700_s17 + $0x28] sm:$0xff]  ;;  %v177_v22 = vld [vmem:[%s4700_s17 + $0x30] sm:$0xff] }
  0x15   : > { %v4708_v13 = vsel %vm267_vm0, %v268_v4, %v269_v5  ;;  %v4711_v14 = vsel %vm267_vm0, %v219_v3, %v268_v4  ;;  %v221_v16 = vrot.slane %v175_v8, 1  ;;  %v274_v17 = vrot.slane %v175_v8, 7  ;;  %v178_v31 = vld [vmem:[%s4700_s17 + $0x38] sm:$0xff]  ;;  %v179_v36 = vld [vmem:[%s4700_s17 + $0x40] sm:$0xff]  ;;  %v180_v41 = vld [vmem:[%s4700_s17 + $0x48] sm:$0xff] }
  0x16   : > { %v458_v18 = vrot.slane %v4711_v14, 1  ;;  %v459_v19 = vrot.slane %v4708_v13, 1  ;;  %v4717_v20 = vsel %vm267_vm0, %v271_v9, %v272_v10  ;;  %v4720_v21 = vsel %vm267_vm0, %v220_v7, %v271_v9  ;;  %v181_v54 = vld [vmem:[%s4700_s17 + $0x50] sm:$0xff]  ;;  %v182_v59 = vld [vmem:[%s4700_s17 + $0x58] sm:$0xff]  ;;  %v183_v0 = vld [vmem:[%s4700_s17 + $0x60] sm:$0xff] }
  0x17   : > { %v463_v23 = vrot.slane %v4720_v21, 1  ;;  %v464_v24 = vrot.slane %v4717_v20, 1  ;;  %v4726_v25 = vsel %vm267_vm0, %v269_v5, %v363_v11  ;;  %v4729_v26 = vsel %vm267_vm0, %v272_v10, %v364_v12  ;;  %v184_v4 = vld [vmem:[%s4700_s17 + $0x68] sm:$0xff] }
  0x18   : > { %v4732_v27 = vsel %vm457_vm1, %v458_v18, %v459_v19  ;;  %v461_v28 = vrot.slane %v4726_v25, 1  ;;  %v466_v29 = vrot.slane %v4729_v26, 1  ;;  %v275_v30 = vrot.slane %v176_v15, 7 }
  0x19   : > { %533 = vrot.lane.b32.xlu0 %v4732_v27, %s4656_s18  ;;  %v4740_v32 = vsel %vm457_vm1, %v463_v23, %v464_v24  ;;  %v4743_v33 = vsel %vm267_vm0, %v221_v16, %v274_v17  ;;  %v365_v34 = vrot.slane %v176_v15, 5  ;;  %v222_v35 = vrot.slane %v177_v22, 1  ;;  %v186_v23 = vld [vmem:[%s4700_s17 + $0x78] sm:$0xff] }
  0x1a   : > { %537 = vrot.lane.b32.xlu1 %v4740_v32, %s4656_s18  ;;  %v4749_v37 = vsel %vm457_vm1, %v459_v19, %v461_v28  ;;  %v4752_v38 = vsel %vm457_vm1, %v464_v24, %v466_v29  ;;  %v4755_v39 = vsel %vm267_vm0, %v274_v17, %v275_v30  ;;  %v468_v40 = vrot.slane %v4743_v33, 1 }
  0x1b   : > { %v469_v42 = vrot.slane %v4755_v39, 1  ;;  %v4761_v43 = vsel %vm267_vm0, %v275_v30, %v365_v34  ;;  %v277_v44 = vrot.slane %v177_v22, 7  ;;  %v278_v45 = vrot.slane %v178_v31, 7  ;;  %v185_v22 = vld [vmem:[%s4700_s17 + $0x70] sm:$0xff]  ;;  %v187_v30 = vld [vmem:[%s4700_s17 + $0x80] sm:$0xff] }
  0x1c   : > { %v471_v46 = vrot.slane %v4761_v43, 1  ;;  %v366_v47 = vrot.slane %v178_v31, 5  ;;  %v223_v48 = vrot.slane %v179_v36, 1  ;;  %v280_v49 = vrot.slane %v179_v36, 7 }
  0x1d   : > { %535 = vrot.lane.b32.xlu0 %v4749_v37, %s4656_s18  ;;  %v4767_v50 = vsel %vm457_vm1, %v468_v40, %v469_v42  ;;  %v4770_v51 = vsel %vm267_vm0, %v277_v44, %v278_v45  ;;  %v4773_v52 = vsel %vm267_vm0, %v222_v35, %v277_v44  ;;  %v281_v53 = vrot.slane %v180_v41, 7  ;;  %v188_v40 = vld [vmem:[%s4700_s17 + $0x88] sm:$0xff] }
  0x1e   : > { %539 = vrot.lane.b32.xlu1 %v4752_v38, %s4656_s18  ;;  %v4779_v55 = vsel %vm457_vm1, %v469_v42, %v471_v46  ;;  %v473_v56 = vrot.slane %v4773_v52, 1  ;;  %v474_v57 = vrot.slane %v4770_v51, 1  ;;  %v4784_v58 = vsel %vm267_vm0, %v278_v45, %v366_v47 }
  0x1f   : > { %v476_v60 = vrot.slane %v4784_v58, 1  ;;  %v4789_v61 = vsel %vm267_vm0, %v280_v49, %v281_v53  ;;  %v4792_v62 = vsel %vm267_vm0, %v223_v48, %v280_v49  ;;  %v367_v63 = vrot.slane %v180_v41, 5 }
  0x20   : > { %v4796_v1 = vsel %vm457_vm1, %v473_v56, %v474_v57  ;;  %v478_v2 = vrot.slane %v4792_v62, 1  ;;  %v224_v3 = vrot.slane %v181_v54, 1  ;;  %v479_v5 = vrot.slane %v4789_v61, 1 }
  0x21   : > { %541 = vrot.lane.b32.xlu0 %v4767_v50, %s4656_s18  ;;  %v4804_v6 = vsel %vm267_vm0, %v281_v53, %v367_v63  ;;  %v283_v7 = vrot.slane %v181_v54, 7  ;;  %v284_v8 = vrot.slane %v182_v59, 7  ;;  %v4809_v9 = vsel %vm457_vm1, %v474_v57, %v476_v60  ;;  %v190_v60 = vld [vmem:[%s4700_s17 + $0x98] sm:$0xff] }
  0x22   : > { %543 = vrot.lane.b32.xlu1 %v4779_v55, %s4656_s18  ;;  %v481_v10 = vrot.slane %v4804_v6, 1  ;;  %v368_v11 = vrot.slane %v182_v59, 5  ;;  %v225_v12 = vrot.slane %v183_v0, 1  ;;  %v286_v17 = vrot.slane %v183_v0, 7  ;;  %v189_v59 = vld [vmem:[%s4700_s17 + $0x90] sm:$0xff] }
  0x23   : > { %v4813_v15 = vsel %vm267_vm0, %v283_v7, %v284_v8  ;;  %v4816_v16 = vsel %vm267_vm0, %v224_v3, %v283_v7  ;;  %v287_v18 = vrot.slane %v184_v4, 7  ;;  %v4826_v24 = vsel %vm457_vm1, %v478_v2, %v479_v5 }
  0x24   : > { %v4819_v19 = vsel %vm267_vm0, %v284_v8, %v368_v11  ;;  %v4829_v28 = vsel %vm457_vm1, %v479_v5, %v481_v10  ;;  %v369_v29 = vrot.slane %v184_v4, 5  ;;  %v483_v31 = vrot.slane %v4816_v16, 1 }
  0x25   : > { %545 = vrot.lane.b32.xlu0 %v4796_v1, %s4656_s18  ;;  %v484_v34 = vrot.slane %v4813_v15, 1  ;;  %v486_v35 = vrot.slane %v4819_v19, 1  ;;  %v4838_v36 = vsel %vm267_vm0, %v286_v17, %v287_v18  ;;  %v4842_v41 = vsel %vm267_vm0, %v225_v12, %v286_v17  ;;  %v191_v17 = vld [vmem:[%s4700_s17 + $0xa0] sm:$0xff] }
  0x26   : > { %547 = vrot.lane.b32.xlu1 %v4809_v9, %s4656_s18  ;;  %v226_v42 = vrot.slane %v185_v22, 1  ;;  %v289_v44 = vrot.slane %v185_v22, 7  ;;  %v290_v45 = vrot.slane %v186_v23, 7  ;;  %v4845_v46 = vsel %vm267_vm0, %v287_v18, %v369_v29  ;;  %v192_v29 = vld [vmem:[%s4700_s17 + $0xa8] sm:$0xff] }
  0x27   : > { %v370_v47 = vrot.slane %v186_v23, 5  ;;  %v227_v48 = vrot.slane %v187_v30, 1  ;;  %v292_v49 = vrot.slane %v187_v30, 7  ;;  %v293_v53 = vrot.slane %v188_v40, 7 }
  0x28   : > { %v4852_v54 = vsel %vm457_vm1, %v483_v31, %v484_v34  ;;  %v488_v56 = vrot.slane %v4842_v41, 1  ;;  %v489_v57 = vrot.slane %v4838_v36, 1  ;;  %v4859_v63 = vsel %vm457_vm1, %v484_v34, %v486_v35 }
  0x29   : > { %549 = vrot.lane.b32.xlu0 %v4826_v24, %s4656_s18  ;;  %v491_v0 = vrot.slane %v4845_v46, 1  ;;  %v4863_v2 = vsel %vm267_vm0, %v289_v44, %v290_v45  ;;  %v4866_v3 = vsel %vm267_vm0, %v226_v42, %v289_v44  ;;  %v4869_v4 = vsel %vm267_vm0, %v290_v45, %v370_v47 }
  0x2a   : > { %551 = vrot.lane.b32.xlu1 %v4829_v28, %s4656_s18  ;;  %v4872_v5 = vsel %vm267_vm0, %v227_v48, %v292_v49  ;;  %v371_v7 = vrot.slane %v188_v40, 5  ;;  %v4877_v8 = vsel %vm267_vm0, %v292_v49, %v293_v53  ;;  %v228_v10 = vrot.slane %v189_v59, 1 }
  0x2b   : > { %8201 = vst [vmem:[#allocation2_spill] sm:$0xff] %v4877_v8  ;;  %v295_v11 = vrot.slane %v189_v59, 7  ;;  %v296_v12 = vrot.slane %v190_v60, 7  ;;  %v4883_v18 = vsel %vm457_vm1, %v488_v56, %v489_v57  ;;  %v493_v22 = vrot.slane %v4866_v3, 1 }
  0x2c   : > { %v494_v23 = vrot.slane %v4863_v2, 1  ;;  %v4889_v30 = vsel %vm457_vm1, %v489_v57, %v491_v0  ;;  %v496_v31 = vrot.slane %v4869_v4, 1  ;;  %v498_v34 = vrot.slane %v4872_v5, 1  ;;  %v194_v0 = vld [vmem:[%s4700_s17 + $0xb8] sm:$0xff] }
  0x2d   : > { %553 = vrot.lane.b32.xlu0 %v4852_v54, %s4656_s18  ;;  %v499_v35 = vrot.slane %v4877_v8, 1  ;;  %v4895_v40 = vsel %vm267_vm0, %v293_v53, %v371_v7  ;;  %v372_v42 = vrot.slane %v190_v60, 5  ;;  %v229_v44 = vrot.slane %v191_v17, 1  ;;  %v193_v60 = vld [vmem:[%s4700_s17 + $0xb0] sm:$0xff]  ;;  %v196_v8 = vld [vmem:[%s4700_s17 + $0xc8] sm:$0xff] }
  0x2e   : > { %555 = vrot.lane.b32.xlu1 %v4859_v63, %s4656_s18  ;;  %8202 = vst [vmem:[#allocation3_spill] sm:$0xff] %v4895_v40  ;;  %v4900_v45 = vsel %vm267_vm0, %v295_v11, %v296_v12  ;;  %v4903_v47 = vsel %vm267_vm0, %v228_v10, %v295_v11  ;;  %v298_v48 = vrot.slane %v191_v17, 7  ;;  %v299_v49 = vrot.slane %v192_v29, 7 }
  0x2f   : > { %8203 = vst [vmem:[#allocation4_spill] sm:$0xff] %v4900_v45  ;;  %8204 = vst [vmem:[#allocation5_spill] sm:$0xff] %v4903_v47  ;;  %v4908_v56 = vsel %vm457_vm1, %v493_v22, %v494_v23  ;;  %v373_v53 = vrot.slane %v192_v29, 5  ;;  %v4911_v57 = vsel %vm457_vm1, %v494_v23, %v496_v31  ;;  %v501_v59 = vrot.slane %v4895_v40, 1 }
  0x30   : > { %v503_v7 = vrot.slane %v4903_v47, 1  ;;  %v504_v10 = vrot.slane %v4900_v45, 1  ;;  %v4919_v11 = vsel %vm267_vm0, %v296_v12, %v372_v42  ;;  %v4924_v17 = vsel %vm457_vm1, %v498_v34, %v499_v35  ;;  %v195_v45 = vld [vmem:[%s4700_s17 + $0xc0] sm:$0xff] }
  0x31   : > { %557 = vrot.lane.b32.xlu0 %v4883_v18, %s4656_s18  ;;  %8205 = vst [vmem:[#allocation6_spill] sm:$0xff] %v4919_v11  ;;  %8206 = vst [vmem:[#allocation7_spill] sm:$0xff] %v4924_v17  ;;  %v4927_v22 = vsel %vm267_vm0, %v298_v48, %v299_v49  ;;  %v4930_v23 = vsel %vm267_vm0, %v229_v44, %v298_v48  ;;  %v4935_v29 = vsel %vm267_vm0, %v299_v49, %v373_v53 }
  0x32   : > { %559 = vrot.lane.b32.xlu1 %v4889_v30, %s4656_s18  ;;  %8207 = vst [vmem:[#allocation8_spill] sm:$0xff] %v4927_v22  ;;  %8208 = vst [vmem:[#allocation9_spill] sm:$0xff] %v4930_v23  ;;  %v230_v12 = vrot.slane %v193_v60, 1  ;;  %v301_v31 = vrot.slane %v193_v60, 7  ;;  %v302_v42 = vrot.slane %v194_v0, 7  ;;  %v4939_v47 = vsel %vm457_vm1, %v499_v35, %v501_v59 }
  0x33   : > { %8209 = vst [vmem:[#allocation10_spill] sm:$0xff] %v4935_v29  ;;  %8210 = vst [vmem:[#allocation11_spill] sm:$0xff] %v4939_v47  ;;  %v506_v34 = vrot.slane %v4919_v11, 1  ;;  %v374_v40 = vrot.slane %v194_v0, 5  ;;  %v4944_v44 = vsel %vm457_vm1, %v503_v7, %v504_v10  ;;  %v508_v48 = vrot.slane %v4930_v23, 1 }
  0x34   : > { %8211 = vst [vmem:[#allocation12_spill] sm:$0xff] %v4944_v44  ;;  %v509_v49 = vrot.slane %v4927_v22, 1  ;;  %v511_v53 = vrot.slane %v4935_v29, 1  ;;  %v231_v35 = vrot.slane %v195_v45, 1  ;;  %v4954_v59 = vsel %vm267_vm0, %v301_v31, %v302_v42  ;;  %v197_v29 = vld [vmem:[%s4700_s17 + $0xd0] sm:$0xff] }
  0x35   : > { %561 = vrot.lane.b32.xlu0 %v4908_v56, %s4656_s18  ;;  %8212 = vst [vmem:[#allocation13_spill] sm:$0xff] %v4954_v59  ;;  %v4957_v60 = vsel %vm267_vm0, %v230_v12, %v301_v31  ;;  %v304_v0 = vrot.slane %v195_v45, 7  ;;  %v305_v7 = vrot.slane %v196_v8, 7  ;;  %v4960_v11 = vsel %vm457_vm1, %v504_v10, %v506_v34 }
  0x36   : > { %563 = vrot.lane.b32.xlu1 %v4911_v57, %s4656_s18  ;;  %8213 = vst [vmem:[#allocation14_spill] sm:$0xff] %v4957_v60  ;;  %8214 = vst [vmem:[#allocation15_spill] sm:$0xff] %v4960_v11  ;;  %v4963_v23 = vsel %vm267_vm0, %v302_v42, %v374_v40  ;;  %v375_v22 = vrot.slane %v196_v8, 5  ;;  %v513_v45 = vrot.slane %v4957_v60, 1  ;;  %v514_v12 = vrot.slane %v4954_v59, 1  ;;  %v199_v60 = vld [vmem:[%s4700_s17 + $0xe0] sm:$0xff] }
  0x37   : > { %8215 = vst [vmem:[#allocation16_spill] sm:$0xff] %v4963_v23  ;;  %v4977_v40 = vsel %vm457_vm1, %v509_v49, %v511_v53  ;;  %v516_v8 = vrot.slane %v4963_v23, 1  ;;  %v4981_v10 = vsel %vm267_vm0, %v304_v0, %v305_v7  ;;  %v4984_v31 = vsel %vm267_vm0, %v231_v35, %v304_v0 }
  0x38   : > { %8216 = vst [vmem:[#allocation17_spill] sm:$0xff] %v4977_v40  ;;  %8217 = vst [vmem:[#allocation18_spill] sm:$0xff] %v4984_v31  ;;  %v4987_v42 = vsel %vm267_vm0, %v305_v7, %v375_v22  ;;  %v232_v34 = vrot.slane %v197_v29, 1  ;;  %v518_v53 = vrot.slane %v4984_v31, 1 }
  0x39   : > { %565 = vrot.lane.b32.xlu0 %v4924_v17, %s4656_s18  ;;  %v198_v17 = vld [vmem:[%s4700_s17 + $0xd8] sm:$0xff]  ;;  %8218 = vst [vmem:[#allocation19_spill] sm:$0xff] %v4987_v42  ;;  %v5000_v22 = vsel %vm457_vm1, %v514_v12, %v516_v8  ;;  %v521_v35 = vrot.slane %v4987_v42, 1  ;;  %v652_v42 = vrot.slane %v4819_v19, 2 }
  0x3a   : > { %567 = vrot.lane.b32.xlu1 %v4939_v47, %s4656_s18  ;;  %v4970_v47 = vsel %vm457_vm1, %v508_v48, %v509_v49  ;;  %v307_v48 = vrot.slane %v197_v29, 7  ;;  %v308_v59 = vrot.slane %v198_v17, 7  ;;  %v4994_v49 = vsel %vm457_vm1, %v513_v45, %v514_v12 }
  0x3b   : > { %v519_v29 = vrot.slane %v4981_v10, 1  ;;  %v310_v45 = vrot.slane %v199_v60, 7 }
  0x3c   : > { %v5005_v0 = vsel %vm267_vm0, %v307_v48, %v308_v59  ;;  %v5008_v7 = vsel %vm267_vm0, %v232_v34, %v307_v48 }
  0x3d   : > { %569 = vrot.lane.b32.xlu0 %v4944_v44, %s4656_s18  ;;  %v376_v44 = vrot.slane %v198_v17, 5  ;;  %v233_v17 = vrot.slane %v199_v60, 1  ;;  %8219 = vst [vmem:[#allocation20_spill] sm:$0xff] %v5005_v0  ;;  %8220 = vst [vmem:[#allocation21_spill] sm:$0xff] %v5008_v7  ;;  %v5018_v12 = vsel %vm457_vm1, %v518_v53, %v519_v29  ;;  %v523_v8 = vrot.slane %v5008_v7, 1 }
  0x3e   : > { %571 = vrot.lane.b32.xlu1 %v4960_v11, %s4656_s18  ;;  %v200_v11 = vld [vmem:[%s4700_s17 + $0xe8] sm:$0xff]  ;;  %8222 = vst [vmem:[#allocation23_spill] sm:$0xff] %v5018_v12  ;;  %v524_v34 = vrot.slane %v5005_v0, 1  ;;  %v5023_v60 = vsel %vm457_vm1, %v519_v29, %v521_v35 }
  0x3f   : > { %v311_v23 = vrot.slane %v200_v11, 7  ;;  %v5011_v31 = vsel %vm267_vm0, %v308_v59, %v376_v44  ;;  %8223 = vst [vmem:[#allocation24_spill] sm:$0xff] %v5023_v60  ;;  %v5030_v59 = vsel %vm267_vm0, %v233_v17, %v310_v45 }
  0x40   : > { %8221 = vst [vmem:[#allocation22_spill] sm:$0xff] %v5011_v31  ;;  %v526_v44 = vrot.slane %v5011_v31, 1  ;;  %8225 = vst [vmem:[#allocation26_spill] sm:$0xff] %v5030_v59  ;;  %v5040_v53 = vsel %vm457_vm1, %v523_v8, %v524_v34  ;;  %v528_v29 = vrot.slane %v5030_v59, 1 }
  0x41   : > { %573 = vrot.lane.b32.xlu0 %v4970_v47, %s4656_s18  ;;  %8227 = vst [vmem:[#allocation28_spill] sm:$0xff] %v5040_v53 }
  0x42   : > { %575 = vrot.lane.b32.xlu1 %v4977_v40, %s4656_s18  ;;  %v377_v40 = vrot.slane %v200_v11, 5  ;;  %v5027_v11 = vsel %vm267_vm0, %v310_v45, %v311_v23  ;;  %v5045_v31 = vsel %vm457_vm1, %v524_v34, %v526_v44  ;;  %v625_v45 = vrot.slane %v4708_v13, 2 }
  0x43   : > { %8224 = vst [vmem:[#allocation25_spill] sm:$0xff] %v5027_v11  ;;  %v529_v35 = vrot.slane %v5027_v11, 1  ;;  %8228 = vst [vmem:[#allocation29_spill] sm:$0xff] %v5045_v31  ;;  %v627_v34 = vrot.slane %v4726_v25, 2 }
  0x44   : > { %v5033_v48 = vsel %vm267_vm0, %v311_v23, %v377_v40  ;;  %v624_v40 = vrot.slane %v4711_v14, 2 }
  0x45   : > { %577 = vrot.lane.b32.xlu0 %v4994_v49, %s4656_s18  ;;  %8226 = vst [vmem:[#allocation27_spill] sm:$0xff] %v5033_v48  ;;  %v531_v17 = vrot.slane %v5033_v48, 1  ;;  %v5053_v23 = vsel %vm457_vm1, %v528_v29, %v529_v35  ;;  %v629_v29 = vrot.slane %v4720_v21, 2  ;;  %v630_v48 = vrot.slane %v4717_v20, 2 }
  0x46   : > { %579 = vrot.lane.b32.xlu1 %v5000_v22, %s4656_s18  ;;  %8229 = vst [vmem:[#allocation30_spill] sm:$0xff] %v5053_v23  ;;  %v626_v44 = vsel %vm623_vm2, %v624_v40, %v625_v45  ;;  %v628_v11 = vsel %vm623_vm2, %v625_v45, %v627_v34  ;;  %v1619_v40 = vld [vmem:[%s8133_s1] sm:$0xff] }
  0x47   : > { %v5058_v8 = vsel %vm457_vm1, %v529_v35, %v531_v17  ;;  %v631_v25 = vsel %vm623_vm2, %v629_v29, %v630_v48  ;;  %v632_v35 = vrot.slane %v4729_v26, 2  ;;  %v1623_v34 = vld [vmem:[%s8133_s1 + $0x20] sm:$0xf] }
  0x48   : > { %8230 = vst [vmem:[#allocation31_spill] sm:$0xff] %v5058_v8 }
  0x49   : > { %581 = vrot.lane.b32.xlu0 %v5018_v12, %s4656_s18  ;;  %v633_v17 = vsel %vm623_vm2, %v630_v48, %v632_v35  ;;  %v1622_v48 = vld [vmem:[%s8133_s1 + $0x18] sm:$0xff] }
  0x4a   : > { %583 = vrot.lane.b32.xlu1 %v5023_v60, %s4656_s18 }
  0x4d   : > { %585 = vrot.lane.b32.xlu0 %v5040_v53, %s4656_s18 }
  0x4e   : > { %587 = vrot.lane.b32.xlu1 %v5045_v31, %s4656_s18 }
  0x51   : > { %589 = vrot.lane.b32.xlu0 %v5053_v23, %s4656_s18  ;;  %v642_v23 = vrot.slane %v4784_v58, 2 }
  0x52   : > { %591 = vrot.lane.b32.xlu1 %v5058_v8, %s4656_s18 }
  0x55   : > { %699 = vrot.lane.b32.xlu0 %v626_v44, %s4657_s19 }
  0x56   : > { %701 = vrot.lane.b32.xlu1 %v628_v11, %s4657_s19 }
  0x59   : > { %703 = vrot.lane.b32.xlu0 %v631_v25, %s4657_s19 }
  0x5a   : > { %790 = vrot.lane.b32.xlu1 %v4720_v21, %s4658_s20 }
  0x5d   : > { %792 = vrot.lane.b32.xlu0 %v4717_v20, %s4658_s20 }
  0x5e   : > { %892 = vrot.lane.b32.xlu1 %v4740_v32, %s4659_s21  ;;  %v1620_v32 = vld [vmem:[%s8133_s1 + $0x8] sm:$0xff] }
  0x5f   : > { %v4580_v26 = vpack.c.bf16 %v1620_v32, %v1619_v40 }
  0x61   : > { %894 = vrot.lane.b32.xlu0 %v4752_v38, %s4659_s21  ;;  %4581 = vmatprep.subr.bf16.mxu0 %v4580_v26  ;;  %v1621_v38 = vld [vmem:[%s8133_s1 + $0x10] sm:$0xff] }
  0x62   : > { %993 = vrot.lane.b32.xlu1 %v631_v25, %s4660_s22  ;;  %4583 = vmatpush3.bf16.msra.mxu0 %v4580_v26  ;;  %v4584_v45 = vpack.c.bf16 %v1622_v48, %v1621_v38  ;;  %v637_v25 = vrot.slane %v4761_v43, 2 }
  0x64   : > { %4585 = vmatprep.subr.bf16.mxu0 %v4584_v45 }
  0x65   : > { %995 = vrot.lane.b32.xlu0 %v633_v17, %s4660_s22 }
  0x66   : > { %1089 = vrot.lane.b32.xlu1 %v4711_v14, %s4661_s27  ;;  %4587 = vmatpush3.bf16.msra.mxu0 %v4584_v45 }
  0x67   : > { %4472 = vmatprep.subr.msk.mxu0 %vm1721_vm3, %v1623_v34 }
  0x69   : > { %705 = vrot.lane.b32.xlu0 %v633_v17, %s4657_s19 }
  0x6a   : > { %794 = vrot.lane.b32.xlu1 %v4711_v14, %s4658_s20  ;;  %4473 = vmatpush3.msk.msra.mxu0 %vm1721_vm3, %v1623_v34 }
  0x6d   : > { %1091 = vrot.lane.b32.xlu0 %v4708_v13, %s4661_s27 }
  0x6e   : > { %1179 = vrot.lane.b32.xlu1 %v4732_v27, %s4662_s5 }
  0x71   : > { %796 = vrot.lane.b32.xlu0 %v4708_v13, %s4658_s20 }
  0x72   : > { %896 = vrot.lane.b32.xlu1 %v4732_v27, %s4659_s21  ;;  %v634_v27 = vrot.slane %v4743_v33, 2 }
  0x75   : > { %1181 = vrot.lane.b32.xlu0 %v4749_v37, %s4662_s5 }
  0x76   : > { %1269 = vrot.lane.b32.xlu1 %v626_v44, %s4663_s8 }
  0x79   : > { %898 = vrot.lane.b32.xlu0 %v4749_v37, %s4659_s21  ;;  %v635_v37 = vrot.slane %v4755_v39, 2 }
  0x7a   : > { %997 = vrot.lane.b32.xlu1 %v626_v44, %s4660_s22 }
  0x7b   : > { %v636_v44 = vsel %vm623_vm2, %v634_v27, %v635_v37  ;;  %v639_v27 = vrot.slane %v4773_v52, 2 }
  0x7d   : > { %1271 = vrot.lane.b32.xlu0 %v628_v11, %s4663_s8 }
  0x7e   : > { %999 = vrot.lane.b32.xlu1 %v628_v11, %s4660_s22 }
  0x81   : > { %1093 = vrot.lane.b32.xlu0 %v4743_v33, %s4661_s27 }
  0x82   : > { %798 = vrot.lane.b32.xlu1 %v4743_v33, %s4658_s20 }
  0x85   : > { %1095 = vrot.lane.b32.xlu0 %v4755_v39, %s4661_s27 }
  0x86   : > { %1183 = vrot.lane.b32.xlu1 %v4767_v50, %s4662_s5 }
  0x89   : > { %800 = vrot.lane.b32.xlu0 %v4755_v39, %s4658_s20 }
  0x8a   : > { %900 = vrot.lane.b32.xlu1 %v4767_v50, %s4659_s21  ;;  %v638_v50 = vsel %vm623_vm2, %v635_v37, %v637_v25  ;;  %v640_v37 = vrot.slane %v4770_v51, 2 }
  0x8b   : > { %v5137_v11 = vpop.permute.xlu0 %533 }
  0x8c   : > { %v5140_v29 = vpop.permute.xlu1 %537 }
  0x8d   : > { %1185 = vrot.lane.b32.xlu0 %v4779_v55, %s4662_s5 }
  0x8e   : > { %1273 = vrot.lane.b32.xlu1 %v636_v44, %s4663_s8 }
  0x8f   : > { %v5146_v35 = vpop.permute.xlu0 %535 }
  0x90   : > { %v5148_v17 = vpop.permute.xlu1 %539 }
  0x91   : > { %902 = vrot.lane.b32.xlu0 %v4779_v55, %s4659_s21 }
  0x92   : > { %1001 = vrot.lane.b32.xlu1 %v636_v44, %s4660_s22 }
  0x93   : > { %v5154_v40 = vpop.permute.xlu0 %541 }
  0x94   : > { %v5156_v32 = vpop.permute.xlu1 %543 }
  0x95   : > { %1275 = vrot.lane.b32.xlu0 %v638_v50, %s4663_s8 }
  0x96   : > { %707 = vrot.lane.b32.xlu1 %v636_v44, %s4657_s19 }
  0x97   : > { %v5160_v43 = vpop.permute.xlu0 %545 }
  0x98   : > { %v5162_v26 = vpop.permute.xlu1 %547 }
  0x99   : > { %1003 = vrot.lane.b32.xlu0 %v638_v50, %s4660_s22 }
  0x9a   : > { %1097 = vrot.lane.b32.xlu1 %v4773_v52, %s4661_s27 }
  0x9b   : > { %v5167_v55 = vpop.permute.xlu0 %549 }
  0x9c   : > { %v5169_v38 = vpop.permute.xlu1 %551 }
  0x9d   : > { %709 = vrot.lane.b32.xlu0 %v638_v50, %s4657_s19  ;;  %v641_v50 = vsel %vm623_vm2, %v639_v27, %v640_v37 }
  0x9e   : > { %802 = vrot.lane.b32.xlu1 %v4773_v52, %s4658_s20 }
  0x9f   : > { %v5174_v48 = vpop.permute.xlu0 %553 }
  0xa0   : > { %v5176_v45 = vpop.permute.xlu1 %555 }
  0xa1   : > { %1099 = vrot.lane.b32.xlu0 %v4770_v51, %s4661_s27 }
  0xa2   : > { %1187 = vrot.lane.b32.xlu1 %v4796_v1, %s4662_s5 }
  0xa3   : > { %v5182_v34 = vpop.permute.xlu0 %557 }
  0xa4   : > { %8231 = vst [vmem:[#allocation32_spill] sm:$0xff] %v5182_v34  ;;  %v5186_v44 = vpop.permute.xlu1 %559 }
  0xa5   : > { %8232 = vst [vmem:[#allocation33_spill] sm:$0xff] %v5186_v44  ;;  %804 = vrot.lane.b32.xlu0 %v4770_v51, %s4658_s20  ;;  %v1360_v44 = vsel %vm1359_vm4, %v4711_v14, %v5137_v11 }
  0xa6   : > { %904 = vrot.lane.b32.xlu1 %v4796_v1, %s4659_s21  ;;  %v643_v1 = vsel %vm623_vm2, %v640_v37, %v642_v23 }
  0xa7   : > { %v5192_v25 = vpop.permute.xlu0 %561 }
  0xa8   : > { %8233 = vst [vmem:[#allocation34_spill] sm:$0xff] %v5192_v25  ;;  %v5195_v8 = vpop.permute.xlu1 %563  ;;  %v650_v25 = vrot.slane %v4813_v15, 2 }
  0xa9   : > { %8234 = vst [vmem:[#allocation35_spill] sm:$0xff] %v5195_v8  ;;  %1189 = vrot.lane.b32.xlu0 %v4809_v9, %s4662_s5 }
  0xaa   : > { %1277 = vrot.lane.b32.xlu1 %v641_v50, %s4663_s8  ;;  %v653_v19 = vsel %vm623_vm2, %v650_v25, %v652_v42 }
  0xab   : > { %v5201_v59 = vpop.permute.xlu0 %565 }
  0xac   : > { %8235 = vst [vmem:[#allocation36_spill] sm:$0xff] %v5201_v59  ;;  %v5203_v31 = vpop.permute.xlu1 %567 }
  0xad   : > { %8236 = vst [vmem:[#allocation37_spill] sm:$0xff] %v5203_v31  ;;  %906 = vrot.lane.b32.xlu0 %v4809_v9, %s4659_s21  ;;  %v649_v31 = vrot.slane %v4816_v16, 2 }
  0xae   : > { %1005 = vrot.lane.b32.xlu1 %v641_v50, %s4660_s22 }
  0xaf   : > { %v5209_v27 = vpop.permute.xlu0 %569  ;;  %v651_v0 = vsel %vm623_vm2, %v649_v31, %v650_v25 }
  0xb0   : > { %8237 = vst [vmem:[#allocation38_spill] sm:$0xff] %v5209_v27  ;;  %v5211_v8 = vpop.permute.xlu1 %571 }
  0xb1   : > { %8238 = vst [vmem:[#allocation39_spill] sm:$0xff] %v5211_v8  ;;  %1279 = vrot.lane.b32.xlu0 %v643_v1, %s4663_s8 }
  0xb2   : > { %711 = vrot.lane.b32.xlu1 %v641_v50, %s4657_s19 }
  0xb3   : > { %v5215_v58 = vpop.permute.xlu0 %573 }
  0xb4   : > { %8239 = vst [vmem:[#allocation40_spill] sm:$0xff] %v5215_v58  ;;  %v5217_v59 = vpop.permute.xlu1 %575 }
  0xb5   : > { %8240 = vst [vmem:[#allocation41_spill] sm:$0xff] %v5217_v59  ;;  %1007 = vrot.lane.b32.xlu0 %v643_v1, %s4660_s22 }
  0xb6   : > { %1101 = vrot.lane.b32.xlu1 %v4792_v62, %s4661_s27 }
  0xb7   : > { %v5222_v9 = vpop.permute.xlu0 %577 }
  0xb8   : > { %8241 = vst [vmem:[#allocation42_spill] sm:$0xff] %v5222_v9  ;;  %v5224_v23 = vpop.permute.xlu1 %579  ;;  %v644_v9 = vrot.slane %v4792_v62, 2 }
  0xb9   : > { %8242 = vst [vmem:[#allocation43_spill] sm:$0xff] %v5224_v23  ;;  %713 = vrot.lane.b32.xlu0 %v643_v1, %s4657_s19  ;;  %v645_v23 = vrot.slane %v4789_v61, 2 }
  0xba   : > { %806 = vrot.lane.b32.xlu1 %v4792_v62, %s4658_s20 }
  0xbb   : > { %v5229_v37 = vpop.permute.xlu0 %581 }
  0xbc   : > { %8243 = vst [vmem:[#allocation44_spill] sm:$0xff] %v5229_v37  ;;  %v5231_v50 = vpop.permute.xlu1 %583  ;;  %v646_v37 = vsel %vm623_vm2, %v644_v9, %v645_v23 }
  0xbd   : > { %8244 = vst [vmem:[#allocation45_spill] sm:$0xff] %v5231_v50  ;;  %1103 = vrot.lane.b32.xlu0 %v4789_v61, %s4661_s27 }
  0xbe   : > { %1191 = vrot.lane.b32.xlu1 %v4826_v24, %s4662_s5 }
  0xbf   : > { %v5237_v59 = vpop.permute.xlu0 %585 }
  0xc0   : > { %8245 = vst [vmem:[#allocation46_spill] sm:$0xff] %v5237_v59  ;;  %v5241_v1 = vpop.permute.xlu1 %587  ;;  %v647_v59 = vrot.slane %v4804_v6, 2 }
  0xc1   : > { %8246 = vst [vmem:[#allocation47_spill] sm:$0xff] %v5241_v1  ;;  %808 = vrot.lane.b32.xlu0 %v4789_v61, %s4658_s20 }
  0xc2   : > { %908 = vrot.lane.b32.xlu1 %v4826_v24, %s4659_s21  ;;  %v648_v24 = vsel %vm623_vm2, %v645_v23, %v647_v59 }
  0xc3   : > { %v5247_v50 = vpop.permute.xlu0 %589 }
  0xc4   : > { %8247 = vst [vmem:[#allocation48_spill] sm:$0xff] %v5247_v50  ;;  %v5250_v58 = vpop.permute.xlu1 %591 }
  0xc5   : > { %8248 = vst [vmem:[#allocation49_spill] sm:$0xff] %v5250_v58  ;;  %1193 = vrot.lane.b32.xlu0 %v4829_v28, %s4662_s5 }
  0xc6   : > { %1281 = vrot.lane.b32.xlu1 %v646_v37, %s4663_s8 }
  0xc7   : > { %v700_v1 = vpop.permute.xlu0 %699 }
  0xc8   : > { %v702_v8 = vpop.permute.xlu1 %701 }
  0xc9   : > { %910 = vrot.lane.b32.xlu0 %v4829_v28, %s4659_s21 }
  0xca   : > { %1009 = vrot.lane.b32.xlu1 %v646_v37, %s4660_s22 }
  0xcb   : > { %v5260_v50 = vpop.permute.xlu0 %703 }
  0xcc   : > { %v791_v9 = vpop.permute.xlu1 %790 }
  0xcd   : > { %1283 = vrot.lane.b32.xlu0 %v648_v24, %s4663_s8 }
  0xce   : > { %715 = vrot.lane.b32.xlu1 %v646_v37, %s4657_s19 }
  0xcf   : > { %v793_v58 = vpop.permute.xlu0 %792 }
  0xd0   : > { %v893_v27 = vpop.permute.xlu1 %892 }
  0xd1   : > { %1011 = vrot.lane.b32.xlu0 %v648_v24, %s4660_s22 }
  0xd2   : > { %1105 = vrot.lane.b32.xlu1 %v4816_v16, %s4661_s27 }
  0xd3   : > { %v895_v6 = vpop.permute.xlu0 %894 }
  0xd4   : > { %v994_v28 = vpop.permute.xlu1 %993 }
  0xd5   : > { %717 = vrot.lane.b32.xlu0 %v648_v24, %s4657_s19 }
  0xd6   : > { %810 = vrot.lane.b32.xlu1 %v4816_v16, %s4658_s20 }
  0xd7   : > { %v996_v59 = vpop.permute.xlu0 %995 }
  0xd8   : > { %v1090_v23 = vpop.permute.xlu1 %1089 }
  0xd9   : > { %1107 = vrot.lane.b32.xlu0 %v4813_v15, %s4661_s27 }
  0xda   : > { %1195 = vrot.lane.b32.xlu1 %v4852_v54, %s4662_s5 }
  0xdb   : > { %v5274_v37 = vpop.permute.xlu0 %705 }
  0xdc   : > { %v5278_v53 = vpop.permute.xlu1 %794 }
  0xdd   : > { %812 = vrot.lane.b32.xlu0 %v4813_v15, %s4658_s20 }
  0xde   : > { %912 = vrot.lane.b32.xlu1 %v4852_v54, %s4659_s21  ;;  %v5293_v54 = vsel %vm1390_vm5, %v1360_v44, %v700_v1 }
  0xdf   : > { %v1092_v24 = vpop.permute.xlu0 %1091  ;;  %v1422_v60 = vsel %vm1421_vm6, %v5293_v54, %v791_v9 }
  0xe0   : > { %v1180_v7 = vpop.permute.xlu1 %1179  ;;  %v1455_v12 = vsel %vm1454_vm7, %v1422_v60, %v893_v27  ;;  %v1361_v60 = vsel %vm1359_vm4, %v4708_v13, %v5146_v35 }
  0xe1   : > { %1197 = vrot.lane.b32.xlu0 %v4859_v63, %s4662_s5  ;;  %v1488_v14 = vsel %vm1487_vm8, %v1455_v12, %v994_v28  ;;  %v5313_v12 = vsel %vm1390_vm5, %v1361_v60, %v702_v8 }
  0xe2   : > { %1285 = vrot.lane.b32.xlu1 %v651_v0, %s4663_s8  ;;  %v1521_v11 = vsel %vm1520_vm9, %v1488_v14, %v1090_v23  ;;  %v1423_v42 = vsel %vm1421_vm6, %v5313_v12, %v793_v58  ;;  %v655_v14 = vrot.slane %v4838_v36, 2 }
  0xe3   : > { %v5295_v31 = vpop.permute.xlu0 %796  ;;  %v1554_v1 = vsel %vm1553_vm10, %v1521_v11, %v1180_v7  ;;  %v1456_v25 = vsel %vm1454_vm7, %v1423_v42, %v895_v6  ;;  %v1362_v11 = vsel %vm1359_vm4, %v4720_v21, %v5140_v29 }
  0xe4   : > { %v897_v34 = vpop.permute.xlu1 %896  ;;  %v1489_v13 = vsel %vm1487_vm8, %v1456_v25, %v996_v59 }
  0xe5   : > { %914 = vrot.lane.b32.xlu0 %v4859_v63, %s4659_s21  ;;  %v1522_v35 = vsel %vm1520_vm9, %v1489_v13, %v1092_v24  ;;  %v654_v24 = vrot.slane %v4842_v41, 2 }
  0xe6   : > { %1013 = vrot.lane.b32.xlu1 %v651_v0, %s4660_s22 }
  0xe7   : > { %v1182_v44 = vpop.permute.xlu0 %1181 }
  0xe8   : > { %v1270_v9 = vpop.permute.xlu1 %1269 }
  0xe9   : > { %1287 = vrot.lane.b32.xlu0 %v653_v19, %s4663_s8  ;;  %v1587_v63 = vsel %vm1586_vm11, %v1554_v1, %v1270_v9  ;;  %v656_v9 = vsel %vm623_vm2, %v654_v24, %v655_v14 }
  0xea   : > { %719 = vrot.lane.b32.xlu1 %v651_v0, %s4657_s19  ;;  %4474 = vmatprep.mubr.msk.f32.mxu0 %vm1624_vm12, %v1587_v63  ;;  %v1555_v0 = vsel %vm1553_vm10, %v1522_v35, %v1182_v44  ;;  %v1393_v44 = vsel %vm1390_vm5, %v1362_v11, %v5260_v50  ;;  %v660_v11 = vrot.slane %v4863_v2, 2 }
  0xeb   : > { %v899_v7 = vpop.permute.xlu0 %898  ;;  %v1424_v60 = vsel %vm1421_vm6, %v1393_v44, %v5278_v53  ;;  %v1363_v53 = vsel %vm1359_vm4, %v4717_v20, %v5148_v17 }
  0xec   : > { %v998_v27 = vpop.permute.xlu1 %997  ;;  %v1457_v42 = vsel %vm1454_vm7, %v1424_v60, %v897_v34 }
  0xed   : > { %1015 = vrot.lane.b32.xlu0 %v653_v19, %s4660_s22  ;;  %v1490_v21 = vsel %vm1487_vm8, %v1457_v42, %v998_v27  ;;  %v1394_v27 = vsel %vm1390_vm5, %v1363_v53, %v5274_v37 }
  0xee   : > { %1109 = vrot.lane.b32.xlu1 %v4842_v41, %s4661_s27  ;;  %v1425_v35 = vsel %vm1421_vm6, %v1394_v27, %v5295_v31 }
  0xef   : > { %v1272_v8 = vpop.permute.xlu0 %1271  ;;  %v1458_v20 = vsel %vm1454_vm7, %v1425_v35, %v899_v7 }
  0xf0   : > { %v1588_v28 = vsel %vm1586_vm11, %v1555_v0, %v1272_v8  ;;  %v1000_v23 = vpop.permute.xlu1 %999 }
  0xf1   : > { %721 = vrot.lane.b32.xlu0 %v653_v19, %s4657_s19  ;;  %4475 = vmatmul.mubr.msk.f32.vlgmr.msra.gmra.mrb[0].mxu0 %vm1624_vm12, %v1588_v28  ;;  %v1491_v8 = vsel %vm1487_vm8, %v1458_v20, %v1000_v23 }
  0xf2   : > { %814 = vrot.lane.b32.xlu1 %v4842_v41, %s4658_s20 }
  0xf3   : > { %v1094_v58 = vpop.permute.xlu0 %1093 }
  0xf4   : > { %v5331_v6 = vpop.permute.xlu1 %798  ;;  %v1523_v29 = vsel %vm1520_vm9, %v1490_v21, %v1094_v58 }
  0xf5   : > { %1111 = vrot.lane.b32.xlu0 %v4838_v36, %s4661_s27  ;;  %v1426_v42 = vsel %vm1421_vm6, %v5293_v54, %v5331_v6 }
  0xf6   : > { %1199 = vrot.lane.b32.xlu1 %v4883_v18, %s4662_s5 }
  0xf7   : > { %v1096_v59 = vpop.permute.xlu0 %1095 }
  0xf8   : > { %v1184_v19 = vpop.permute.xlu1 %1183 }
  0xf9   : > { %816 = vrot.lane.b32.xlu0 %v4838_v36, %s4658_s20  ;;  %v1556_v25 = vsel %vm1553_vm10, %v1523_v29, %v1184_v19  ;;  %v659_v19 = vrot.slane %v4866_v3, 2 }
  0xfa   : > { %916 = vrot.lane.b32.xlu1 %v4883_v18, %s4659_s21  ;;  %v657_v18 = vrot.slane %v4845_v46, 2 }
  0xfb   : > { %v5348_v1 = vpop.permute.xlu0 %800  ;;  %v661_v60 = vsel %vm623_vm2, %v659_v19, %v660_v11  ;;  %v1364_v19 = vsel %vm1359_vm4, %v4743_v33, %v5154_v40  ;;  %v8252_v40 = vld [vmem:[#allocation3_spill] sm:$0xff] }
  0xfc   : > { %v901_v63 = vpop.permute.xlu1 %900  ;;  %v658_v46 = vsel %vm623_vm2, %v655_v14, %v657_v18 }
  0xfd   : > { %1201 = vrot.lane.b32.xlu0 %v4889_v30, %s4662_s5  ;;  %v1459_v18 = vsel %vm1454_vm7, %v1426_v42, %v901_v63 }
  0xfe   : > { %1289 = vrot.lane.b32.xlu1 %v656_v9, %s4663_s8 }
  0xff   : > { %v1186_v50 = vpop.permute.xlu0 %1185 }
 0x100   : > { %v1274_v13 = vpop.permute.xlu1 %1273 }
 0x101   : > { %v1589_v34 = vsel %vm1586_vm11, %v1556_v25, %v1274_v13  ;;  %918 = vrot.lane.b32.xlu0 %v4889_v30, %s4659_s21  ;;  %v1524_v30 = vsel %vm1520_vm9, %v1491_v8, %v1096_v59 }
 0x102   : > { %1017 = vrot.lane.b32.xlu1 %v656_v9, %s4660_s22  ;;  %4477 = vmatprep.mubr.msk.f32.mxu0 %vm1624_vm12, %v1589_v34  ;;  %v1557_v37 = vsel %vm1553_vm10, %v1524_v30, %v1186_v50 }
 0x103   : > { %v903_v0 = vpop.permute.xlu0 %902 }
 0x104   : > { %v1002_v17 = vpop.permute.xlu1 %1001 }
 0x105   : > { %1291 = vrot.lane.b32.xlu0 %v658_v46, %s4663_s8  ;;  %v1492_v29 = vsel %vm1487_vm8, %v1459_v18, %v1002_v17 }
 0x106   : > { %723 = vrot.lane.b32.xlu1 %v656_v9, %s4657_s19 }
 0x107   : > { %v1276_v28 = vpop.permute.xlu0 %1275 }
 0x108   : > { %v1590_v58 = vsel %vm1586_vm11, %v1557_v37, %v1276_v28  ;;  %v5381_v24 = vpop.permute.xlu1 %707  ;;  %v8249_v37 = vld [vmem:[#allocation2_spill] sm:$0xff]  ;;  %v8250_v28 = vld [vmem:[#allocation7_spill] sm:$0xff] }
 0x109   : > { %1019 = vrot.lane.b32.xlu0 %v658_v46, %s4660_s22  ;;  %4478 = vmatmul.mubr.msk.f32.gmra.mrb[2].mxu0 %vm1624_vm12, %v1590_v58 }
 0x10a   : > { %1113 = vrot.lane.b32.xlu1 %v4866_v3, %s4661_s27 }
 0x10b   : > { %v1004_v31 = vpop.permute.xlu0 %1003 }
 0x10c   : > { %v1098_v7 = vpop.permute.xlu1 %1097 }
 0x10d   : > { %725 = vrot.lane.b32.xlu0 %v658_v46, %s4657_s19  ;;  %v1525_v50 = vsel %vm1520_vm9, %v1492_v29, %v1098_v7  ;;  %v665_v7 = vrot.slane %v8249_v37, 2 }
 0x10e   : > { %818 = vrot.lane.b32.xlu1 %v4866_v3, %s4658_s20 }
 0x10f   : > { %v5390_v23 = vpop.permute.xlu0 %709 }
 0x110   : > { %v803_v59 = vpop.permute.xlu1 %802 }
 0x111   : > { %1115 = vrot.lane.b32.xlu0 %v4863_v2, %s4661_s27 }
 0x112   : > { %1203 = vrot.lane.b32.xlu1 %v4908_v56, %s4662_s5 }
 0x113   : > { %v1100_v14 = vpop.permute.xlu0 %1099 }
 0x114   : > { %v1188_v44 = vpop.permute.xlu1 %1187 }
 0x115   : > { %820 = vrot.lane.b32.xlu0 %v4863_v2, %s4658_s20  ;;  %v1558_v13 = vsel %vm1553_vm10, %v1525_v50, %v1188_v44  ;;  %v667_v50 = vrot.slane %v8252_v40, 2 }
 0x116   : > { %920 = vrot.lane.b32.xlu1 %v4908_v56, %s4659_s21  ;;  %v662_v56 = vrot.slane %v4869_v4, 2  ;;  %v1427_v4 = vsel %vm1421_vm6, %v5313_v12, %v5348_v1 }
 0x117   : > { %v5402_v9 = vpop.permute.xlu0 %804  ;;  %v1460_v34 = vsel %vm1454_vm7, %v1427_v4, %v903_v0 }
 0x118   : > { %v905_v21 = vpop.permute.xlu1 %904  ;;  %v663_v6 = vsel %vm623_vm2, %v660_v11, %v662_v56  ;;  %v1493_v46 = vsel %vm1487_vm8, %v1460_v34, %v1004_v31  ;;  %v664_v31 = vrot.slane %v4872_v5, 2  ;;  %v1395_v11 = vsel %vm1390_vm5, %v1364_v19, %v5381_v24  ;;  %v8251_v56 = vld [vmem:[#allocation11_spill] sm:$0xff] }
 0x119   : > { %1205 = vrot.lane.b32.xlu0 %v4911_v57, %s4662_s5  ;;  %v1428_v42 = vsel %vm1421_vm6, %v1395_v11, %v803_v59  ;;  %v1365_v59 = vsel %vm1359_vm4, %v4755_v39, %v5156_v32  ;;  %v1366_v11 = vsel %vm1359_vm4, %v4773_v52, %v5160_v43  ;;  %v8257_v43 = vld [vmem:[#allocation6_spill] sm:$0xff] }
 0x11a   : > { %1293 = vrot.lane.b32.xlu1 %v661_v60, %s4663_s8  ;;  %v1461_v29 = vsel %vm1454_vm7, %v1428_v42, %v905_v21 }
 0x11b   : > { %v1190_v25 = vpop.permute.xlu0 %1189 }
 0x11c   : > { %v1278_v53 = vpop.permute.xlu1 %1277 }
 0x11d   : > { %v1591_v54 = vsel %vm1586_vm11, %v1558_v13, %v1278_v53  ;;  %922 = vrot.lane.b32.xlu0 %v4911_v57, %s4659_s21  ;;  %v1526_v57 = vsel %vm1520_vm9, %v1493_v46, %v1100_v14 }
 0x11e   : > { %1021 = vrot.lane.b32.xlu1 %v661_v60, %s4660_s22  ;;  %4480 = vmatprep.mubr.msk.f32.mxu0 %vm1624_vm12, %v1591_v54  ;;  %v1559_v35 = vsel %vm1553_vm10, %v1526_v57, %v1190_v25  ;;  %v1396_v54 = vsel %vm1390_vm5, %v1365_v59, %v5390_v23 }
 0x11f   : > { %v907_v63 = vpop.permute.xlu0 %906  ;;  %v1429_v4 = vsel %vm1421_vm6, %v1396_v54, %v5402_v9  ;;  %v8253_v9 = vld [vmem:[#allocation5_spill] sm:$0xff] }
 0x120   : > { %v1006_v27 = vpop.permute.xlu1 %1005  ;;  %v1462_v39 = vsel %vm1454_vm7, %v1429_v4, %v907_v63 }
 0x121   : > { %1295 = vrot.lane.b32.xlu0 %v663_v6, %s4663_s8  ;;  %v1494_v33 = vsel %vm1487_vm8, %v1461_v29, %v1006_v27 }
 0x122   : > { %727 = vrot.lane.b32.xlu1 %v661_v60, %s4657_s19  ;;  %v666_v60 = vsel %vm623_vm2, %v664_v31, %v665_v7 }
 0x123   : > { %v1280_v20 = vpop.permute.xlu0 %1279 }
 0x124   : > { %v1592_v17 = vsel %vm1586_vm11, %v1559_v35, %v1280_v20  ;;  %v5432_v8 = vpop.permute.xlu1 %711 }
 0x125   : > { %1023 = vrot.lane.b32.xlu0 %v663_v6, %s4660_s22  ;;  %4481 = vmatmul.mubr.msk.f32.gmra.mrb[4].mxu0 %vm1624_vm12, %v1592_v17 }
 0x126   : > { %1117 = vrot.lane.b32.xlu1 %v4872_v5, %s4661_s27 }
 0x127   : > { %v1008_v12 = vpop.permute.xlu0 %1007 }
 0x128   : > { %v1102_v1 = vpop.permute.xlu1 %1101  ;;  %v1495_v27 = vsel %vm1487_vm8, %v1462_v39, %v1008_v12 }
 0x129   : > { %729 = vrot.lane.b32.xlu0 %v663_v6, %s4657_s19  ;;  %v1527_v24 = vsel %vm1520_vm9, %v1494_v33, %v1102_v1  ;;  %v668_v6 = vsel %vm623_vm2, %v665_v7, %v667_v50  ;;  %v669_v7 = vrot.slane %v8253_v9, 2  ;;  %v8256_v50 = vld [vmem:[#allocation15_spill] sm:$0xff] }
 0x12a   : > { %822 = vrot.lane.b32.xlu1 %v4872_v5, %s4658_s20 }
 0x12b   : > { %v5441_v0 = vpop.permute.xlu0 %713 }
 0x12c   : > { %v5443_v30 = vpop.permute.xlu1 %806 }
 0x12d   : > { %1119 = vrot.lane.b32.xlu0 %v8249_v37, %s4661_s27 }
 0x12e   : > { %1207 = vrot.lane.b32.xlu1 %v8250_v28, %s4662_s5 }
 0x12f   : > { %v1104_v58 = vpop.permute.xlu0 %1103 }
 0x130   : > { %v1192_v14 = vpop.permute.xlu1 %1191  ;;  %v1528_v46 = vsel %vm1520_vm9, %v1495_v27, %v1104_v58  ;;  %v8255_v58 = vld [vmem:[#allocation12_spill] sm:$0xff] }
 0x131   : > { %824 = vrot.lane.b32.xlu0 %v8249_v37, %s4658_s20  ;;  %v1560_v13 = vsel %vm1553_vm10, %v1527_v24, %v1192_v14  ;;  %v672_v24 = vrot.slane %v8257_v43, 2 }
 0x132   : > { %924 = vrot.lane.b32.xlu1 %v8250_v28, %s4659_s21  ;;  %v8254_v28 = vld [vmem:[#allocation4_spill] sm:$0xff] }
 0x133   : > { %v5460_v44 = vpop.permute.xlu0 %808  ;;  %v670_v14 = vrot.slane %v8254_v28, 2 }
 0x134   : > { %v909_v18 = vpop.permute.xlu1 %908 }
 0x135   : > { %1209 = vrot.lane.b32.xlu0 %v8251_v56, %s4662_s5  ;;  %v671_v29 = vsel %vm623_vm2, %v669_v7, %v670_v14 }
 0x136   : > { %1297 = vrot.lane.b32.xlu1 %v666_v60, %s4663_s8 }
 0x137   : > { %v1194_v25 = vpop.permute.xlu0 %1193 }
 0x138   : > { %v1282_v53 = vpop.permute.xlu1 %1281  ;;  %v1561_v23 = vsel %vm1553_vm10, %v1528_v46, %v1194_v25 }
 0x139   : > { %v1593_v21 = vsel %vm1586_vm11, %v1560_v13, %v1282_v53  ;;  %926 = vrot.lane.b32.xlu0 %v8251_v56, %s4659_s21 }
 0x13a   : > { %1025 = vrot.lane.b32.xlu1 %v666_v60, %s4660_s22  ;;  %4483 = vmatprep.mubr.msk.f32.mxu0 %vm1624_vm12, %v1593_v21  ;;  %v673_v21 = vsel %vm623_vm2, %v670_v14, %v672_v24  ;;  %v1368_v14 = vsel %vm1359_vm4, %v4792_v62, %v5167_v55 }
 0x13b   : > { %v911_v34 = vpop.permute.xlu0 %910 }
 0x13c   : > { %v1010_v32 = vpop.permute.xlu1 %1009 }
 0x13d   : > { %1299 = vrot.lane.b32.xlu0 %v668_v6, %s4663_s8 }
 0x13e   : > { %731 = vrot.lane.b32.xlu1 %v666_v60, %s4657_s19  ;;  %v1397_v60 = vsel %vm1390_vm5, %v1366_v11, %v5432_v8 }
 0x13f   : > { %v1284_v57 = vpop.permute.xlu0 %1283  ;;  %v1430_v56 = vsel %vm1421_vm6, %v1397_v60, %v5443_v30  ;;  %v1367_v30 = vsel %vm1359_vm4, %v4770_v51, %v5162_v26 }
 0x140   : > { %v1594_v35 = vsel %vm1586_vm11, %v1561_v23, %v1284_v57  ;;  %v5492_v20 = vpop.permute.xlu1 %715  ;;  %v1463_v40 = vsel %vm1454_vm7, %v1430_v56, %v909_v18  ;;  %v1398_v59 = vsel %vm1390_vm5, %v1367_v30, %v5441_v0 }
 0x141   : > { %1027 = vrot.lane.b32.xlu0 %v668_v6, %s4660_s22  ;;  %4484 = vmatmul.mubr.msk.f32.gmra.mrb[6].mxu0 %vm1624_vm12, %v1594_v35  ;;  %v1496_v52 = vsel %vm1487_vm8, %v1463_v40, %v1010_v32  ;;  %v1431_v54 = vsel %vm1421_vm6, %v1398_v59, %v5460_v44  ;;  %v8258_v44 = vld [vmem:[#allocation9_spill] sm:$0xff] }
 0x142   : > { %1121 = vrot.lane.b32.xlu1 %v8253_v9, %s4661_s27  ;;  %v1464_v51 = vsel %vm1454_vm7, %v1431_v54, %v911_v34 }
 0x143   : > { %v1012_v63 = vpop.permute.xlu0 %1011 }
 0x144   : > { %v1106_v17 = vpop.permute.xlu1 %1105  ;;  %v1497_v4 = vsel %vm1487_vm8, %v1464_v51, %v1012_v63  ;;  %v8259_v63 = vld [vmem:[#allocation8_spill] sm:$0xff] }
 0x145   : > { %733 = vrot.lane.b32.xlu0 %v668_v6, %s4657_s19  ;;  %v1529_v8 = vsel %vm1520_vm9, %v1496_v52, %v1106_v17 }
 0x146   : > { %826 = vrot.lane.b32.xlu1 %v8253_v9, %s4658_s20 }
 0x147   : > { %v5501_v12 = vpop.permute.xlu0 %717 }
 0x148   : > { %v5503_v1 = vpop.permute.xlu1 %810 }
 0x149   : > { %1123 = vrot.lane.b32.xlu0 %v8254_v28, %s4661_s27 }
 0x14a   : > { %1211 = vrot.lane.b32.xlu1 %v8255_v58, %s4662_s5 }
 0x14b   : > { %v1108_v31 = vpop.permute.xlu0 %1107 }
 0x14c   : > { %v1196_v19 = vpop.permute.xlu1 %1195  ;;  %v1530_v39 = vsel %vm1520_vm9, %v1497_v4, %v1108_v31  ;;  %v675_v31 = vrot.slane %v8259_v63, 2 }
 0x14d   : > { %828 = vrot.lane.b32.xlu0 %v8254_v28, %s4658_s20  ;;  %v1562_v13 = vsel %vm1553_vm10, %v1529_v8, %v1196_v19  ;;  %v1399_v19 = vsel %vm1390_vm5, %v1368_v14, %v5492_v20 }
 0x14e   : > { %928 = vrot.lane.b32.xlu1 %v8255_v58, %s4659_s21  ;;  %v674_v58 = vrot.slane %v8258_v44, 2 }
 0x14f   : > { %v5520_v42 = vpop.permute.xlu0 %812 }
 0x150   : > { %v913_v33 = vpop.permute.xlu1 %912  ;;  %v676_v60 = vsel %vm623_vm2, %v674_v58, %v675_v31 }
 0x151   : > { %1213 = vrot.lane.b32.xlu0 %v8256_v50, %s4662_s5 }
 0x152   : > { %1301 = vrot.lane.b32.xlu1 %v671_v29, %s4663_s8 }
 0x153   : > { %v1198_v25 = vpop.permute.xlu0 %1197 }
 0x154   : > { %v1286_v53 = vpop.permute.xlu1 %1285  ;;  %v1563_v0 = vsel %vm1553_vm10, %v1530_v39, %v1198_v25  ;;  %v8263_v39 = vld [vmem:[#allocation13_spill] sm:$0xff] }
 0x155   : > { %v1595_v18 = vsel %vm1586_vm11, %v1562_v13, %v1286_v53  ;;  %930 = vrot.lane.b32.xlu0 %v8256_v50, %s4659_s21  ;;  %v8260_v50 = vld [vmem:[#allocation17_spill] sm:$0xff] }
 0x156   : > { %1029 = vrot.lane.b32.xlu1 %v671_v29, %s4660_s22  ;;  %4486 = vmatprep.mubr.msk.f32.mxu0 %vm1624_vm12, %v1595_v18 }
 0x157   : > { %v915_v6 = vpop.permute.xlu0 %914 }
 0x158   : > { %v1014_v26 = vpop.permute.xlu1 %1013 }
 0x159   : > { %1303 = vrot.lane.b32.xlu0 %v673_v21, %s4663_s8 }
 0x15a   : > { %735 = vrot.lane.b32.xlu1 %v671_v29, %s4657_s19  ;;  %v1432_v29 = vsel %vm1421_vm6, %v1399_v19, %v5503_v1  ;;  %v1369_v1 = vsel %vm1359_vm4, %v4789_v61, %v5169_v38 }
 0x15b   : > { %v1288_v32 = vpop.permute.xlu0 %1287  ;;  %v1465_v40 = vsel %vm1454_vm7, %v1432_v29, %v913_v33  ;;  %v1400_v8 = vsel %vm1390_vm5, %v1369_v1, %v5501_v12 }
 0x15c   : > { %v1596_v27 = vsel %vm1586_vm11, %v1563_v0, %v1288_v32  ;;  %v5553_v46 = vpop.permute.xlu1 %719  ;;  %v1498_v62 = vsel %vm1487_vm8, %v1465_v40, %v1014_v26  ;;  %v1433_v13 = vsel %vm1421_vm6, %v1400_v8, %v5520_v42  ;;  %v8262_v42 = vld [vmem:[#allocation14_spill] sm:$0xff] }
 0x15d   : > { %1031 = vrot.lane.b32.xlu0 %v673_v21, %s4660_s22  ;;  %4487 = vmatmul.mubr.msk.f32.gmra.mrb[8].mxu0 %vm1624_vm12, %v1596_v27  ;;  %v1466_v61 = vsel %vm1454_vm7, %v1433_v13, %v915_v6  ;;  %v679_v32 = vrot.slane %v8262_v42, 2  ;;  %v680_v27 = vrot.slane %v8263_v39, 2  ;;  %v8266_v13 = vld [vmem:[#allocation23_spill] sm:$0xff] }
 0x15e   : > { %1125 = vrot.lane.b32.xlu1 %v8258_v44, %s4661_s27 }
 0x15f   : > { %v1016_v34 = vpop.permute.xlu0 %1015 }
 0x160   : > { %v1110_v23 = vpop.permute.xlu1 %1109  ;;  %v1499_v30 = vsel %vm1487_vm8, %v1466_v61, %v1016_v34 }
 0x161   : > { %737 = vrot.lane.b32.xlu0 %v673_v21, %s4657_s19  ;;  %v1531_v20 = vsel %vm1520_vm9, %v1498_v62, %v1110_v23  ;;  %v1370_v23 = vsel %vm1359_vm4, %v4816_v16, %v5174_v48 }
 0x162   : > { %830 = vrot.lane.b32.xlu1 %v8258_v44, %s4658_s20 }
 0x163   : > { %v5562_v57 = vpop.permute.xlu0 %721 }
 0x164   : > { %v5564_v35 = vpop.permute.xlu1 %814 }
 0x165   : > { %1127 = vrot.lane.b32.xlu0 %v8259_v63, %s4661_s27 }
 0x166   : > { %1215 = vrot.lane.b32.xlu1 %v4970_v47, %s4662_s5 }
 0x167   : > { %v1112_v17 = vpop.permute.xlu0 %1111 }
 0x168   : > { %v1200_v7 = vpop.permute.xlu1 %1199  ;;  %v1532_v18 = vsel %vm1520_vm9, %v1499_v30, %v1112_v17  ;;  %v1401_v17 = vsel %vm1390_vm5, %v1370_v23, %v5553_v46 }
 0x169   : > { %832 = vrot.lane.b32.xlu0 %v8259_v63, %s4658_s20  ;;  %v1564_v43 = vsel %vm1553_vm10, %v1531_v20, %v1200_v7  ;;  %v1434_v7 = vsel %vm1421_vm6, %v1401_v17, %v5564_v35  ;;  %v1371_v35 = vsel %vm1359_vm4, %v4813_v15, %v5176_v45 }
 0x16a   : > { %932 = vrot.lane.b32.xlu1 %v4970_v47, %s4659_s21  ;;  %v8261_v47 = vld [vmem:[#allocation10_spill] sm:$0xff] }
 0x16b   : > { %v5581_v11 = vpop.permute.xlu0 %816  ;;  %v677_v55 = vrot.slane %v8261_v47, 2 }
 0x16c   : > { %v917_v56 = vpop.permute.xlu1 %916 }
 0x16d   : > { %1217 = vrot.lane.b32.xlu0 %v8260_v50, %s4662_s5  ;;  %v678_v25 = vsel %vm623_vm2, %v675_v31, %v677_v55  ;;  %v681_v31 = vsel %vm623_vm2, %v679_v32, %v680_v27  ;;  %v1467_v19 = vsel %vm1454_vm7, %v1434_v7, %v917_v56 }
 0x16e   : > { %1305 = vrot.lane.b32.xlu1 %v676_v60, %s4663_s8 }
 0x16f   : > { %v1202_v52 = vpop.permute.xlu0 %1201 }
 0x170   : > { %v1290_v24 = vpop.permute.xlu1 %1289  ;;  %v1565_v12 = vsel %vm1553_vm10, %v1532_v18, %v1202_v52  ;;  %v8267_v18 = vld [vmem:[#allocation32_spill] sm:$0xff] }
 0x171   : > { %v1597_v33 = vsel %vm1586_vm11, %v1564_v43, %v1290_v24  ;;  %934 = vrot.lane.b32.xlu0 %v8260_v50, %s4659_s21  ;;  %v1402_v50 = vsel %vm1390_vm5, %v1371_v35, %v5562_v57 }
 0x172   : > { %1033 = vrot.lane.b32.xlu1 %v676_v60, %s4660_s22  ;;  %4489 = vmatprep.mubr.msk.f32.mxu0 %vm1624_vm12, %v1597_v33  ;;  %v1435_v47 = vsel %vm1421_vm6, %v1402_v50, %v5581_v11  ;;  %v8265_v11 = vld [vmem:[#allocation18_spill] sm:$0xff] }
 0x173   : > { %v919_v53 = vpop.permute.xlu0 %918  ;;  %v684_v61 = vrot.slane %v8265_v11, 2 }
 0x174   : > { %v1018_v38 = vpop.permute.xlu1 %1017  ;;  %v1468_v15 = vsel %vm1454_vm7, %v1435_v47, %v919_v53 }
 0x175   : > { %1307 = vrot.lane.b32.xlu0 %v678_v25, %s4663_s8  ;;  %v1500_v16 = vsel %vm1487_vm8, %v1467_v19, %v1018_v38  ;;  %v685_v38 = vrot.slane %v4981_v10, 2  ;;  %v8270_v19 = vld [vmem:[#allocation33_spill] sm:$0xff] }
 0x176   : > { %739 = vrot.lane.b32.xlu1 %v676_v60, %s4657_s19 }
 0x177   : > { %v1292_v59 = vpop.permute.xlu0 %1291 }
 0x178   : > { %v1598_v21 = vsel %vm1586_vm11, %v1565_v12, %v1292_v59  ;;  %v5614_v54 = vpop.permute.xlu1 %723  ;;  %v1372_v12 = vsel %vm1359_vm4, %v4842_v41, %v8267_v18 }
 0x179   : > { %1035 = vrot.lane.b32.xlu0 %v678_v25, %s4660_s22  ;;  %4490 = vmatmul.mubr.msk.f32.gmra.mrb[10].mxu0 %vm1624_vm12, %v1598_v21  ;;  %v1403_v59 = vsel %vm1390_vm5, %v1372_v12, %v5614_v54  ;;  %v8275_v12 = vld [vmem:[#allocation29_spill] sm:$0xff] }
 0x17a   : > { %1129 = vrot.lane.b32.xlu1 %v8262_v42, %s4661_s27 }
 0x17b   : > { %v1020_v6 = vpop.permute.xlu0 %1019 }
 0x17c   : > { %v1114_v51 = vpop.permute.xlu1 %1113  ;;  %v1501_v20 = vsel %vm1487_vm8, %v1468_v15, %v1020_v6  ;;  %v686_v6 = vsel %vm623_vm2, %v684_v61, %v685_v38 }
 0x17d   : > { %741 = vrot.lane.b32.xlu0 %v678_v25, %s4657_s19  ;;  %v1533_v46 = vsel %vm1520_vm9, %v1500_v16, %v1114_v51 }
 0x17e   : > { %834 = vrot.lane.b32.xlu1 %v8262_v42, %s4658_s20 }
 0x17f   : > { %v5623_v26 = vpop.permute.xlu0 %725 }
 0x180   : > { %v5625_v4 = vpop.permute.xlu1 %818 }
 0x181   : > { %1131 = vrot.lane.b32.xlu0 %v8263_v39, %s4661_s27  ;;  %v1436_v51 = vsel %vm1421_vm6, %v1403_v59, %v5625_v4  ;;  %v1373_v4 = vsel %vm1359_vm4, %v4838_v36, %v8270_v19  ;;  %v8276_v59 = vld [vmem:[#allocation22_spill] sm:$0xff] }
 0x182   : > { %1219 = vrot.lane.b32.xlu1 %v4994_v49, %s4662_s5  ;;  %v1404_v16 = vsel %vm1390_vm5, %v1373_v4, %v5623_v26 }
 0x183   : > { %v1116_v0 = vpop.permute.xlu0 %1115 }
 0x184   : > { %v1204_v34 = vpop.permute.xlu1 %1203 }
 0x185   : > { %836 = vrot.lane.b32.xlu0 %v8263_v39, %s4658_s20  ;;  %v1566_v29 = vsel %vm1553_vm10, %v1533_v46, %v1204_v34  ;;  %v8269_v34 = vld [vmem:[#allocation19_spill] sm:$0xff] }
 0x186   : > { %936 = vrot.lane.b32.xlu1 %v4994_v49, %s4659_s21  ;;  %v8264_v49 = vld [vmem:[#allocation16_spill] sm:$0xff]  ;;  %v687_v23 = vrot.slane %v8269_v34, 2 }
 0x187   : > { %v5642_v58 = vpop.permute.xlu0 %820  ;;  %v682_v48 = vrot.slane %v8264_v49, 2 }
 0x188   : > { %v921_v14 = vpop.permute.xlu1 %920  ;;  %v688_v49 = vsel %vm623_vm2, %v685_v38, %v687_v23 }
 0x189   : > { %1221 = vrot.lane.b32.xlu0 %v5000_v22, %s4662_s5  ;;  %v683_v62 = vsel %vm623_vm2, %v680_v27, %v682_v48  ;;  %v1469_v32 = vsel %vm1454_vm7, %v1436_v51, %v921_v14  ;;  %v8268_v27 = vld [vmem:[#allocation24_spill] sm:$0xff]  ;;  %v1437_v48 = vsel %vm1421_vm6, %v1404_v16, %v5642_v58  ;;  %v8271_v58 = vld [vmem:[#allocation21_spill] sm:$0xff] }
 0x18a   : > { %1309 = vrot.lane.b32.xlu1 %v681_v31, %s4663_s8 }
 0x18b   : > { %v1206_v60 = vpop.permute.xlu0 %1205 }
 0x18c   : > { %v1294_v40 = vpop.permute.xlu1 %1293 }
 0x18d   : > { %v1599_v56 = vsel %vm1586_vm11, %v1566_v29, %v1294_v40  ;;  %938 = vrot.lane.b32.xlu0 %v5000_v22, %s4659_s21  ;;  %v1534_v22 = vsel %vm1520_vm9, %v1501_v20, %v1116_v0  ;;  %v8273_v20 = vld [vmem:[#allocation28_spill] sm:$0xff] }
 0x18e   : > { %1037 = vrot.lane.b32.xlu1 %v681_v31, %s4660_s22  ;;  %4492 = vmatprep.mubr.msk.f32.mxu0 %vm1624_vm12, %v1599_v56  ;;  %v1567_v57 = vsel %vm1553_vm10, %v1534_v22, %v1206_v60 }
 0x18f   : > { %v923_v55 = vpop.permute.xlu0 %922 }
 0x190   : > { %v1022_v45 = vpop.permute.xlu1 %1021  ;;  %v1470_v36 = vsel %vm1454_vm7, %v1437_v48, %v923_v55 }
 0x191   : > { %1311 = vrot.lane.b32.xlu0 %v683_v62, %s4663_s8  ;;  %v1502_v41 = vsel %vm1487_vm8, %v1469_v32, %v1022_v45  ;;  %v8272_v45 = vld [vmem:[#allocation20_spill] sm:$0xff] }
 0x192   : > { %743 = vrot.lane.b32.xlu1 %v681_v31, %s4657_s19 }
 0x193   : > { %v1296_v52 = vpop.permute.xlu0 %1295 }
 0x194   : > { %v1600_v43 = vsel %vm1586_vm11, %v1567_v57, %v1296_v52  ;;  %v5675_v24 = vpop.permute.xlu1 %727  ;;  %v689_v57 = vrot.slane %v8271_v58, 2  ;;  %v690_v52 = vrot.slane %v8272_v45, 2 }
 0x195   : > { %1039 = vrot.lane.b32.xlu0 %v683_v62, %s4660_s22  ;;  %4493 = vmatmul.mubr.msk.f32.gmra.mrb[12].mxu0 %vm1624_vm12, %v1600_v43 }
 0x196   : > { %1133 = vrot.lane.b32.xlu1 %v8265_v11, %s4661_s27  ;;  %v691_v61 = vsel %vm623_vm2, %v689_v57, %v690_v52 }
 0x197   : > { %v1024_v1 = vpop.permute.xlu0 %1023 }
 0x198   : > { %v1118_v33 = vpop.permute.xlu1 %1117  ;;  %v1503_v29 = vsel %vm1487_vm8, %v1470_v36, %v1024_v1  ;;  %v8274_v1 = vld [vmem:[#allocation34_spill] sm:$0xff] }
 0x199   : > { %745 = vrot.lane.b32.xlu0 %v683_v62, %s4657_s19  ;;  %v1535_v54 = vsel %vm1520_vm9, %v1502_v41, %v1118_v33  ;;  %v1374_v33 = vsel %vm1359_vm4, %v4866_v3, %v8274_v1 }
 0x19a   : > { %838 = vrot.lane.b32.xlu1 %v8265_v11, %s4658_s20 }
 0x19b   : > { %v5684_v8 = vpop.permute.xlu0 %729 }
 0x19c   : > { %v5686_v25 = vpop.permute.xlu1 %822 }
 0x19d   : > { %1135 = vrot.lane.b32.xlu0 %v4981_v10, %s4661_s27 }
 0x19e   : > { %1223 = vrot.lane.b32.xlu1 %v8266_v13, %s4662_s5 }
 0x19f   : > { %v1120_v53 = vpop.permute.xlu0 %1119 }
 0x1a0   : > { %v1208_v30 = vpop.permute.xlu1 %1207  ;;  %v1536_v40 = vsel %vm1520_vm9, %v1503_v29, %v1120_v53 }
 0x1a1   : > { %840 = vrot.lane.b32.xlu0 %v4981_v10, %s4658_s20  ;;  %v1568_v31 = vsel %vm1553_vm10, %v1535_v54, %v1208_v30 }
 0x1a2   : > { %940 = vrot.lane.b32.xlu1 %v8266_v13, %s4659_s21  ;;  %v1405_v13 = vsel %vm1390_vm5, %v1374_v33, %v5675_v24 }
 0x1a3   : > { %v5703_v21 = vpop.permute.xlu0 %824  ;;  %v1438_v38 = vsel %vm1421_vm6, %v1405_v13, %v5686_v25  ;;  %v8277_v25 = vld [vmem:[#allocation35_spill] sm:$0xff] }
 0x1a4   : > { %v925_v0 = vpop.permute.xlu1 %924 }
 0x1a5   : > { %1225 = vrot.lane.b32.xlu0 %v8268_v27, %s4662_s5  ;;  %v1471_v18 = vsel %vm1454_vm7, %v1438_v38, %v925_v0  ;;  %v1375_v0 = vsel %vm1359_vm4, %v4863_v2, %v8277_v25 }
 0x1a6   : > { %1313 = vrot.lane.b32.xlu1 %v686_v6, %s4663_s8 }
 0x1a7   : > { %v1210_v17 = vpop.permute.xlu0 %1209 }
 0x1a8   : > { %v1298_v7 = vpop.permute.xlu1 %1297  ;;  %v1569_v26 = vsel %vm1553_vm10, %v1536_v40, %v1210_v17  ;;  %v1406_v17 = vsel %vm1390_vm5, %v1375_v0, %v5684_v8  ;;  %v201_v0 = vld [vmem:[%s4700_s17 + $0xf0] sm:$0xff] }
 0x1a9   : > { %v1601_v14 = vsel %vm1586_vm11, %v1568_v31, %v1298_v7  ;;  %942 = vrot.lane.b32.xlu0 %v8268_v27, %s4659_s21  ;;  %v1439_v7 = vsel %vm1421_vm6, %v1406_v17, %v5703_v21 }
 0x1aa   : > { %1041 = vrot.lane.b32.xlu1 %v686_v6, %s4660_s22  ;;  %4495 = vmatprep.mubr.msk.f32.mxu0 %vm1624_vm12, %v1601_v14 }
 0x1ab   : > { %v927_v46 = vpop.permute.xlu0 %926 }
 0x1ac   : > { %v1026_v60 = vpop.permute.xlu1 %1025  ;;  %v1472_v14 = vsel %vm1454_vm7, %v1439_v7, %v927_v46  ;;  %v8278_v46 = vld [vmem:[#allocation26_spill] sm:$0xff] }
 0x1ad   : > { %1315 = vrot.lane.b32.xlu0 %v688_v49, %s4663_s8  ;;  %v1504_v3 = vsel %vm1487_vm8, %v1471_v18, %v1026_v60 }
 0x1ae   : > { %747 = vrot.lane.b32.xlu1 %v686_v6, %s4657_s19  ;;  %v692_v6 = vrot.slane %v8276_v59, 2 }
 0x1af   : > { %v1300_v35 = vpop.permute.xlu0 %1299 }
 0x1b0   : > { %v1602_v56 = vsel %vm1586_vm11, %v1569_v26, %v1300_v35  ;;  %v5736_v50 = vpop.permute.xlu1 %731  ;;  %v693_v2 = vsel %vm623_vm2, %v690_v52, %v692_v6  ;;  %v8281_v52 = vld [vmem:[#allocation36_spill] sm:$0xff] }
 0x1b1   : > { %1043 = vrot.lane.b32.xlu0 %v688_v49, %s4660_s22  ;;  %4496 = vmatmul.mubr.msk.f32.gmra.mrb[14].mxu0 %vm1624_vm12, %v1602_v56  ;;  %v8279_v56 = vld [vmem:[#allocation25_spill] sm:$0xff] }
 0x1b2   : > { %1137 = vrot.lane.b32.xlu1 %v8271_v58, %s4661_s27 }
 0x1b3   : > { %v1028_v62 = vpop.permute.xlu0 %1027 }
 0x1b4   : > { %v1122_v47 = vpop.permute.xlu1 %1121  ;;  %v1505_v8 = vsel %vm1487_vm8, %v1472_v14, %v1028_v62  ;;  %v8280_v62 = vld [vmem:[#allocation30_spill] sm:$0xff] }
 0x1b5   : > { %749 = vrot.lane.b32.xlu0 %v688_v49, %s4657_s19  ;;  %v1537_v24 = vsel %vm1520_vm9, %v1504_v3, %v1122_v47 }
 0x1b6   : > { %842 = vrot.lane.b32.xlu1 %v8271_v58, %s4658_s20 }
 0x1b7   : > { %v5745_v55 = vpop.permute.xlu0 %733 }
 0x1b8   : > { %v5747_v15 = vpop.permute.xlu1 %826 }
 0x1b9   : > { %1139 = vrot.lane.b32.xlu0 %v8272_v45, %s4661_s27 }
 0x1ba   : > { %1227 = vrot.lane.b32.xlu1 %v8273_v20, %s4662_s5 }
 0x1bb   : > { %v1124_v22 = vpop.permute.xlu0 %1123 }
 0x1bc   : > { %v1212_v43 = vpop.permute.xlu1 %1211  ;;  %v1538_v49 = vsel %vm1520_vm9, %v1505_v8, %v1124_v22  ;;  %v695_v22 = vrot.slane %v8279_v56, 2  ;;  %v313_v8 = vrot.slane %v201_v0, 7 }
 0x1bd   : > { %844 = vrot.lane.b32.xlu0 %v8272_v45, %s4658_s20  ;;  %v1570_v32 = vsel %vm1553_vm10, %v1537_v24, %v1212_v43  ;;  %v1376_v43 = vsel %vm1359_vm4, %v4872_v5, %v8281_v52 }
 0x1be   : > { %944 = vrot.lane.b32.xlu1 %v8273_v20, %s4659_s21  ;;  %v694_v20 = vrot.slane %v8278_v46, 2  ;;  %v1407_v1 = vsel %vm1390_vm5, %v1376_v43, %v5736_v50 }
 0x1bf   : > { %v5764_v53 = vpop.permute.xlu0 %828 }
 0x1c0   : > { %v929_v30 = vpop.permute.xlu1 %928  ;;  %v696_v13 = vsel %vm623_vm2, %v694_v20, %v695_v22 }
 0x1c1   : > { %1229 = vrot.lane.b32.xlu0 %v8275_v12, %s4662_s5 }
 0x1c2   : > { %1317 = vrot.lane.b32.xlu1 %v691_v61, %s4663_s8 }
 0x1c3   : > { %v1214_v51 = vpop.permute.xlu0 %1213 }
 0x1c4   : > { %v1302_v27 = vpop.permute.xlu1 %1301  ;;  %v5777_v41 = vpop.f32.mrb[0].mxu0  ;;  %v1571_v48 = vsel %vm1553_vm10, %v1538_v49, %v1214_v51 }
 0x1c5   : > { %v1603_v34 = vsel %vm1586_vm11, %v1570_v32, %v1302_v27  ;;  %v1951_v23 = vsel %vm1359_vm4, %v5777_v41, 0.0  ;;  %946 = vrot.lane.b32.xlu0 %v8275_v12, %s4659_s21  ;;  %v5787_v54 = vpop.f32.mrb[1].mxu0  ;;  %v8282_v12 = vld [vmem:[#allocation31_spill] sm:$0xff] }
 0x1c6   : > { %v1950_v31 = vsel %vm1359_vm4, %v5787_v54, 0.0  ;;  %1045 = vrot.lane.b32.xlu1 %v691_v61, %s4660_s22  ;;  %4498 = vmatprep.mubr.msk.f32.mxu0 %vm1624_vm12, %v1603_v34  ;;  %v8284_v34 = vld [vmem:[#allocation37_spill] sm:$0xff] }
 0x1c7   : > { %v1952_v19 = vadd.f32 %v1951_v23, %v1950_v31  ;;  %v5798_v4 = vpop.permute.xlu0 %930  ;;  %v1377_v23 = vsel %vm1359_vm4, %v8249_v37, %v8284_v34  ;;  %v202_v31 = vld [vmem:[%s4700_s17 + $0xf8] sm:$0xff] }
 0x1c8   : > { %v1030_v16 = vpop.permute.xlu1 %1029  ;;  %v1408_v7 = vsel %vm1390_vm5, %v1377_v23, %v5745_v55 }
 0x1c9   : > { %1319 = vrot.lane.b32.xlu0 %v693_v2, %s4663_s8  ;;  %v1441_v14 = vsel %vm1421_vm6, %v1408_v7, %v5764_v53 }
 0x1ca   : > { %751 = vrot.lane.b32.xlu1 %v691_v61, %s4657_s19  ;;  %v1440_v61 = vsel %vm1421_vm6, %v1407_v1, %v5747_v15  ;;  %v8283_v15 = vld [vmem:[#allocation27_spill] sm:$0xff]  ;;  %v1474_v49 = vsel %vm1454_vm7, %v1441_v14, %v5798_v4 }
 0x1cb   : > { %v1304_v36 = vpop.permute.xlu0 %1303  ;;  %v1473_v5 = vsel %vm1454_vm7, %v1440_v61, %v929_v30  ;;  %v697_v6 = vrot.slane %v8283_v15, 2 }
 0x1cc   : > { %v1604_v60 = vsel %vm1586_vm11, %v1571_v48, %v1304_v36  ;;  %v5807_v21 = vpop.permute.xlu1 %735  ;;  %v1506_v50 = vsel %vm1487_vm8, %v1473_v5, %v1030_v16  ;;  %v234_v16 = vrot.slane %v201_v0, 1  ;;  %v314_v36 = vrot.slane %v202_v31, 7 }
 0x1cd   : > { %1047 = vrot.lane.b32.xlu0 %v693_v2, %s4660_s22  ;;  %4499 = vmatmul.mubr.msk.f32.gmra.mrb[16].mxu0 %vm1624_vm12, %v1604_v60 }
 0x1ce   : > { %1141 = vrot.lane.b32.xlu1 %v8278_v46, %s4661_s27  ;;  %v315_v4 = vsel %vm267_vm0, %v313_v8, %v314_v36 }
 0x1cf   : > { %v1032_v29 = vpop.permute.xlu0 %1031  ;;  %v888_v52 = vrot.slane %v315_v4, 1 }
 0x1d0   : > { %v1126_v40 = vpop.permute.xlu1 %1125  ;;  %v1507_v55 = vsel %vm1487_vm8, %v1474_v49, %v1032_v29  ;;  %v8286_v49 = vld [vmem:[#allocation39_spill] sm:$0xff] }
 0x1d1   : > { %753 = vrot.lane.b32.xlu0 %v693_v2, %s4657_s19  ;;  %v1539_v24 = vsel %vm1520_vm9, %v1506_v50, %v1126_v40 }
 0x1d2   : > { %846 = vrot.lane.b32.xlu1 %v8278_v46, %s4658_s20 }
 0x1d3   : > { %v5816_v26 = vpop.permute.xlu0 %737 }
 0x1d4   : > { %v5818_v35 = vpop.permute.xlu1 %830 }
 0x1d5   : > { %1143 = vrot.lane.b32.xlu0 %v8279_v56, %s4661_s27 }
 0x1d6   : > { %1231 = vrot.lane.b32.xlu1 %v8280_v62, %s4662_s5 }
 0x1d7   : > { %v1128_v47 = vpop.permute.xlu0 %1127 }
 0x1d8   : > { %v1216_v57 = vpop.permute.xlu1 %1215  ;;  %v1540_v60 = vsel %vm1520_vm9, %v1507_v55, %v1128_v47 }
 0x1d9   : > { %848 = vrot.lane.b32.xlu0 %v8279_v56, %s4658_s20  ;;  %v1572_v30 = vsel %vm1553_vm10, %v1539_v24, %v1216_v57  ;;  %v378_v57 = vrot.slane %v202_v31, 5  ;;  %v8285_v24 = vld [vmem:[#allocation38_spill] sm:$0xff] }
 0x1da   : > { %948 = vrot.lane.b32.xlu1 %v8280_v62, %s4659_s21  ;;  %v410_v62 = vsel %vm267_vm0, %v234_v16, %v313_v8 }
 0x1db   : > { %v5835_v33 = vpop.permute.xlu0 %832  ;;  %v887_v29 = vrot.slane %v410_v62, 1  ;;  %v426_v61 = vsel %vm267_vm0, %v314_v36, %v378_v57  ;;  %v988_v50 = vrot.slane %v410_v62, 2 }
 0x1dc   : > { %v5840_v38 = vpop.permute.xlu1 %932  ;;  %v5842_v18 = vpop.f32.mrb[2].mxu0  ;;  %v991_v7 = vrot.slane %v426_v61, 2 }
 0x1dd   : > { %1233 = vrot.lane.b32.xlu0 %v8282_v12, %s4662_s5  ;;  %v5847_v3 = vpop.f32.mrb[3].mxu0  ;;  %v1955_v27 = vsel %vm1359_vm4, %v5842_v18, 0.0 }
 0x1de   : > { %v1953_v59 = vsel %vm1359_vm4, %v5847_v3, 0.0  ;;  %1321 = vrot.lane.b32.xlu1 %v696_v13, %s4663_s8 }
 0x1df   : > { %v1954_v51 = vadd.f32 %v1953_v59, %v1952_v19  ;;  %v1218_v32 = vpop.permute.xlu0 %1217  ;;  %v698_v19 = vsel %vm623_vm2, %v695_v22, %v697_v6  ;;  %v989_v59 = vrot.slane %v315_v4, 2 }
 0x1e0   : > { %v1306_v25 = vpop.permute.xlu1 %1305  ;;  %v1573_v40 = vsel %vm1553_vm10, %v1540_v60, %v1218_v32 }
 0x1e1   : > { %v1605_v17 = vsel %vm1586_vm11, %v1572_v30, %v1306_v25  ;;  %950 = vrot.lane.b32.xlu0 %v8282_v12, %s4659_s21  ;;  %v1956_v2 = vadd.f32 %v1955_v27, %v1954_v51  ;;  %v890_v12 = vrot.slane %v426_v61, 1  ;;  %v1378_v51 = vsel %vm1359_vm4, %v8253_v9, %v8285_v24 }
 0x1e2   : > { %1049 = vrot.lane.b32.xlu1 %v696_v13, %s4660_s22  ;;  %4501 = vmatprep.mubr.msk.f32.mxu0 %vm1624_vm12, %v1605_v17  ;;  %v1409_v30 = vsel %vm1390_vm5, %v1378_v51, %v5807_v21  ;;  %v990_v25 = vsel %vm623_vm2, %v988_v50, %v989_v59 }
 0x1e3   : > { %v5873_v37 = vpop.permute.xlu0 %934  ;;  %v891_v32 = vsel %vm457_vm1, %v888_v52, %v890_v12  ;;  %v1442_v0 = vsel %vm1421_vm6, %v1409_v30, %v5818_v35  ;;  %v8287_v12 = vld [vmem:[#allocation40_spill] sm:$0xff] }
 0x1e4   : > { %v1034_v48 = vpop.permute.xlu1 %1033  ;;  %v1475_v9 = vsel %vm1454_vm7, %v1442_v0, %v5840_v38  ;;  %v1380_v50 = vsel %vm1359_vm4, %v8258_v44, %v8287_v12 }
 0x1e5   : > { %1323 = vrot.lane.b32.xlu0 %v698_v19, %s4663_s8  ;;  %v1508_v31 = vsel %vm1487_vm8, %v1475_v9, %v1034_v48  ;;  %v1379_v48 = vsel %vm1359_vm4, %v8254_v28, %v8286_v49 }
 0x1e6   : > { %755 = vrot.lane.b32.xlu1 %v696_v13, %s4657_s19  ;;  %v889_v13 = vsel %vm457_vm1, %v887_v29, %v888_v52  ;;  %v1410_v60 = vsel %vm1390_vm5, %v1379_v48, %v5816_v26 }
 0x1e7   : > { %v1308_v53 = vpop.permute.xlu0 %1307 }
 0x1e8   : > { %v1606_v20 = vsel %vm1586_vm11, %v1573_v40, %v1308_v53  ;;  %v5884_v22 = vpop.permute.xlu1 %739  ;;  %v1443_v40 = vsel %vm1421_vm6, %v1410_v60, %v5835_v33 }
 0x1e9   : > { %1051 = vrot.lane.b32.xlu0 %v698_v19, %s4660_s22  ;;  %4502 = vmatmul.mubr.msk.f32.gmra.mrb[18].mxu0 %vm1624_vm12, %v1606_v20  ;;  %v1476_v28 = vsel %vm1454_vm7, %v1443_v40, %v5873_v37 }
 0x1ea   : > { %1145 = vrot.lane.b32.xlu1 %v410_v62, %s4661_s27 }
 0x1eb   : > { %v1036_v47 = vpop.permute.xlu0 %1035 }
 0x1ec   : > { %v1130_v43 = vpop.permute.xlu1 %1129  ;;  %v1509_v20 = vsel %vm1487_vm8, %v1476_v28, %v1036_v47 }
 0x1ed   : > { %757 = vrot.lane.b32.xlu0 %v698_v19, %s4657_s19  ;;  %v1541_v35 = vsel %vm1520_vm9, %v1508_v31, %v1130_v43 }
 0x1ee   : > { %850 = vrot.lane.b32.xlu1 %v410_v62, %s4658_s20 }
 0x1ef   : > { %v5892_v1 = vpop.permute.xlu0 %741 }
 0x1f0   : > { %v835_v5 = vpop.permute.xlu1 %834 }
 0x1f1   : > { %1147 = vrot.lane.b32.xlu0 %v315_v4, %s4661_s27 }
 0x1f2   : > { %1235 = vrot.lane.b32.xlu1 %v889_v13, %s4662_s5 }
 0x1f3   : > { %v1132_v15 = vpop.permute.xlu0 %1131 }
 0x1f4   : > { %v1220_v6 = vpop.permute.xlu1 %1219  ;;  %v1542_v26 = vsel %vm1520_vm9, %v1509_v20, %v1132_v15 }
 0x1f5   : > { %852 = vrot.lane.b32.xlu0 %v315_v4, %s4658_s20  ;;  %v1574_v16 = vsel %vm1553_vm10, %v1541_v35, %v1220_v6 }
 0x1f6   : > { %952 = vrot.lane.b32.xlu1 %v889_v13, %s4659_s21 }
 0x1f7   : > { %v5906_v27 = vpop.permute.xlu0 %836 }
 0x1f8   : > { %v937_v34 = vpop.permute.xlu1 %936  ;;  %v5911_v23 = vpop.f32.mrb[4].mxu0 }
 0x1f9   : > { %1237 = vrot.lane.b32.xlu0 %v891_v32, %s4662_s5  ;;  %v5916_v17 = vpop.f32.mrb[5].mxu0  ;;  %v1959_v38 = vsel %vm1359_vm4, %v5911_v23, 0.0 }
 0x1fa   : > { %v1957_v21 = vsel %vm1359_vm4, %v5916_v17, 0.0  ;;  %1325 = vrot.lane.b32.xlu1 %v990_v25, %s4663_s8 }
 0x1fb   : > { %v1958_v19 = vadd.f32 %v1957_v21, %v1956_v2  ;;  %v1222_v14 = vpop.permute.xlu0 %1221  ;;  %v992_v2 = vsel %vm623_vm2, %v989_v59, %v991_v7  ;;  %v1411_v59 = vsel %vm1390_vm5, %v1380_v50, %v5884_v22  ;;  %v8288_v7 = vld [vmem:[#allocation41_spill] sm:$0xff] }
 0x1fc   : > { %v1310_v8 = vpop.permute.xlu1 %1309  ;;  %v1575_v4 = vsel %vm1553_vm10, %v1542_v26, %v1222_v14  ;;  %v1444_v6 = vsel %vm1421_vm6, %v1411_v59, %v835_v5 }
 0x1fd   : > { %v1607_v36 = vsel %vm1586_vm11, %v1574_v16, %v1310_v8  ;;  %954 = vrot.lane.b32.xlu0 %v891_v32, %s4659_s21  ;;  %v1960_v55 = vadd.f32 %v1959_v38, %v1958_v19  ;;  %v1477_v32 = vsel %vm1454_vm7, %v1444_v6, %v937_v34  ;;  %v1381_v34 = vsel %vm1359_vm4, %v8259_v63, %v8288_v7 }
 0x1fe   : > { %1053 = vrot.lane.b32.xlu1 %v990_v25, %s4660_s22  ;;  %4504 = vmatprep.mubr.msk.f32.mxu0 %vm1624_vm12, %v1607_v36  ;;  %v1412_v14 = vsel %vm1390_vm5, %v1381_v34, %v5892_v1 }
 0x1ff   : > { %v939_v53 = vpop.permute.xlu0 %938  ;;  %v1445_v16 = vsel %vm1421_vm6, %v1412_v14, %v5906_v27 }
 0x200   : > { %v1038_v62 = vpop.permute.xlu1 %1037  ;;  %v1478_v8 = vsel %vm1454_vm7, %v1445_v16, %v939_v53  ;;  %v8289_v53 = vld [vmem:[#allocation42_spill] sm:$0xff] }
 0x201   : > { %1327 = vrot.lane.b32.xlu0 %v992_v2, %s4663_s8  ;;  %v1510_v25 = vsel %vm1487_vm8, %v1477_v32, %v1038_v62  ;;  %v1382_v26 = vsel %vm1359_vm4, %v8262_v42, %v8289_v53 }
 0x202   : > { %1055 = vrot.lane.b32.xlu1 %v992_v2, %s4660_s22 }
 0x203   : > { %v1312_v29 = vpop.permute.xlu0 %1311 }
 0x204   : > { %v1608_v57 = vsel %vm1586_vm11, %v1575_v4, %v1312_v29  ;;  %v744_v52 = vpop.permute.xlu1 %743 }
 0x205   : > { %4505 = vmatmul.mubr.msk.f32.gmra.mrb[20].mxu0 %vm1624_vm12, %v1608_v57  ;;  %v1413_v4 = vsel %vm1390_vm5, %v1382_v26, %v744_v52 }
 0x207   : > { %v1040_v33 = vpop.permute.xlu0 %1039 }
 0x208   : > { %v1134_v43 = vpop.permute.xlu1 %1133  ;;  %v1511_v48 = vsel %vm1487_vm8, %v1478_v8, %v1040_v33 }
 0x209   : > { %v1543_v44 = vsel %vm1520_vm9, %v1510_v25, %v1134_v43  ;;  %v8290_v25 = vld [vmem:[#allocation43_spill] sm:$0xff] }
 0x20b   : > { %v746_v37 = vpop.permute.xlu0 %745 }
 0x20c   : > { %v839_v13 = vpop.permute.xlu1 %838 }
 0x20d   : > { %v1446_v57 = vsel %vm1421_vm6, %v1413_v4, %v839_v13 }
 0x20f   : > { %v1136_v61 = vpop.permute.xlu0 %1135 }
 0x210   : > { %v1224_v47 = vpop.permute.xlu1 %1223  ;;  %v1544_v36 = vsel %vm1520_vm9, %v1511_v48, %v1136_v61  ;;  %v8291_v48 = vld [vmem:[#allocation44_spill] sm:$0xff] }
 0x211   : > { %v1576_v22 = vsel %vm1553_vm10, %v1543_v44, %v1224_v47 }
 0x213   : > { %v841_v15 = vpop.permute.xlu0 %840 }
 0x214   : > { %v941_v24 = vpop.permute.xlu1 %940  ;;  %v5953_v51 = vpop.f32.mrb[6].mxu0 }
 0x215   : > { %v5956_v30 = vpop.f32.mrb[7].mxu0  ;;  %v1963_v5 = vsel %vm1359_vm4, %v5953_v51, 0.0  ;;  %v1479_v61 = vsel %vm1454_vm7, %v1446_v57, %v941_v24  ;;  %v1383_v24 = vsel %vm1359_vm4, %v8263_v39, %v8290_v25 }
 0x216   : > { %v1961_v0 = vsel %vm1359_vm4, %v5956_v30, 0.0 }
 0x217   : > { %v1962_v9 = vadd.f32 %v1961_v0, %v1960_v55  ;;  %v1226_v31 = vpop.permute.xlu0 %1225 }
 0x218   : > { %v1314_v21 = vpop.permute.xlu1 %1313  ;;  %v1577_v63 = vsel %vm1553_vm10, %v1544_v36, %v1226_v31  ;;  %v1384_v36 = vsel %vm1359_vm4, %v8265_v11, %v8291_v48 }
 0x219   : > { %v1609_v35 = vsel %vm1586_vm11, %v1576_v22, %v1314_v21  ;;  %v1964_v19 = vadd.f32 %v1963_v5, %v1962_v9  ;;  %v1414_v9 = vsel %vm1390_vm5, %v1383_v24, %v746_v37 }
 0x21a   : > { %4507 = vmatprep.mubr.msk.f32.mxu0 %vm1624_vm12, %v1609_v35  ;;  %v1447_v31 = vsel %vm1421_vm6, %v1414_v9, %v841_v15 }
 0x21b   : > { %v943_v38 = vpop.permute.xlu0 %942 }
 0x21c   : > { %v1042_v49 = vpop.permute.xlu1 %1041  ;;  %v1480_v5 = vsel %vm1454_vm7, %v1447_v31, %v943_v38 }
 0x21d   : > { %v1512_v12 = vsel %vm1487_vm8, %v1479_v61, %v1042_v49  ;;  %v8292_v61 = vld [vmem:[#allocation45_spill] sm:$0xff] }
 0x21f   : > { %v1316_v55 = vpop.permute.xlu0 %1315 }
 0x220   : > { %v1610_v60 = vsel %vm1586_vm11, %v1577_v63, %v1316_v55  ;;  %v748_v2 = vpop.permute.xlu1 %747 }
 0x221   : > { %4508 = vmatmul.mubr.msk.f32.gmra.mrb[22].mxu0 %vm1624_vm12, %v1610_v60  ;;  %v1415_v63 = vsel %vm1390_vm5, %v1384_v36, %v748_v2 }
 0x223   : > { %v1044_v1 = vpop.permute.xlu0 %1043 }
 0x224   : > { %v1138_v40 = vpop.permute.xlu1 %1137  ;;  %v1513_v7 = vsel %vm1487_vm8, %v1480_v5, %v1044_v1 }
 0x225   : > { %v1545_v59 = vsel %vm1520_vm9, %v1512_v12, %v1138_v40  ;;  %v1385_v12 = vsel %vm1359_vm4, %v4981_v10, %v8292_v61 }
 0x227   : > { %v750_v28 = vpop.permute.xlu0 %749 }
 0x228   : > { %v843_v27 = vpop.permute.xlu1 %842 }
 0x229   : > { %v1448_v60 = vsel %vm1421_vm6, %v1415_v63, %v843_v27 }
 0x22b   : > { %v1140_v62 = vpop.permute.xlu0 %1139 }
 0x22c   : > { %v1228_v20 = vpop.permute.xlu1 %1227  ;;  %v1546_v34 = vsel %vm1520_vm9, %v1513_v7, %v1140_v62  ;;  %v8293_v7 = vld [vmem:[#allocation46_spill] sm:$0xff] }
 0x22d   : > { %v1578_v52 = vsel %vm1553_vm10, %v1545_v59, %v1228_v20 }
 0x22f   : > { %v845_v29 = vpop.permute.xlu0 %844 }
 0x230   : > { %v945_v33 = vpop.permute.xlu1 %944  ;;  %v5985_v43 = vpop.f32.mrb[8].mxu0 }
 0x231   : > { %v5988_v47 = vpop.f32.mrb[9].mxu0  ;;  %v1967_v13 = vsel %vm1359_vm4, %v5985_v43, 0.0  ;;  %v1481_v62 = vsel %vm1454_vm7, %v1448_v60, %v945_v33 }
 0x232   : > { %v1965_v50 = vsel %vm1359_vm4, %v5988_v47, 0.0 }
 0x233   : > { %v1966_v42 = vadd.f32 %v1965_v50, %v1964_v19  ;;  %v1230_v6 = vpop.permute.xlu0 %1229 }
 0x234   : > { %v1318_v32 = vpop.permute.xlu1 %1317  ;;  %v1579_v35 = vsel %vm1553_vm10, %v1546_v34, %v1230_v6  ;;  %v1386_v34 = vsel %vm1359_vm4, %v8271_v58, %v8293_v7 }
 0x235   : > { %v1611_v0 = vsel %vm1586_vm11, %v1578_v52, %v1318_v32  ;;  %v1968_v44 = vadd.f32 %v1967_v13, %v1966_v42  ;;  %v1416_v42 = vsel %vm1390_vm5, %v1385_v12, %v750_v28 }
 0x236   : > { %4510 = vmatprep.mubr.msk.f32.mxu0 %vm1624_vm12, %v1611_v0  ;;  %v1449_v6 = vsel %vm1421_vm6, %v1416_v42, %v845_v29 }
 0x237   : > { %v947_v22 = vpop.permute.xlu0 %946 }
 0x238   : > { %v1046_v21 = vpop.permute.xlu1 %1045  ;;  %v1482_v13 = vsel %vm1454_vm7, %v1449_v6, %v947_v22 }
 0x239   : > { %v1514_v53 = vsel %vm1487_vm8, %v1481_v62, %v1046_v21 }
 0x23b   : > { %v1320_v39 = vpop.permute.xlu0 %1319 }
 0x23c   : > { %v1612_v19 = vsel %vm1586_vm11, %v1579_v35, %v1320_v39  ;;  %v752_v14 = vpop.permute.xlu1 %751 }
 0x23d   : > { %4511 = vmatmul.mubr.msk.f32.gmra.mrb[24].mxu0 %vm1624_vm12, %v1612_v19  ;;  %v1417_v35 = vsel %vm1390_vm5, %v1386_v34, %v752_v14 }
 0x23f   : > { %v1048_v37 = vpop.permute.xlu0 %1047 }
 0x240   : > { %v6010_v16 = vpop.permute.xlu1 %1141  ;;  %v1515_v25 = vsel %vm1487_vm8, %v1482_v13, %v1048_v37 }
 0x241   : > { %v1547_v11 = vsel %vm1520_vm9, %v1514_v53, %v6010_v16 }
 0x243   : > { %v6012_v15 = vpop.permute.xlu0 %753 }
 0x244   : > { %v847_v8 = vpop.permute.xlu1 %846 }
 0x245   : > { %v1450_v19 = vsel %vm1421_vm6, %v1417_v35, %v847_v8 }
 0x247   : > { %v6014_v38 = vpop.permute.xlu0 %1143 }
 0x248   : > { %v6016_v49 = vpop.permute.xlu1 %1231  ;;  %v1548_v24 = vsel %vm1520_vm9, %v1515_v25, %v6014_v38  ;;  %v8296_v25 = vld [vmem:[#allocation49_spill] sm:$0xff] }
 0x249   : > { %v1580_v27 = vsel %vm1553_vm10, %v1547_v11, %v6016_v49 }
 0x24b   : > { %v849_v55 = vpop.permute.xlu0 %848 }
 0x24c   : > { %v949_v1 = vpop.permute.xlu1 %948  ;;  %v6023_v40 = vpop.f32.mrb[10].mxu0 }
 0x24d   : > { %v6026_v20 = vpop.f32.mrb[11].mxu0  ;;  %v1971_v57 = vsel %vm1359_vm4, %v6023_v40, 0.0  ;;  %v1483_v36 = vsel %vm1454_vm7, %v1450_v19, %v949_v1 }
 0x24e   : > { %v1969_v26 = vsel %vm1359_vm4, %v6026_v20, 0.0 }
 0x24f   : > { %v1970_v4 = vadd.f32 %v1969_v26, %v1968_v44  ;;  %v6033_v2 = vpop.permute.xlu0 %1233 }
 0x250   : > { %v6039_v33 = vpop.permute.xlu1 %1321  ;;  %v1581_v10 = vsel %vm1553_vm10, %v1548_v24, %v6033_v2  ;;  %v1389_v24 = vsel %vm1359_vm4, %v8279_v56, %v8296_v25 }
 0x251   : > { %v1613_v50 = vsel %vm1586_vm11, %v1580_v27, %v6039_v33  ;;  %v1972_v59 = vadd.f32 %v1971_v57, %v1970_v4  ;;  %v8294_v4 = vld [vmem:[#allocation47_spill] sm:$0xff]  ;;  %v8295_v27 = vld [vmem:[#allocation48_spill] sm:$0xff] }
 0x252   : > { %4513 = vmatprep.mubr.msk.f32.mxu0 %vm1624_vm12, %v1613_v50  ;;  %v1387_v1 = vsel %vm1359_vm4, %v8272_v45, %v8294_v4  ;;  %v1388_v57 = vsel %vm1359_vm4, %v8278_v46, %v8295_v27 }
 0x253   : > { %v951_v52 = vpop.permute.xlu0 %950  ;;  %v1418_v50 = vsel %vm1390_vm5, %v1387_v1, %v6012_v15 }
 0x254   : > { %v1050_v32 = vpop.permute.xlu1 %1049  ;;  %v1451_v42 = vsel %vm1421_vm6, %v1418_v50, %v849_v55 }
 0x255   : > { %v1516_v60 = vsel %vm1487_vm8, %v1483_v36, %v1050_v32  ;;  %v1484_v45 = vsel %vm1454_vm7, %v1451_v42, %v951_v52 }
 0x257   : > { %v1324_v0 = vpop.permute.xlu0 %1323 }
 0x258   : > { %v756_v44 = vpop.permute.xlu1 %755  ;;  %v1614_v28 = vsel %vm1586_vm11, %v1581_v10, %v1324_v0 }
 0x259   : > { %4514 = vmatmul.mubr.msk.f32.gmra.mrb[26].mxu0 %vm1624_vm12, %v1614_v28 }
 0x25b   : > { %v1052_v9 = vpop.permute.xlu0 %1051 }
 0x25c   : > { %v1146_v29 = vpop.permute.xlu1 %1145  ;;  %v1517_v15 = vsel %vm1487_vm8, %v1484_v45, %v1052_v9 }
 0x25d   : > { %v1549_v53 = vsel %vm1520_vm9, %v1516_v60, %v1146_v29 }
 0x25f   : > { %v758_v31 = vpop.permute.xlu0 %757 }
 0x260   : > { %v851_v5 = vpop.permute.xlu1 %850 }
 0x263   : > { %v1148_v22 = vpop.permute.xlu0 %1147 }
 0x264   : > { %v1236_v21 = vpop.permute.xlu1 %1235  ;;  %v1550_v55 = vsel %vm1520_vm9, %v1517_v15, %v1148_v22 }
 0x265   : > { %v1582_v14 = vsel %vm1553_vm10, %v1549_v53, %v1236_v21 }
 0x267   : > { %v853_v39 = vpop.permute.xlu0 %852 }
 0x268   : > { %v953_v37 = vpop.permute.xlu1 %952  ;;  %v6062_v48 = vpop.f32.mrb[12].mxu0 }
 0x269   : > { %v6065_v63 = vpop.f32.mrb[13].mxu0  ;;  %v1975_v8 = vsel %vm1359_vm4, %v6062_v48, 0.0 }
 0x26a   : > { %v1973_v62 = vsel %vm1359_vm4, %v6065_v63, 0.0 }
 0x26b   : > { %v1974_v58 = vadd.f32 %v1973_v62, %v1972_v59  ;;  %v1238_v26 = vpop.permute.xlu0 %1237  ;;  %v1419_v59 = vsel %vm1390_vm5, %v1388_v57, %v756_v44  ;;  %v1420_v44 = vsel %vm1390_vm5, %v1389_v24, %v758_v31 }
 0x26c   : > { %v1326_v11 = vpop.permute.xlu1 %1325  ;;  %v1452_v6 = vsel %vm1421_vm6, %v1419_v59, %v851_v5  ;;  %v1453_v52 = vsel %vm1421_vm6, %v1420_v44, %v853_v39  ;;  %v1583_v29 = vsel %vm1553_vm10, %v1550_v55, %v1238_v26 }
 0x26d   : > { %v1615_v61 = vsel %vm1586_vm11, %v1582_v14, %v1326_v11  ;;  %v1976_v12 = vadd.f32 %v1975_v8, %v1974_v58  ;;  %v1485_v32 = vsel %vm1454_vm7, %v1452_v6, %v953_v37 }
 0x26e   : > { %4516 = vmatprep.mubr.msk.f32.mxu0 %vm1624_vm12, %v1615_v61 }
 0x26f   : > { %v955_v13 = vpop.permute.xlu0 %954 }
 0x270   : > { %v1054_v46 = vpop.permute.xlu1 %1053  ;;  %v1486_v56 = vsel %vm1454_vm7, %v1453_v52, %v955_v13 }
 0x271   : > { %v1518_v10 = vsel %vm1487_vm8, %v1485_v32, %v1054_v46 }
 0x272   : > { %v1551_v28 = vsel %vm1520_vm9, %v1518_v10, %v6010_v16 }
 0x273   : > { %v1328_v5 = vpop.permute.xlu0 %1327  ;;  %v1584_v21 = vsel %vm1553_vm10, %v1551_v28, %v6016_v49 }
 0x274   : > { %v1616_v9 = vsel %vm1586_vm11, %v1583_v29, %v1328_v5  ;;  %v1056_v7 = vpop.permute.xlu1 %1055  ;;  %v1617_v16 = vsel %vm1586_vm11, %v1584_v21, %v6039_v33 }
 0x275   : > { %v1519_v31 = vsel %vm1487_vm8, %v1486_v56, %v1056_v7  ;;  %4517 = vmatmul.mubr.msk.f32.gmra.mrb[28].mxu0 %vm1624_vm12, %v1616_v9 }
 0x276   : > { %v1552_v22 = vsel %vm1520_vm9, %v1519_v31, %v6014_v38  ;;  %4519 = vmatprep.mubr.msk.f32.mxu0 %vm1624_vm12, %v1617_v16 }
 0x277   : > { %v1585_v49 = vsel %vm1553_vm10, %v1552_v22, %v6033_v2 }
 0x278   : > { %v1618_v34 = vsel %vm1586_vm11, %v1585_v49, %v1324_v0 }
 0x279   : > { %4520 = vmatmul.mubr.msk.f32.gmra.mrb[30].mxu0 %vm1624_vm12, %v1618_v34 }
 0x284   : > { %v6115_v35 = vpop.f32.mrb[14].mxu0 }
 0x285   : > { %v6117_v39 = vpop.f32.mrb[15].mxu0  ;;  %v1979_v38 = vsel %vm1359_vm4, %v6115_v35, 0.0 }
 0x286   : > { %v1977_v19 = vsel %vm1359_vm4, %v6117_v39, 0.0 }
 0x287   : > { %v1978_v33 = vadd.f32 %v1977_v19, %v1976_v12 }
 0x289   : > { %v1980_v37 = vadd.f32 %v1979_v38, %v1978_v33 }
 0x2a0   : > { %v6123_v36 = vpop.f32.mrb[16].mxu0 }
 0x2a1   : > { %v6125_v60 = vpop.f32.mrb[17].mxu0  ;;  %v1983_v62 = vsel %vm1359_vm4, %v6123_v36, 0.0 }
 0x2a2   : > { %v1981_v2 = vsel %vm1359_vm4, %v6125_v60, 0.0 }
 0x2a3   : > { %v1982_v0 = vadd.f32 %v1981_v2, %v1980_v37 }
 0x2a5   : > { %v1984_v53 = vadd.f32 %v1983_v62, %v1982_v0 }
 0x2bc   : > { %v6131_v58 = vpop.f32.mrb[18].mxu0 }
 0x2bd   : > { %v6133_v26 = vpop.f32.mrb[19].mxu0  ;;  %v1987_v11 = vsel %vm1359_vm4, %v6131_v58, 0.0 }
 0x2be   : > { %v1985_v14 = vsel %vm1359_vm4, %v6133_v26, 0.0 }
 0x2bf   : > { %v1986_v8 = vadd.f32 %v1985_v14, %v1984_v53 }
 0x2c1   : > { %v1988_v4 = vadd.f32 %v1987_v11, %v1986_v8 }
 0x2d8   : > { %v6139_v1 = vpop.f32.mrb[20].mxu0 }
 0x2d9   : > { %v1891_v27 = vpop.f32.mrb[21].mxu0  ;;  %v1991_v12 = vsel %vm1359_vm4, %v6139_v1, 0.0 }
 0x2da   : > { %v1989_v57 = vsel %vm1359_vm4, %v1891_v27, 0.0 }
 0x2db   : > { %v1990_v61 = vadd.f32 %v1989_v57, %v1988_v4 }
 0x2dd   : > { %v1992_v50 = vadd.f32 %v1991_v12, %v1990_v61 }
 0x2f4   : > { %v4509_v59 = vpop.f32.mrb[22].mxu0 }
 0x2f5   : > { %v1901_v42 = vpop.f32.mrb[23].mxu0  ;;  %v1995_v45 = vsel %vm1359_vm4, %v4509_v59, 0.0 }
 0x2f6   : > { %v1993_v6 = vsel %vm1359_vm4, %v1901_v42, 0.0 }
 0x2f7   : > { %v1994_v13 = vadd.f32 %v1993_v6, %v1992_v50 }
 0x2f9   : > { %v1996_v32 = vadd.f32 %v1995_v45, %v1994_v13 }
 0x310   : > { %v4512_v46 = vpop.f32.mrb[24].mxu0 }
 0x311   : > { %v1911_v25 = vpop.f32.mrb[25].mxu0  ;;  %v1999_v10 = vsel %vm1359_vm4, %v4512_v46, 0.0 }
 0x312   : > { %v1997_v24 = vsel %vm1359_vm4, %v1911_v25, 0.0 }
 0x313   : > { %v1998_v15 = vadd.f32 %v1997_v24, %v1996_v32 }
 0x315   : > { %v2000_v44 = vadd.f32 %v1999_v10, %v1998_v15 }
 0x32c   : > { %v4515_v55 = vpop.f32.mrb[26].mxu0 }
 0x32d   : > { %v1921_v28 = vpop.f32.mrb[27].mxu0  ;;  %v2003_v5 = vsel %vm1359_vm4, %v4515_v55, 0.0 }
 0x32e   : > { %v2001_v52 = vsel %vm1359_vm4, %v1921_v28, 0.0 }
 0x32f   : > { %v2002_v29 = vadd.f32 %v2001_v52, %v2000_v44 }
 0x331   : > { %v2004_v21 = vadd.f32 %v2003_v5, %v2002_v29 }
 0x348   : > { %v4518_v56 = vpop.f32.mrb[28].mxu0 }
 0x349   : > { %v1931_v9 = vpop.f32.mrb[29].mxu0  ;;  %v2007_v16 = vsel %vm1359_vm4, %v4518_v56, 0.0 }
 0x34a   : > { %v2005_v7 = vsel %vm1359_vm4, %v1931_v9, 0.0 }
 0x34b   : > { %v2006_v31 = vadd.f32 %v2005_v7, %v2004_v21 }
 0x34c   : > { %v4521_v22 = vpop.f32.mrb[30].mxu0 }
 0x34d   : > { %v1941_v49 = vpop.f32.mrb[31].mxu0  ;;  %v2008_v34 = vadd.f32 %v2007_v16, %v2006_v31  ;;  %v2011_v38 = vsel %vm1359_vm4, %v4521_v22, 0.0 }
 0x34e   : > { %v2009_v19 = vsel %vm1359_vm4, %v1941_v49, 0.0 }
 0x34f   : > { %v2010_v33 = vadd.f32 %v2009_v19, %v2008_v34 }
 0x351   : > { %v2012_v37 = vadd.f32 %v2011_v38, %v2010_v33 }
 0x353   : > { %v2013_v2 = vrot.slane %v2012_v37, 4 }
 0x355   : > { %v2014_v0 = vadd.f32 %v2013_v2, %v2012_v37 }
 0x357   : > { %v2015_v62 = vrot.slane %v2014_v0, 2 }
 0x359   : > { %v2016_v53 = vadd.f32 %v2015_v62, %v2014_v0 }
 0x35b   : > { %v2017_v14 = vrot.slane %v2016_v53, 1 }
 0x35d   : > { %v2018_v8 = vadd.f32 %v2017_v14, %v2016_v53 }
 0x35f   : > { %v2019_v11 = vmul.f32 0.00390625, %v2018_v8 }
 0x361   : > { %v6155_v4 = vsub.f32 %v5787_v54, %v2019_v11  ;;  %v6158_v57 = vsub.f32 %v5777_v41, %v2019_v11  ;;  %v6161_v61 = vsub.f32 %v5847_v3, %v2019_v11  ;;  %v6164_v12 = vsub.f32 %v5842_v18, %v2019_v11 }
 0x362   : > { %v6167_v50 = vsub.f32 %v5916_v17, %v2019_v11  ;;  %v6170_v6 = vsub.f32 %v5911_v23, %v2019_v11  ;;  %v6173_v13 = vsub.f32 %v5956_v30, %v2019_v11  ;;  %v6176_v54 = vsub.f32 %v5953_v51, %v2019_v11 }
 0x363   : > { %v6179_v41 = vsub.f32 %v5988_v47, %v2019_v11  ;;  %v6182_v3 = vsub.f32 %v5985_v43, %v2019_v11  ;;  %v6185_v18 = vsub.f32 %v6026_v20, %v2019_v11  ;;  %v6188_v17 = vsub.f32 %v6023_v40, %v2019_v11 }
 0x364   : > { %v6191_v23 = vsub.f32 %v6065_v63, %v2019_v11  ;;  %v6194_v30 = vsub.f32 %v6062_v48, %v2019_v11  ;;  %v6197_v51 = vsub.f32 %v6117_v39, %v2019_v11  ;;  %v6200_v47 = vsub.f32 %v6115_v35, %v2019_v11 }
 0x365   : > { %v6203_v43 = vsub.f32 %v6125_v60, %v2019_v11  ;;  %v6206_v20 = vsub.f32 %v6123_v36, %v2019_v11  ;;  %v6209_v40 = vsub.f32 %v6133_v26, %v2019_v11  ;;  %v6212_v63 = vsub.f32 %v6131_v58, %v2019_v11 }
 0x366   : > { %v6214_v48 = vsub.f32 %v1891_v27, %v2019_v11  ;;  %v6217_v39 = vsub.f32 %v6139_v1, %v2019_v11  ;;  %v6219_v45 = vsub.f32 %v1901_v42, %v2019_v11  ;;  %v6221_v35 = vsub.f32 %v4509_v59, %v2019_v11 }
 0x367   : > { %v6223_v60 = vsub.f32 %v1911_v25, %v2019_v11  ;;  %v6225_v32 = vsub.f32 %v4512_v46, %v2019_v11  ;;  %v6227_v36 = vsub.f32 %v1921_v28, %v2019_v11  ;;  %v6229_v26 = vsub.f32 %v4515_v55, %v2019_v11 }
 0x368   : > { %8297 = vst [vmem:[#allocation2_spill] sm:$0xff] %v6221_v35  ;;  %v6231_v24 = vsub.f32 %v1931_v9, %v2019_v11  ;;  %v6233_v58 = vsub.f32 %v4518_v56, %v2019_v11  ;;  %v6235_v27 = vsub.f32 %v1941_v49, %v2019_v11  ;;  %v6237_v1 = vsub.f32 %v4521_v22, %v2019_v11 }
 0x369   : > { %8298 = vst [vmem:[#allocation7_spill] sm:$0xff] %v6223_v60  ;;  %8299 = vst [vmem:[#allocation11_spill] sm:$0xff] %v6225_v32  ;;  %v2052_v59 = vmul.f32 %v6155_v4, %v6155_v4  ;;  %v2053_v42 = vmul.f32 %v6158_v57, %v6158_v57  ;;  %v2054_v46 = vmul.f32 %v6161_v61, %v6161_v61 }
 0x36a   : > { %8300 = vst [vmem:[#allocation3_spill] sm:$0xff] %v6227_v36  ;;  %8301 = vst [vmem:[#allocation5_spill] sm:$0xff] %v6229_v26  ;;  %v2055_v25 = vmul.f32 %v6164_v12, %v6164_v12  ;;  %v2056_v55 = vmul.f32 %v6167_v50, %v6167_v50  ;;  %v2057_v29 = vmul.f32 %v6170_v6, %v6170_v6 }
 0x36b   : > { %8302 = vst [vmem:[#allocation4_spill] sm:$0xff] %v6231_v24  ;;  %8303 = vst [vmem:[#allocation12_spill] sm:$0xff] %v6233_v58  ;;  %v2084_v15 = vsel %vm1359_vm4, %v2052_v59, 0.0  ;;  %v2085_v10 = vsel %vm1359_vm4, %v2053_v42, 0.0  ;;  %v2087_v28 = vsel %vm1359_vm4, %v2054_v46, 0.0  ;;  %v2058_v56 = vmul.f32 %v6173_v13, %v6173_v13 }
 0x36c   : > { %8304 = vst [vmem:[#allocation15_spill] sm:$0xff] %v6235_v27  ;;  %8305 = vst [vmem:[#allocation6_spill] sm:$0xff] %v6237_v1  ;;  %v2086_v44 = vadd.f32 %v2085_v10, %v2084_v15  ;;  %v2089_v5 = vsel %vm1359_vm4, %v2055_v25, 0.0  ;;  %v2091_v9 = vsel %vm1359_vm4, %v2056_v55, 0.0  ;;  %v2059_v31 = vmul.f32 %v6176_v54, %v6176_v54 }
 0x36d   : > { %v2093_v16 = vsel %vm1359_vm4, %v2057_v29, 0.0  ;;  %v2060_v49 = vmul.f32 %v6179_v41, %v6179_v41  ;;  %v2095_v34 = vsel %vm1359_vm4, %v2058_v56, 0.0  ;;  %v2061_v33 = vmul.f32 %v6182_v3, %v6182_v3 }
 0x36e   : > { %v2088_v52 = vadd.f32 %v2087_v28, %v2086_v44  ;;  %v2097_v38 = vsel %vm1359_vm4, %v2059_v31, 0.0  ;;  %v2062_v2 = vmul.f32 %v6185_v18, %v6185_v18  ;;  %v2063_v53 = vmul.f32 %v6188_v17, %v6188_v17 }
 0x36f   : > { %v2099_v0 = vsel %vm1359_vm4, %v2060_v49, 0.0  ;;  %v2101_v14 = vsel %vm1359_vm4, %v2061_v33, 0.0  ;;  %v2064_v11 = vmul.f32 %v6191_v23, %v6191_v23  ;;  %v2065_v46 = vmul.f32 %v6194_v30, %v6194_v30 }
 0x370   : > { %v2090_v21 = vadd.f32 %v2089_v5, %v2088_v52  ;;  %v2103_v59 = vsel %vm1359_vm4, %v2062_v2, 0.0  ;;  %v2105_v25 = vsel %vm1359_vm4, %v2063_v53, 0.0  ;;  %v2066_v10 = vmul.f32 %v6197_v51, %v6197_v51 }
 0x371   : > { %v2107_v44 = vsel %vm1359_vm4, %v2064_v11, 0.0  ;;  %v2067_v28 = vmul.f32 %v6200_v47, %v6200_v47  ;;  %v2109_v52 = vsel %vm1359_vm4, %v2065_v46, 0.0  ;;  %v2068_v5 = vmul.f32 %v6203_v43, %v6203_v43 }
 0x372   : > { %v2092_v7 = vadd.f32 %v2091_v9, %v2090_v21  ;;  %v2111_v21 = vsel %vm1359_vm4, %v2066_v10, 0.0  ;;  %v2069_v9 = vmul.f32 %v6206_v20, %v6206_v20 }
 0x374   : > { %v2094_v22 = vadd.f32 %v2093_v16, %v2092_v7  ;;  %v2113_v7 = vsel %vm1359_vm4, %v2067_v28, 0.0  ;;  %v2070_v16 = vmul.f32 %v6209_v40, %v6209_v40 }
 0x376   : > { %v2096_v19 = vadd.f32 %v2095_v34, %v2094_v22  ;;  %v2115_v22 = vsel %vm1359_vm4, %v2068_v5, 0.0  ;;  %v2071_v34 = vmul.f32 %v6212_v63, %v6212_v63 }
 0x378   : > { %v2098_v37 = vadd.f32 %v2097_v38, %v2096_v19  ;;  %v2117_v19 = vsel %vm1359_vm4, %v2069_v9, 0.0  ;;  %v2072_v38 = vmul.f32 %v6214_v48, %v6214_v48 }
 0x37a   : > { %v2100_v62 = vadd.f32 %v2099_v0, %v2098_v37  ;;  %v2119_v37 = vsel %vm1359_vm4, %v2070_v16, 0.0  ;;  %v2073_v0 = vmul.f32 %v6217_v39, %v6217_v39 }
 0x37c   : > { %v2102_v8 = vadd.f32 %v2101_v14, %v2100_v62  ;;  %v2121_v62 = vsel %vm1359_vm4, %v2071_v34, 0.0  ;;  %v2074_v14 = vmul.f32 %v6219_v45, %v6219_v45 }
 0x37e   : > { %v2104_v42 = vadd.f32 %v2103_v59, %v2102_v8  ;;  %v2123_v8 = vsel %vm1359_vm4, %v2072_v38, 0.0  ;;  %v2075_v59 = vmul.f32 %v6221_v35, %v6221_v35 }
 0x380   : > { %v2106_v15 = vadd.f32 %v2105_v25, %v2104_v42  ;;  %v2125_v42 = vsel %vm1359_vm4, %v2073_v0, 0.0  ;;  %v2076_v25 = vmul.f32 %v6223_v60, %v6223_v60 }
 0x382   : > { %v2108_v55 = vadd.f32 %v2107_v44, %v2106_v15  ;;  %v2127_v15 = vsel %vm1359_vm4, %v2074_v14, 0.0  ;;  %v2077_v44 = vmul.f32 %v6225_v32, %v6225_v32 }
 0x384   : > { %v2110_v29 = vadd.f32 %v2109_v52, %v2108_v55  ;;  %v2129_v55 = vsel %vm1359_vm4, %v2075_v59, 0.0  ;;  %v2078_v52 = vmul.f32 %v6227_v36, %v6227_v36 }
 0x386   : > { %v2112_v56 = vadd.f32 %v2111_v21, %v2110_v29  ;;  %v2131_v29 = vsel %vm1359_vm4, %v2076_v25, 0.0  ;;  %v2079_v21 = vmul.f32 %v6229_v26, %v6229_v26 }
 0x388   : > { %v2114_v31 = vadd.f32 %v2113_v7, %v2112_v56  ;;  %v2133_v56 = vsel %vm1359_vm4, %v2077_v44, 0.0  ;;  %v2080_v7 = vmul.f32 %v6231_v24, %v6231_v24 }
 0x38a   : > { %v2116_v49 = vadd.f32 %v2115_v22, %v2114_v31  ;;  %v2135_v31 = vsel %vm1359_vm4, %v2078_v52, 0.0  ;;  %v2081_v22 = vmul.f32 %v6233_v58, %v6233_v58 }
 0x38c   : > { %v2118_v33 = vadd.f32 %v2117_v19, %v2116_v49  ;;  %v2137_v49 = vsel %vm1359_vm4, %v2079_v21, 0.0  ;;  %v2082_v19 = vmul.f32 %v6235_v27, %v6235_v27 }
 0x38e   : > { %v2120_v2 = vadd.f32 %v2119_v37, %v2118_v33  ;;  %v2139_v33 = vsel %vm1359_vm4, %v2080_v7, 0.0  ;;  %v2083_v37 = vmul.f32 %v6237_v1, %v6237_v1 }
 0x390   : > { %v2122_v53 = vadd.f32 %v2121_v62, %v2120_v2  ;;  %v2141_v2 = vsel %vm1359_vm4, %v2081_v22, 0.0  ;;  %v2143_v62 = vsel %vm1359_vm4, %v2082_v19, 0.0  ;;  %v2145_v14 = vsel %vm1359_vm4, %v2083_v37, 0.0 }
 0x392   : > { %v2124_v11 = vadd.f32 %v2123_v8, %v2122_v53 }
 0x394   : > { %v2126_v46 = vadd.f32 %v2125_v42, %v2124_v11 }
 0x396   : > { %v2128_v10 = vadd.f32 %v2127_v15, %v2126_v46 }
 0x398   : > { %v2130_v28 = vadd.f32 %v2129_v55, %v2128_v10 }
 0x39a   : > { %v2132_v5 = vadd.f32 %v2131_v29, %v2130_v28 }
 0x39c   : > { %v2134_v9 = vadd.f32 %v2133_v56, %v2132_v5 }
 0x39e   : > { %v2136_v16 = vadd.f32 %v2135_v31, %v2134_v9 }
 0x3a0   : > { %v2138_v34 = vadd.f32 %v2137_v49, %v2136_v16 }
 0x3a2   : > { %v2140_v38 = vadd.f32 %v2139_v33, %v2138_v34 }
 0x3a4   : > { %v2142_v0 = vadd.f32 %v2141_v2, %v2140_v38 }
 0x3a6   : > { %v2144_v53 = vadd.f32 %v2143_v62, %v2142_v0 }
 0x3a8   : > { %v2146_v8 = vadd.f32 %v2145_v14, %v2144_v53 }
 0x3aa   : > { %v2147_v11 = vrot.slane %v2146_v8, 4 }
 0x3ac   : > { %v2148_v59 = vadd.f32 %v2147_v11, %v2146_v8 }
 0x3ae   : > { %v2149_v42 = vrot.slane %v2148_v59, 2 }
 0x3b0   : > { %v2150_v46 = vadd.f32 %v2149_v42, %v2148_v59 }
 0x3b2   : > { %v2151_v25 = vrot.slane %v2150_v46, 1 }
 0x3b4   : > { %v2152_v15 = vadd.f32 %v2151_v25, %v2150_v46 }
 0x3b6   : > { %v2153_v10 = vmul.f32 0.00390625, %v2152_v15 }
 0x3b8   : > { %v2154_v44 = vadd.f32 1e-05, %v2153_v10 }
 0x3ba   : > { %4612 = vrsqrt.f32 %v2154_v44 }
 0x3c4   : > { %v6335_v55 = vpop.eup %4612 }
 0x3c5   : > { %v2156_v28 = vmul.f32 %v6335_v55, %v6155_v4  ;;  %v2157_v52 = vmul.f32 %v6335_v55, %v6158_v57  ;;  %v2158_v4 = vmul.f32 %v6335_v55, %v6161_v61  ;;  %v2159_v57 = vmul.f32 %v6335_v55, %v6164_v12 }
 0x3c6   : > { %v2160_v49 = vmul.f32 %v6335_v55, %v6167_v50  ;;  %v2161_v34 = vmul.f32 %v6335_v55, %v6170_v6  ;;  %v2162_v61 = vmul.f32 %v6335_v55, %v6173_v13  ;;  %v2163_v12 = vmul.f32 %v6335_v55, %v6176_v54 }
 0x3c7   : > { %v2188_v29 = vmax.f32 %v2156_v28, 0.0  ;;  %v2189_v5 = vmax.f32 %v2157_v52, 0.0  ;;  %v2190_v16 = vmax.f32 %v2158_v4, 0.0  ;;  %v2191_v22 = vmax.f32 %v2159_v57, 0.0 }
 0x3c8   : > { %v2192_v37 = vmax.f32 %v2160_v49, 0.0  ;;  %v2193_v2 = vmax.f32 %v2161_v34, 0.0  ;;  %v2164_v0 = vmul.f32 %v6335_v55, %v6179_v41  ;;  %v2165_v50 = vmul.f32 %v6335_v55, %v6182_v3 }
 0x3c9   : > { %v2287_v21 = vrot.slane %v2188_v29, 7  ;;  %v2288_v56 = vrot.slane %v2189_v5, 7  ;;  %v2237_v7 = vrot.slane %v2188_v29, 1  ;;  %v2284_v19 = vrot.slane %v2190_v16, 7 }
 0x3ca   : > { %v2285_v33 = vrot.slane %v2191_v22, 7  ;;  %v2379_v38 = vrot.slane %v2191_v22, 5  ;;  %v2236_v6 = vrot.slane %v2190_v16, 1  ;;  %v2194_v14 = vmax.f32 %v2162_v61, 0.0 }
 0x3cb   : > { %v6342_v9 = vsel %vm267_vm0, %v2287_v21, %v2288_v56  ;;  %v6347_v31 = vsel %vm267_vm0, %v2237_v7, %v2287_v21  ;;  %v2195_v8 = vmax.f32 %v2163_v12, 0.0  ;;  %v2166_v11 = vmul.f32 %v6335_v55, %v6185_v18 }
 0x3cc   : > { %2806 = vrot.lane.b32.xlu1 %v6342_v9, %s4658_s20  ;;  %2804 = vrot.lane.b32.xlu0 %v6347_v31, %s4658_s20  ;;  %v6366_v62 = vsel %vm267_vm0, %v2284_v19, %v2285_v33  ;;  %v6371_v53 = vsel %vm267_vm0, %v2285_v33, %v2379_v38  ;;  %v2380_v41 = vrot.slane %v2189_v5, 5  ;;  %v2290_v59 = vrot.slane %v2192_v37, 7 }
 0x3cd   : > { %v2474_v13 = vrot.slane %v6366_v62, 1  ;;  %v2476_v54 = vrot.slane %v6371_v53, 1  ;;  %v2291_v42 = vrot.slane %v2193_v2, 7  ;;  %v2167_v46 = vmul.f32 %v6335_v55, %v6188_v17 }
 0x3ce   : > { %v6381_v3 = vmul.f32 %v6335_v55, %v6191_v23  ;;  %v2381_v25 = vrot.slane %v2193_v2, 5  ;;  %v6388_v10 = vmul.f32 %v6335_v55, %v6194_v30  ;;  %v2196_v44 = vmax.f32 %v2164_v0, 0.0 }
 0x3cf   : > { %v6384_v15 = vsel %vm457_vm1, %v2474_v13, %v2476_v54  ;;  %v2197_v18 = vmax.f32 %v2165_v50, 0.0  ;;  %v6393_v28 = vsel %vm267_vm0, %v2236_v6, %v2284_v19  ;;  %v2479_v17 = vrot.slane %v6342_v9, 1 }
 0x3d0   : > { %2550 = vrot.lane.b32.xlu1 %v6384_v15, %s4656_s18  ;;  %v2238_v23 = vrot.slane %v2192_v37, 1  ;;  %v2293_v52 = vrot.slane %v2194_v14, 7  ;;  %v2294_v29 = vrot.slane %v2195_v8, 7  ;;  %v2382_v5 = vrot.slane %v2195_v8, 5 }
 0x3d1   : > { %v6397_v21 = vsel %vm267_vm0, %v2290_v59, %v2291_v42  ;;  %v2473_v30 = vrot.slane %v6393_v28, 1  ;;  %v6401_v7 = vsel %vm267_vm0, %v2288_v56, %v2380_v41  ;;  %v2198_v4 = vmax.f32 %v2166_v11, 0.0 }
 0x3d2   : > { %v2199_v57 = vmax.f32 %v2167_v46, 0.0  ;;  %v2481_v16 = vrot.slane %v6401_v7, 1  ;;  %v6405_v22 = vsel %vm267_vm0, %v2291_v42, %v2381_v25  ;;  %v2478_v49 = vrot.slane %v6347_v31, 1 }
 0x3d3   : > { %v2239_v34 = vrot.slane %v2194_v14, 1  ;;  %v2296_v19 = vrot.slane %v2196_v44, 7  ;;  %v6409_v33 = vsel %vm457_vm1, %v2473_v30, %v2474_v13  ;;  %v6412_v38 = vsel %vm267_vm0, %v2238_v23, %v2290_v59 }
 0x3d4   : > { %2548 = vrot.lane.b32.xlu0 %v6409_v33, %s4656_s18  ;;  %v6417_v56 = vsel %vm457_vm1, %v2479_v17, %v2481_v16  ;;  %v2484_v61 = vrot.slane %v6397_v21, 1  ;;  %v2486_v12 = vrot.slane %v6405_v22, 1  ;;  %v2297_v37 = vrot.slane %v2197_v18, 7 }
 0x3d5   : > { %v2383_v2 = vrot.slane %v2197_v18, 5  ;;  %v6422_v0 = vsel %vm267_vm0, %v2293_v52, %v2294_v29  ;;  %2554 = vrot.lane.b32.xlu1 %v6417_v56, %s4656_s18  ;;  %v6427_v50 = vsel %vm267_vm0, %v2294_v29, %v2382_v5  ;;  %v2170_v6 = vmul.f32 %v6335_v55, %v6197_v51 }
 0x3d6   : > { %v2171_v13 = vmul.f32 %v6335_v55, %v6200_v47  ;;  %v2200_v14 = vmax.f32 %v6381_v3, 0.0  ;;  %v2201_v8 = vmax.f32 %v6388_v10, 0.0  ;;  %v2240_v54 = vrot.slane %v2196_v44, 1 }
 0x3d7   : > { %v2299_v11 = vrot.slane %v2198_v4, 7  ;;  %v6436_v41 = vsel %vm457_vm1, %v2478_v49, %v2479_v17  ;;  %v2483_v59 = vrot.slane %v6412_v38, 1  ;;  %v6440_v42 = vsel %vm267_vm0, %v2239_v34, %v2293_v52 }
 0x3d8   : > { %2552 = vrot.lane.b32.xlu0 %v6436_v41, %s4656_s18  ;;  %v6445_v51 = vsel %vm457_vm1, %v2484_v61, %v2486_v12  ;;  %v2489_v47 = vrot.slane %v6422_v0, 1  ;;  %v2491_v46 = vrot.slane %v6427_v50, 1  ;;  %v2300_v3 = vrot.slane %v2199_v57, 7 }
 0x3d9   : > { %v2384_v25 = vrot.slane %v2199_v57, 5  ;;  %v6450_v10 = vsel %vm267_vm0, %v2296_v19, %v2297_v37  ;;  %2558 = vrot.lane.b32.xlu1 %v6445_v51, %s4656_s18  ;;  %v6455_v44 = vsel %vm267_vm0, %v2297_v37, %v2383_v2  ;;  %v2172_v18 = vmul.f32 %v6335_v55, %v6203_v43 }
 0x3da   : > { %8306 = vst [vmem:[#allocation9_spill] sm:$0xff] %v6450_v10  ;;  %v2173_v17 = vmul.f32 %v6335_v55, %v6206_v20  ;;  %v2202_v23 = vmax.f32 %v2170_v6, 0.0  ;;  %v2203_v52 = vmax.f32 %v2171_v13, 0.0  ;;  %v2241_v29 = vrot.slane %v2198_v4, 1 }
 0x3db   : > { %v2302_v5 = vrot.slane %v2200_v14, 7  ;;  %v6462_v30 = vsel %vm457_vm1, %v2483_v59, %v2484_v61  ;;  %v2488_v57 = vrot.slane %v6440_v42, 1  ;;  %v6466_v16 = vsel %vm267_vm0, %v2240_v54, %v2296_v19 }
 0x3dc   : > { %2556 = vrot.lane.b32.xlu0 %v6462_v30, %s4656_s18  ;;  %v6471_v43 = vsel %vm457_vm1, %v2489_v47, %v2491_v46  ;;  %v2494_v20 = vrot.slane %v6450_v10, 1  ;;  %v2496_v49 = vrot.slane %v6455_v44, 1  ;;  %v2303_v4 = vrot.slane %v2201_v8, 7 }
 0x3dd   : > { %v2385_v34 = vrot.slane %v2201_v8, 5  ;;  %v6476_v61 = vsel %vm267_vm0, %v2299_v11, %v2300_v3  ;;  %2562 = vrot.lane.b32.xlu1 %v6471_v43, %s4656_s18  ;;  %v6481_v19 = vsel %vm267_vm0, %v2300_v3, %v2384_v25  ;;  %v2204_v12 = vmax.f32 %v2172_v18, 0.0 }
 0x3de   : > { %8307 = vst [vmem:[#allocation8_spill] sm:$0xff] %v6476_v61  ;;  %v2205_v37 = vmax.f32 %v2173_v17, 0.0  ;;  %v2242_v2 = vrot.slane %v2200_v14, 1  ;;  %v2305_v6 = vrot.slane %v2202_v23, 7  ;;  %v6484_v13 = vsel %vm457_vm1, %v2488_v57, %v2489_v47 }
 0x3df   : > { %v2493_v54 = vrot.slane %v6466_v16, 1  ;;  %v6488_v8 = vsel %vm267_vm0, %v2241_v29, %v2299_v11  ;;  %v6493_v59 = vsel %vm457_vm1, %v2494_v20, %v2496_v49  ;;  %v2499_v46 = vrot.slane %v6476_v61, 1 }
 0x3e0   : > { %8308 = vst [vmem:[#allocation17_spill] sm:$0xff] %v6488_v8  ;;  %2560 = vrot.lane.b32.xlu0 %v6484_v13, %s4656_s18  ;;  %v2501_v3 = vrot.slane %v6481_v19, 1  ;;  %v2306_v14 = vrot.slane %v2203_v52, 7  ;;  %v2386_v25 = vrot.slane %v2203_v52, 5  ;;  %v6498_v47 = vsel %vm267_vm0, %v2302_v5, %v2303_v4 }
 0x3e1   : > { %2566 = vrot.lane.b32.xlu1 %v6493_v59, %s4656_s18  ;;  %v6503_v11 = vsel %vm267_vm0, %v2303_v4, %v2385_v34  ;;  %v2243_v18 = vrot.slane %v2202_v23, 1  ;;  %v2308_v17 = vrot.slane %v2204_v12, 7  ;;  %v6506_v29 = vsel %vm457_vm1, %v2493_v54, %v2494_v20 }
 0x3e2   : > { %v2498_v57 = vrot.slane %v6488_v8, 1  ;;  %v6510_v49 = vsel %vm267_vm0, %v2242_v2, %v2302_v5  ;;  %v6515_v52 = vsel %vm457_vm1, %v2499_v46, %v2501_v3  ;;  %v2504_v1 = vrot.slane %v6498_v47, 1 }
 0x3e3   : > { %v2506_v4 = vrot.slane %v6503_v11, 1  ;;  %v2309_v23 = vrot.slane %v2205_v37, 7  ;;  %v2387_v34 = vrot.slane %v2205_v37, 5  ;;  %v6520_v20 = vsel %vm267_vm0, %v2305_v6, %v2306_v14 }
 0x3e4   : > { %2564 = vrot.lane.b32.xlu0 %v6506_v29, %s4656_s18  ;;  %v6525_v5 = vsel %vm267_vm0, %v2306_v14, %v2386_v25  ;;  %v2244_v2 = vrot.slane %v2204_v12, 1  ;;  %v6528_v54 = vsel %vm457_vm1, %v2498_v57, %v2499_v46  ;;  %v2503_v3 = vrot.slane %v6510_v49, 1 }
 0x3e5   : > { %2570 = vrot.lane.b32.xlu1 %v6515_v52, %s4656_s18  ;;  %v6532_v27 = vsel %vm267_vm0, %v2243_v18, %v2305_v6  ;;  %v6537_v37 = vsel %vm457_vm1, %v2504_v1, %v2506_v4  ;;  %v2509_v58 = vrot.slane %v6520_v20, 1  ;;  %v2511_v14 = vrot.slane %v6525_v5, 1 }
 0x3e6   : > { %v6542_v12 = vsel %vm267_vm0, %v2308_v17, %v2309_v23  ;;  %v6547_v46 = vsel %vm267_vm0, %v2309_v23, %v2387_v34  ;;  %v6550_v6 = vsel %vm457_vm1, %v2503_v3, %v2504_v1  ;;  %v2508_v25 = vrot.slane %v6532_v27, 1 }
 0x3e7   : > { %v6554_v18 = vsel %vm267_vm0, %v2244_v2, %v2308_v17  ;;  %v6559_v57 = vsel %vm457_vm1, %v2509_v58, %v2511_v14  ;;  %v2514_v4 = vrot.slane %v6542_v12, 1  ;;  %v2516_v24 = vrot.slane %v6547_v46, 1 }
 0x3e8   : > { %2568 = vrot.lane.b32.xlu0 %v6528_v54, %s4656_s18  ;;  %v6566_v1 = vsel %vm457_vm1, %v2508_v25, %v2509_v58  ;;  %v2513_v23 = vrot.slane %v6554_v18, 1  ;;  %v2639_v34 = vrot.slane %v6366_v62, 2  ;;  %v2641_v2 = vrot.slane %v6371_v53, 2 }
 0x3e9   : > { %2574 = vrot.lane.b32.xlu1 %v6537_v37, %s4656_s18  ;;  %v6572_v17 = vsel %vm457_vm1, %v2514_v4, %v2516_v24  ;;  %v2638_v58 = vrot.slane %v6393_v28, 2  ;;  %v2644_v25 = vrot.slane %v6342_v9, 2  ;;  %v2643_v53 = vrot.slane %v6347_v31, 2 }
 0x3ea   : > { %v6579_v3 = vsel %vm457_vm1, %v2513_v23, %v2514_v4  ;;  %v2642_v14 = vsel %vm623_vm2, %v2639_v34, %v2641_v2  ;;  %v2646_v23 = vrot.slane %v6401_v7, 2  ;;  %v3627_v2 = vld [vmem:[%s8134_s2 + $0x10] sm:$0xff] }
 0x3eb   : > { %v2640_v24 = vsel %vm623_vm2, %v2638_v58, %v2639_v34  ;;  %v2645_v4 = vsel %vm623_vm2, %v2643_v53, %v2644_v25  ;;  %v3628_v58 = vld [vmem:[%s8134_s2 + $0x18] sm:$0xff]  ;;  %v3629_v53 = vld [vmem:[%s8134_s2 + $0x20] sm:$0xf] }
 0x3ec   : > { %2572 = vrot.lane.b32.xlu0 %v6550_v6, %s4656_s18  ;;  %v2647_v34 = vsel %vm623_vm2, %v2644_v25, %v2646_v23  ;;  %v4592_v25 = vpack.c.bf16 %v3628_v58, %v3627_v2  ;;  %v2654_v23 = vrot.slane %v6422_v0, 2  ;;  %v2656_v58 = vrot.slane %v6427_v50, 2 }
 0x3ed   : > { %2578 = vrot.lane.b32.xlu1 %v6559_v57, %s4656_s18 }
 0x3f0   : > { %2576 = vrot.lane.b32.xlu0 %v6566_v1, %s4656_s18 }
 0x3f1   : > { %2582 = vrot.lane.b32.xlu1 %v6572_v17, %s4656_s18 }
 0x3f4   : > { %2580 = vrot.lane.b32.xlu0 %v6579_v3, %s4656_s18 }
 0x3f5   : > { %2715 = vrot.lane.b32.xlu1 %v2642_v14, %s4657_s19 }
 0x3f8   : > { %2713 = vrot.lane.b32.xlu0 %v2640_v24, %s4657_s19 }
 0x3f9   : > { %2908 = vrot.lane.b32.xlu1 %v6417_v56, %s4659_s21  ;;  %v3625_v56 = vld [vmem:[%s8134_s2] sm:$0xff] }
 0x3fc   : > { %2906 = vrot.lane.b32.xlu0 %v6436_v41, %s4659_s21  ;;  %v3626_v41 = vld [vmem:[%s8134_s2 + $0x8] sm:$0xff] }
 0x3fd   : > { %2717 = vrot.lane.b32.xlu1 %v2645_v4, %s4657_s19  ;;  %v4588_v7 = vpack.c.bf16 %v3626_v41, %v3625_v56 }
 0x3ff   : > { %4589 = vmatprep.subr.bf16.mxu1 %v4588_v7 }
 0x400   : > { %3007 = vrot.lane.b32.xlu0 %v2645_v4, %s4660_s22  ;;  %4591 = vmatpush3.bf16.msra.mxu1 %v4588_v7 }
 0x401   : > { %3103 = vrot.lane.b32.xlu1 %v6393_v28, %s4661_s27  ;;  %4593 = vmatprep.subr.bf16.mxu1 %v4592_v25 }
 0x404   : > { %3009 = vrot.lane.b32.xlu0 %v2647_v34, %s4660_s22  ;;  %4595 = vmatpush3.bf16.msra.mxu1 %v4592_v25 }
 0x405   : > { %2808 = vrot.lane.b32.xlu1 %v6393_v28, %s4658_s20  ;;  %4530 = vmatprep.subr.msk.mxu1 %vm1721_vm3, %v3629_v53 }
 0x408   : > { %2719 = vrot.lane.b32.xlu0 %v2647_v34, %s4657_s19  ;;  %4531 = vmatpush3.msk.msra.mxu1 %vm1721_vm3, %v3629_v53  ;;  %v2657_v53 = vsel %vm623_vm2, %v2654_v23, %v2656_v58 }
 0x409   : > { %3193 = vrot.lane.b32.xlu1 %v6409_v33, %s4662_s5 }
 0x40c   : > { %3105 = vrot.lane.b32.xlu0 %v6366_v62, %s4661_s27 }
 0x40d   : > { %2910 = vrot.lane.b32.xlu1 %v6409_v33, %s4659_s21  ;;  %v2648_v33 = vrot.slane %v6412_v38, 2 }
 0x410   : > { %2810 = vrot.lane.b32.xlu0 %v6366_v62, %s4658_s20 }
 0x411   : > { %3283 = vrot.lane.b32.xlu1 %v2640_v24, %s4663_s8 }
 0x414   : > { %3195 = vrot.lane.b32.xlu0 %v6384_v15, %s4662_s5 }
 0x415   : > { %3011 = vrot.lane.b32.xlu1 %v2640_v24, %s4660_s22  ;;  %v2651_v24 = vrot.slane %v6405_v22, 2 }
 0x418   : > { %2912 = vrot.lane.b32.xlu0 %v6384_v15, %s4659_s21  ;;  %v2649_v15 = vrot.slane %v6397_v21, 2 }
 0x419   : > { %3013 = vrot.lane.b32.xlu1 %v2642_v14, %s4660_s22 }
 0x41c   : > { %3285 = vrot.lane.b32.xlu0 %v2642_v14, %s4663_s8  ;;  %v2650_v14 = vsel %vm623_vm2, %v2648_v33, %v2649_v15 }
 0x41d   : > { %2812 = vrot.lane.b32.xlu1 %v6412_v38, %s4658_s20 }
 0x420   : > { %3107 = vrot.lane.b32.xlu0 %v6412_v38, %s4661_s27 }
 0x421   : > { %3197 = vrot.lane.b32.xlu1 %v6462_v30, %s4662_s5 }
 0x424   : > { %3109 = vrot.lane.b32.xlu0 %v6397_v21, %s4661_s27 }
 0x425   : > { %2914 = vrot.lane.b32.xlu1 %v6462_v30, %s4659_s21  ;;  %v2652_v30 = vsel %vm623_vm2, %v2649_v15, %v2651_v24 }
 0x428   : > { %2814 = vrot.lane.b32.xlu0 %v6397_v21, %s4658_s20 }
 0x429   : > { %3287 = vrot.lane.b32.xlu1 %v2650_v14, %s4663_s8 }
 0x42c   : > { %3199 = vrot.lane.b32.xlu0 %v6445_v51, %s4662_s5 }
 0x42d   : > { %3015 = vrot.lane.b32.xlu1 %v2650_v14, %s4660_s22 }
 0x430   : > { %2916 = vrot.lane.b32.xlu0 %v6445_v51, %s4659_s21  ;;  %v2653_v51 = vrot.slane %v6440_v42, 2 }
 0x431   : > { %2721 = vrot.lane.b32.xlu1 %v2650_v14, %s4657_s19 }
 0x432   : > { %v2655_v56 = vsel %vm623_vm2, %v2653_v51, %v2654_v23  ;;  %v2658_v51 = vrot.slane %v6466_v16, 2  ;;  %v2659_v23 = vrot.slane %v6450_v10, 2 }
 0x434   : > { %3289 = vrot.lane.b32.xlu0 %v2652_v30, %s4663_s8 }
 0x435   : > { %3111 = vrot.lane.b32.xlu1 %v6440_v42, %s4661_s27 }
 0x438   : > { %3017 = vrot.lane.b32.xlu0 %v2652_v30, %s4660_s22 }
 0x439   : > { %2816 = vrot.lane.b32.xlu1 %v6440_v42, %s4658_s20 }
 0x43c   : > { %2723 = vrot.lane.b32.xlu0 %v2652_v30, %s4657_s19 }
 0x43d   : > { %3201 = vrot.lane.b32.xlu1 %v6484_v13, %s4662_s5 }
 0x43e   : > { %v6668_v4 = vpop.permute.xlu1 %2806  ;;  %v6675_v22 = vpop.permute.xlu0 %2804 }
 0x440   : > { %3113 = vrot.lane.b32.xlu0 %v6422_v0, %s4661_s27 }
 0x441   : > { %2918 = vrot.lane.b32.xlu1 %v6484_v13, %s4659_s21 }
 0x442   : > { %v6681_v34 = vpop.permute.xlu1 %2550 }
 0x444   : > { %2818 = vrot.lane.b32.xlu0 %v6422_v0, %s4658_s20 }
 0x445   : > { %3291 = vrot.lane.b32.xlu1 %v2655_v56, %s4663_s8 }
 0x446   : > { %v6687_v41 = vpop.permute.xlu0 %2548 }
 0x447   : > { %v6689_v7 = vpop.permute.xlu1 %2554 }
 0x448   : > { %3203 = vrot.lane.b32.xlu0 %v6471_v43, %s4662_s5 }
 0x449   : > { %3019 = vrot.lane.b32.xlu1 %v2655_v56, %s4660_s22 }
 0x44a   : > { %v6694_v2 = vpop.permute.xlu0 %2552 }
 0x44b   : > { %v6696_v13 = vpop.permute.xlu1 %2558 }
 0x44c   : > { %2920 = vrot.lane.b32.xlu0 %v6471_v43, %s4659_s21 }
 0x44d   : > { %2725 = vrot.lane.b32.xlu1 %v2655_v56, %s4657_s19 }
 0x44e   : > { %v6702_v25 = vpop.permute.xlu0 %2556 }
 0x44f   : > { %v6705_v33 = vpop.permute.xlu1 %2562 }
 0x450   : > { %3293 = vrot.lane.b32.xlu0 %v2657_v53, %s4663_s8 }
 0x451   : > { %3115 = vrot.lane.b32.xlu1 %v6466_v16, %s4661_s27 }
 0x452   : > { %v6710_v15 = vpop.permute.xlu0 %2560 }
 0x453   : > { %v6712_v14 = vpop.permute.xlu1 %2566 }
 0x454   : > { %8309 = vst [vmem:[#allocation10_spill] sm:$0xff] %v6712_v14  ;;  %3021 = vrot.lane.b32.xlu0 %v2657_v53, %s4660_s22 }
 0x455   : > { %2820 = vrot.lane.b32.xlu1 %v6466_v16, %s4658_s20 }
 0x456   : > { %v6717_v50 = vpop.permute.xlu0 %2564 }
 0x457   : > { %v6719_v43 = vpop.permute.xlu1 %2570 }
 0x458   : > { %8310 = vst [vmem:[#allocation14_spill] sm:$0xff] %v6719_v43  ;;  %2727 = vrot.lane.b32.xlu0 %v2657_v53, %s4657_s19  ;;  %v2660_v53 = vsel %vm623_vm2, %v2658_v51, %v2659_v23 }
 0x459   : > { %3205 = vrot.lane.b32.xlu1 %v6506_v29, %s4662_s5 }
 0x45a   : > { %v6724_v24 = vpop.permute.xlu0 %2568 }
 0x45b   : > { %8311 = vst [vmem:[#allocation13_spill] sm:$0xff] %v6724_v24  ;;  %v6726_v30 = vpop.permute.xlu1 %2574 }
 0x45c   : > { %8312 = vst [vmem:[#allocation16_spill] sm:$0xff] %v6726_v30  ;;  %3117 = vrot.lane.b32.xlu0 %v6450_v10, %s4661_s27 }
 0x45d   : > { %2922 = vrot.lane.b32.xlu1 %v6506_v29, %s4659_s21 }
 0x45e   : > { %v6734_v56 = vpop.permute.xlu0 %2572 }
 0x45f   : > { %8313 = vst [vmem:[#allocation18_spill] sm:$0xff] %v6734_v56  ;;  %v6736_v58 = vpop.permute.xlu1 %2578 }
 0x460   : > { %8314 = vst [vmem:[#allocation23_spill] sm:$0xff] %v6736_v58  ;;  %2822 = vrot.lane.b32.xlu0 %v6450_v10, %s4658_s20  ;;  %v2661_v58 = vrot.slane %v6455_v44, 2 }
 0x461   : > { %3295 = vrot.lane.b32.xlu1 %v2660_v53, %s4663_s8 }
 0x462   : > { %v6742_v26 = vpop.permute.xlu0 %2576 }
 0x463   : > { %8315 = vst [vmem:[#allocation32_spill] sm:$0xff] %v6742_v26  ;;  %v6744_v36 = vpop.permute.xlu1 %2582  ;;  %v2662_v26 = vsel %vm623_vm2, %v2659_v23, %v2661_v58 }
 0x464   : > { %8316 = vst [vmem:[#allocation24_spill] sm:$0xff] %v6744_v36  ;;  %3207 = vrot.lane.b32.xlu0 %v6493_v59, %s4662_s5 }
 0x465   : > { %3023 = vrot.lane.b32.xlu1 %v2660_v53, %s4660_s22 }
 0x466   : > { %v6749_v29 = vpop.permute.xlu0 %2580 }
 0x467   : > { %8317 = vst [vmem:[#allocation19_spill] sm:$0xff] %v6749_v29  ;;  %v2716_v30 = vpop.permute.xlu1 %2715  ;;  %v2664_v29 = vrot.slane %v6476_v61, 2 }
 0x468   : > { %2924 = vrot.lane.b32.xlu0 %v6493_v59, %s4659_s21 }
 0x469   : > { %2729 = vrot.lane.b32.xlu1 %v2660_v53, %s4657_s19  ;;  %v2663_v53 = vrot.slane %v6488_v8, 2 }
 0x46a   : > { %v2714_v51 = vpop.permute.xlu0 %2713 }
 0x46b   : > { %v2909_v56 = vpop.permute.xlu1 %2908 }
 0x46c   : > { %3297 = vrot.lane.b32.xlu0 %v2662_v26, %s4663_s8 }
 0x46d   : > { %3119 = vrot.lane.b32.xlu1 %v6488_v8, %s4661_s27 }
 0x46e   : > { %v2907_v36 = vpop.permute.xlu0 %2906 }
 0x46f   : > { %v6759_v32 = vpop.permute.xlu1 %2717 }
 0x470   : > { %3025 = vrot.lane.b32.xlu0 %v2662_v26, %s4660_s22 }
 0x471   : > { %2824 = vrot.lane.b32.xlu1 %v6488_v8, %s4658_s20  ;;  %v2665_v8 = vsel %vm623_vm2, %v2663_v53, %v2664_v29 }
 0x472   : > { %v3008_v44 = vpop.permute.xlu0 %3007 }
 0x473   : > { %v3104_v59 = vpop.permute.xlu1 %3103 }
 0x474   : > { %2731 = vrot.lane.b32.xlu0 %v2662_v26, %s4657_s19  ;;  %v3373_v26 = vsel %vm1359_vm4, %v6393_v28, %v6687_v41 }
 0x475   : > { %3209 = vrot.lane.b32.xlu1 %v6528_v54, %s4662_s5  ;;  %v6779_v24 = vsel %vm1390_vm5, %v3373_v26, %v2714_v51 }
 0x476   : > { %v3010_v23 = vpop.permute.xlu0 %3009 }
 0x477   : > { %v2809_v58 = vpop.permute.xlu1 %2808 }
 0x478   : > { %3121 = vrot.lane.b32.xlu0 %v6476_v61, %s4661_s27 }
 0x479   : > { %2926 = vrot.lane.b32.xlu1 %v6528_v54, %s4659_s21  ;;  %v3433_v54 = vsel %vm1421_vm6, %v6779_v24, %v6675_v22  ;;  %v3374_v22 = vsel %vm1359_vm4, %v6366_v62, %v6681_v34 }
 0x47a   : > { %v6773_v60 = vpop.permute.xlu0 %2719  ;;  %v3465_v14 = vsel %vm1454_vm7, %v3433_v54, %v2907_v36 }
 0x47b   : > { %v3194_v43 = vpop.permute.xlu1 %3193  ;;  %v3497_v28 = vsel %vm1487_vm8, %v3465_v14, %v3008_v44  ;;  %v6805_v44 = vsel %vm1390_vm5, %v3374_v22, %v2716_v30 }
 0x47c   : > { %2826 = vrot.lane.b32.xlu0 %v6476_v61, %s4658_s20  ;;  %v3529_v41 = vsel %vm1520_vm9, %v3497_v28, %v3104_v59  ;;  %v2666_v61 = vrot.slane %v6481_v19, 2 }
 0x47d   : > { %3299 = vrot.lane.b32.xlu1 %v2665_v8, %s4663_s8  ;;  %v3561_v53 = vsel %vm1553_vm10, %v3529_v41, %v3194_v43  ;;  %v3375_v41 = vsel %vm1359_vm4, %v6347_v31, %v6694_v2 }
 0x47e   : > { %v3106_v35 = vpop.permute.xlu0 %3105  ;;  %v2667_v43 = vsel %vm623_vm2, %v2664_v29, %v2666_v61 }
 0x47f   : > { %v2911_v10 = vpop.permute.xlu1 %2910 }
 0x480   : > { %3211 = vrot.lane.b32.xlu0 %v6515_v52, %s4662_s5 }
 0x481   : > { %3027 = vrot.lane.b32.xlu1 %v2665_v8, %s4660_s22 }
 0x482   : > { %v2811_v51 = vpop.permute.xlu0 %2810 }
 0x483   : > { %v3284_v26 = vpop.permute.xlu1 %3283 }
 0x484   : > { %2928 = vrot.lane.b32.xlu0 %v6515_v52, %s4659_s21  ;;  %v3593_v36 = vsel %vm1586_vm11, %v3561_v53, %v3284_v26  ;;  %v3405_v53 = vsel %vm1390_vm5, %v3375_v41, %v6759_v32  ;;  %v2673_v41 = vrot.slane %v6532_v27, 2 }
 0x485   : > { %2733 = vrot.lane.b32.xlu1 %v2665_v8, %s4657_s19  ;;  %4532 = vmatprep.mubr.msk.f32.mxu1 %vm1624_vm12, %v3593_v36  ;;  %v3434_v8 = vsel %vm1421_vm6, %v6805_v44, %v6668_v4  ;;  %v3435_v36 = vsel %vm1421_vm6, %v3405_v53, %v2809_v58  ;;  %v2674_v53 = vrot.slane %v6520_v20, 2 }
 0x486   : > { %v3196_v14 = vpop.permute.xlu0 %3195  ;;  %v3466_v59 = vsel %vm1454_vm7, %v3434_v8, %v2909_v56 }
 0x487   : > { %v3012_v19 = vpop.permute.xlu1 %3011  ;;  %v3498_v34 = vsel %vm1487_vm8, %v3466_v59, %v3010_v23  ;;  %v2669_v23 = vrot.slane %v6498_v47, 2 }
 0x488   : > { %3301 = vrot.lane.b32.xlu0 %v2667_v43, %s4663_s8  ;;  %v3530_v61 = vsel %vm1520_vm9, %v3498_v34, %v3106_v35  ;;  %v2668_v35 = vrot.slane %v6510_v49, 2  ;;  %v3376_v34 = vsel %vm1359_vm4, %v6342_v9, %v6689_v7 }
 0x489   : > { %3123 = vrot.lane.b32.xlu1 %v6510_v49, %s4661_s27  ;;  %v3562_v30 = vsel %vm1553_vm10, %v3530_v61, %v3196_v14  ;;  %v3467_v14 = vsel %vm1454_vm7, %v3435_v36, %v2911_v10  ;;  %v3406_v61 = vsel %vm1390_vm5, %v3376_v34, %v6773_v60 }
 0x48a   : > { %v2913_v52 = vpop.permute.xlu0 %2912  ;;  %v3499_v8 = vsel %vm1487_vm8, %v3467_v14, %v3012_v19  ;;  %v2671_v19 = vrot.slane %v6503_v11, 2 }
 0x48b   : > { %v3014_v62 = vpop.permute.xlu1 %3013 }
 0x48c   : > { %3029 = vrot.lane.b32.xlu0 %v2667_v43, %s4660_s22 }
 0x48d   : > { %2828 = vrot.lane.b32.xlu1 %v6510_v49, %s4658_s20 }
 0x48e   : > { %v3286_v29 = vpop.permute.xlu0 %3285 }
 0x48f   : > { %v3594_v54 = vsel %vm1586_vm11, %v3562_v30, %v3286_v29  ;;  %v6822_v28 = vpop.permute.xlu1 %2812  ;;  %v3436_v30 = vsel %vm1421_vm6, %v3406_v61, %v2811_v51 }
 0x490   : > { %2735 = vrot.lane.b32.xlu0 %v2667_v43, %s4657_s19  ;;  %4533 = vmatmul.mubr.msk.f32.vlgmr.msra.gmra.mrb[0].mxu1 %vm1624_vm12, %v3594_v54  ;;  %v2670_v43 = vsel %vm623_vm2, %v2668_v35, %v2669_v23  ;;  %v3468_v54 = vsel %vm1454_vm7, %v3436_v30, %v2913_v52  ;;  %v3437_v36 = vsel %vm1421_vm6, %v6779_v24, %v6822_v28 }
 0x491   : > { %3213 = vrot.lane.b32.xlu1 %v6550_v6, %s4662_s5 }
 0x492   : > { %v3108_v4 = vpop.permute.xlu0 %3107 }
 0x493   : > { %v3198_v56 = vpop.permute.xlu1 %3197  ;;  %v3531_v31 = vsel %vm1520_vm9, %v3499_v8, %v3108_v4  ;;  %v2672_v4 = vsel %vm623_vm2, %v2669_v23, %v2671_v19  ;;  %v2675_v8 = vsel %vm623_vm2, %v2673_v41, %v2674_v53 }
 0x494   : > { %3125 = vrot.lane.b32.xlu0 %v6498_v47, %s4661_s27  ;;  %v3563_v32 = vsel %vm1553_vm10, %v3531_v31, %v3198_v56  ;;  %v3500_v56 = vsel %vm1487_vm8, %v3468_v54, %v3014_v62 }
 0x495   : > { %2930 = vrot.lane.b32.xlu1 %v6550_v6, %s4659_s21 }
 0x496   : > { %v3110_v26 = vpop.permute.xlu0 %3109 }
 0x497   : > { %v2915_v22 = vpop.permute.xlu1 %2914  ;;  %v3532_v9 = vsel %vm1520_vm9, %v3500_v56, %v3110_v26 }
 0x498   : > { %2830 = vrot.lane.b32.xlu0 %v6498_v47, %s4658_s20 }
 0x499   : > { %3303 = vrot.lane.b32.xlu1 %v2670_v43, %s4663_s8 }
 0x49a   : > { %v2815_v6 = vpop.permute.xlu0 %2814 }
 0x49b   : > { %v3288_v2 = vpop.permute.xlu1 %3287 }
 0x49c   : > { %3215 = vrot.lane.b32.xlu0 %v6537_v37, %s4662_s5  ;;  %v3595_v10 = vsel %vm1586_vm11, %v3563_v32, %v3288_v2 }
 0x49d   : > { %3031 = vrot.lane.b32.xlu1 %v2670_v43, %s4660_s22  ;;  %4535 = vmatprep.mubr.msk.f32.mxu1 %vm1624_vm12, %v3595_v10 }
 0x49e   : > { %v3200_v58 = vpop.permute.xlu0 %3199 }
 0x49f   : > { %v3016_v59 = vpop.permute.xlu1 %3015  ;;  %v3564_v60 = vsel %vm1553_vm10, %v3532_v9, %v3200_v58  ;;  %v2676_v58 = vrot.slane %v6525_v5, 2 }
 0x4a0   : > { %2932 = vrot.lane.b32.xlu0 %v6537_v37, %s4659_s21 }
 0x4a1   : > { %2737 = vrot.lane.b32.xlu1 %v2670_v43, %s4657_s19  ;;  %v3469_v43 = vsel %vm1454_vm7, %v3437_v36, %v2915_v22  ;;  %v2677_v61 = vsel %vm623_vm2, %v2674_v53, %v2676_v58 }
 0x4a2   : > { %v2917_v29 = vpop.permute.xlu0 %2916  ;;  %v3501_v31 = vsel %vm1487_vm8, %v3469_v43, %v3016_v59  ;;  %v3438_v59 = vsel %vm1421_vm6, %v6805_v44, %v2815_v6 }
 0x4a3   : > { %v6865_v11 = vpop.permute.xlu1 %2721  ;;  %v3470_v34 = vsel %vm1454_vm7, %v3438_v59, %v2917_v29 }
 0x4a4   : > { %3305 = vrot.lane.b32.xlu0 %v2672_v4, %s4663_s8 }
 0x4a5   : > { %3127 = vrot.lane.b32.xlu1 %v6532_v27, %s4661_s27 }
 0x4a6   : > { %v3290_v37 = vpop.permute.xlu0 %3289 }
 0x4a7   : > { %v3596_v7 = vsel %vm1586_vm11, %v3564_v60, %v3290_v37  ;;  %v3112_v51 = vpop.permute.xlu1 %3111  ;;  %v2678_v37 = vrot.slane %v6554_v18, 2 }
 0x4a8   : > { %3033 = vrot.lane.b32.xlu0 %v2672_v4, %s4660_s22  ;;  %4536 = vmatmul.mubr.msk.f32.gmra.mrb[2].mxu1 %vm1624_vm12, %v3596_v7  ;;  %v3533_v32 = vsel %vm1520_vm9, %v3501_v31, %v3112_v51  ;;  %v2679_v7 = vrot.slane %v6542_v12, 2  ;;  %v3377_v51 = vsel %vm1359_vm4, %v6412_v38, %v6702_v25 }
 0x4a9   : > { %2832 = vrot.lane.b32.xlu1 %v6532_v27, %s4658_s20 }
 0x4aa   : > { %v3018_v52 = vpop.permute.xlu0 %3017  ;;  %v2680_v38 = vsel %vm623_vm2, %v2678_v37, %v2679_v7 }
 0x4ab   : > { %v2817_v62 = vpop.permute.xlu1 %2816  ;;  %v3502_v54 = vsel %vm1487_vm8, %v3470_v34, %v3018_v52  ;;  %v3407_v52 = vsel %vm1390_vm5, %v3377_v51, %v6865_v11 }
 0x4ac   : > { %2739 = vrot.lane.b32.xlu0 %v2672_v4, %s4657_s19  ;;  %v3439_v41 = vsel %vm1421_vm6, %v3407_v52, %v2817_v62 }
 0x4ad   : > { %3217 = vrot.lane.b32.xlu1 %v6566_v1, %s4662_s5 }
 0x4ae   : > { %v6881_v35 = vpop.permute.xlu0 %2723 }
 0x4af   : > { %v3202_v23 = vpop.permute.xlu1 %3201 }
 0x4b0   : > { %3129 = vrot.lane.b32.xlu0 %v6520_v20, %s4661_s27  ;;  %v3565_v2 = vsel %vm1553_vm10, %v3533_v32, %v3202_v23 }
 0x4b1   : > { %2934 = vrot.lane.b32.xlu1 %v6566_v1, %s4659_s21 }
 0x4b2   : > { %v3114_v26 = vpop.permute.xlu0 %3113 }
 0x4b3   : > { %v2919_v14 = vpop.permute.xlu1 %2918  ;;  %v3534_v5 = vsel %vm1520_vm9, %v3502_v54, %v3114_v26  ;;  %v2174_v26 = vmul.f32 %v6335_v55, %v6209_v40 }
 0x4b4   : > { %2834 = vrot.lane.b32.xlu0 %v6520_v20, %s4658_s20  ;;  %v3471_v36 = vsel %vm1454_vm7, %v3439_v41, %v2919_v14 }
 0x4b5   : > { %3307 = vrot.lane.b32.xlu1 %v2675_v8, %s4663_s8  ;;  %v2206_v14 = vmax.f32 %v2174_v26, 0.0  ;;  %v3379_v26 = vsel %vm1359_vm4, %v6440_v42, %v6710_v15 }
 0x4b6   : > { %v6899_v1 = vpop.permute.xlu0 %2818 }
 0x4b7   : > { %v3292_v10 = vpop.permute.xlu1 %3291 }
 0x4b8   : > { %3219 = vrot.lane.b32.xlu0 %v6559_v57, %s4662_s5  ;;  %v3597_v24 = vsel %vm1586_vm11, %v3565_v2, %v3292_v10  ;;  %v2681_v2 = vrot.slane %v6547_v46, 2  ;;  %v2245_v10 = vrot.slane %v2206_v14, 1 }
 0x4b9   : > { %3035 = vrot.lane.b32.xlu1 %v2675_v8, %s4660_s22  ;;  %4538 = vmatprep.mubr.msk.f32.mxu1 %vm1624_vm12, %v3597_v24  ;;  %v2311_v24 = vrot.slane %v2206_v14, 7 }
 0x4ba   : > { %v3204_v28 = vpop.permute.xlu0 %3203 }
 0x4bb   : > { %v3020_v22 = vpop.permute.xlu1 %3019 }
 0x4bc   : > { %2936 = vrot.lane.b32.xlu0 %v6559_v57, %s4659_s21  ;;  %v3566_v57 = vsel %vm1553_vm10, %v3534_v5, %v3204_v28  ;;  %v3503_v25 = vsel %vm1487_vm8, %v3471_v36, %v3020_v22  ;;  %v3378_v28 = vsel %vm1359_vm4, %v6397_v21, %v6696_v13 }
 0x4bd   : > { %2741 = vrot.lane.b32.xlu1 %v2675_v8, %s4657_s19  ;;  %v3408_v58 = vsel %vm1390_vm5, %v3378_v28, %v6881_v35  ;;  %v3380_v28 = vsel %vm1359_vm4, %v6422_v0, %v6705_v33 }
 0x4be   : > { %v2921_v19 = vpop.permute.xlu0 %2920  ;;  %v3440_v59 = vsel %vm1421_vm6, %v3408_v58, %v6899_v1 }
 0x4bf   : > { %v6915_v30 = vpop.permute.xlu1 %2725  ;;  %v3472_v46 = vsel %vm1454_vm7, %v3440_v59, %v2921_v19 }
 0x4c0   : > { %3309 = vrot.lane.b32.xlu0 %v2677_v61, %s4663_s8  ;;  %v3409_v36 = vsel %vm1390_vm5, %v3379_v26, %v6915_v30 }
 0x4c1   : > { %3131 = vrot.lane.b32.xlu1 %v6554_v18, %s4661_s27 }
 0x4c2   : > { %v3294_v4 = vpop.permute.xlu0 %3293 }
 0x4c3   : > { %v3598_v44 = vsel %vm1586_vm11, %v3566_v57, %v3294_v4  ;;  %v3116_v6 = vpop.permute.xlu1 %3115 }
 0x4c4   : > { %3037 = vrot.lane.b32.xlu0 %v2677_v61, %s4660_s22  ;;  %4539 = vmatmul.mubr.msk.f32.gmra.mrb[4].mxu1 %vm1624_vm12, %v3598_v44  ;;  %v3535_v11 = vsel %vm1520_vm9, %v3503_v25, %v3116_v6 }
 0x4c5   : > { %2836 = vrot.lane.b32.xlu1 %v6554_v18, %s4658_s20 }
 0x4c6   : > { %v3022_v29 = vpop.permute.xlu0 %3021 }
 0x4c7   : > { %v6928_v56 = vpop.permute.xlu1 %2820  ;;  %v3504_v21 = vsel %vm1487_vm8, %v3472_v46, %v3022_v29 }
 0x4c8   : > { %2743 = vrot.lane.b32.xlu0 %v2677_v61, %s4657_s19  ;;  %v2682_v61 = vsel %vm623_vm2, %v2679_v7, %v2681_v2 }
 0x4c9   : > { %3221 = vrot.lane.b32.xlu1 %v6579_v3, %s4662_s5 }
 0x4ca   : > { %v6933_v9 = vpop.permute.xlu0 %2727 }
 0x4cb   : > { %v3206_v60 = vpop.permute.xlu1 %3205  ;;  %v3410_v58 = vsel %vm1390_vm5, %v3380_v28, %v6933_v9  ;;  %v8320_v28 = vld [vmem:[#allocation2_spill] sm:$0xff] }
 0x4cc   : > { %3133 = vrot.lane.b32.xlu0 %v6542_v12, %s4661_s27  ;;  %v3567_v40 = vsel %vm1553_vm10, %v3535_v11, %v3206_v60 }
 0x4cd   : > { %2938 = vrot.lane.b32.xlu1 %v6579_v3, %s4659_s21  ;;  %v2175_v3 = vmul.f32 %v6335_v55, %v6212_v63 }
 0x4ce   : > { %v3118_v23 = vpop.permute.xlu0 %3117 }
 0x4cf   : > { %v6947_v53 = vpop.permute.xlu1 %2922  ;;  %v2207_v31 = vmax.f32 %v2175_v3, 0.0  ;;  %v3536_v35 = vsel %vm1520_vm9, %v3504_v21, %v3118_v23  ;;  %v3441_v3 = vsel %vm1421_vm6, %v3409_v36, %v6928_v56 }
 0x4d0   : > { %2838 = vrot.lane.b32.xlu0 %v6542_v12, %s4658_s20 }
 0x4d1   : > { %3311 = vrot.lane.b32.xlu1 %v2680_v38, %s4663_s8  ;;  %v2312_v22 = vrot.slane %v2207_v31, 7  ;;  %v2388_v60 = vrot.slane %v2207_v31, 5 }
 0x4d2   : > { %v6960_v62 = vpop.permute.xlu0 %2822 }
 0x4d3   : > { %v3296_v43 = vpop.permute.xlu1 %3295  ;;  %v6991_v13 = vsel %vm267_vm0, %v2311_v24, %v2312_v22  ;;  %v2436_v41 = vsel %vm267_vm0, %v2312_v22, %v2388_v60 }
 0x4d4   : > { %3223 = vrot.lane.b32.xlu0 %v6572_v17, %s4662_s5  ;;  %v3599_v8 = vsel %vm1586_vm11, %v3567_v40, %v3296_v43  ;;  %v2519_v44 = vrot.slane %v6991_v13, 1  ;;  %v2684_v23 = vrot.slane %v6991_v13, 2  ;;  %v2521_v11 = vrot.slane %v2436_v41, 1 }
 0x4d5   : > { %3039 = vrot.lane.b32.xlu1 %v2680_v38, %s4660_s22  ;;  %4541 = vmatprep.mubr.msk.f32.mxu1 %vm1624_vm12, %v3599_v8  ;;  %v3473_v40 = vsel %vm1454_vm7, %v3441_v3, %v6947_v53  ;;  %v2176_v53 = vmul.f32 %v6335_v55, %v6214_v48 }
 0x4d6   : > { %v3208_v63 = vpop.permute.xlu0 %3207  ;;  %v2522_v14 = vsel %vm457_vm1, %v2519_v44, %v2521_v11 }
 0x4d7   : > { %v3024_v32 = vpop.permute.xlu1 %3023  ;;  %v3568_v1 = vsel %vm1553_vm10, %v3536_v35, %v3208_v63  ;;  %v2686_v63 = vrot.slane %v2436_v41, 2  ;;  %v3381_v41 = vsel %vm1359_vm4, %v6466_v16, %v6717_v50 }
 0x4d8   : > { %2940 = vrot.lane.b32.xlu0 %v6572_v17, %s4659_s21  ;;  %v6988_v17 = vsel %vm267_vm0, %v2245_v10, %v2311_v24  ;;  %v3505_v15 = vsel %vm1487_vm8, %v3473_v40, %v3024_v32  ;;  %v2177_v32 = vmul.f32 %v6335_v55, %v6217_v39  ;;  %v2208_v24 = vmax.f32 %v2176_v53, 0.0 }
 0x4d9   : > { %2745 = vrot.lane.b32.xlu1 %v2680_v38, %s4657_s19  ;;  %v2518_v4 = vrot.slane %v6988_v17, 1  ;;  %v2683_v52 = vrot.slane %v6988_v17, 2  ;;  %v2687_v48 = vsel %vm623_vm2, %v2684_v23, %v2686_v63  ;;  %v3442_v39 = vsel %vm1421_vm6, %v3410_v58, %v6960_v62 }
 0x4da   : > { %v6979_v34 = vpop.permute.xlu0 %2924  ;;  %v2209_v22 = vmax.f32 %v2177_v32, 0.0  ;;  %v2246_v0 = vrot.slane %v2208_v24, 1  ;;  %v2314_v33 = vrot.slane %v2208_v24, 7  ;;  %v2178_v63 = vmul.f32 %v6335_v55, %v6219_v45  ;;  %v8318_v32 = vld [vmem:[#allocation10_spill] sm:$0xff] }
 0x4db   : > { %v6983_v54 = vpop.permute.xlu1 %2729  ;;  %v2520_v37 = vsel %vm457_vm1, %v2518_v4, %v2519_v44  ;;  %v2685_v42 = vsel %vm623_vm2, %v2683_v52, %v2684_v23  ;;  %v3474_v46 = vsel %vm1454_vm7, %v3442_v39, %v6979_v34 }
 0x4dc   : > { %3313 = vrot.lane.b32.xlu0 %v2682_v61, %s4663_s8  ;;  %v2315_v35 = vrot.slane %v2209_v22, 7  ;;  %v7071_v34 = vsel %vm267_vm0, %v2246_v0, %v2314_v33  ;;  %v2389_v52 = vrot.slane %v2209_v22, 5  ;;  %v3411_v26 = vsel %vm1390_vm5, %v3381_v41, %v6983_v54 }
 0x4dd   : > { %3135 = vrot.lane.b32.xlu1 %v6988_v17, %s4661_s27  ;;  %v2688_v40 = vrot.slane %v7071_v34, 2  ;;  %v2210_v0 = vmax.f32 %v2178_v63, 0.0 }
 0x4de   : > { %v3298_v19 = vpop.permute.xlu0 %3297  ;;  %v2437_v50 = vsel %vm267_vm0, %v2315_v35, %v2389_v52 }
 0x4df   : > { %v3600_v5 = vsel %vm1586_vm11, %v3568_v1, %v3298_v19  ;;  %v3120_v57 = vpop.permute.xlu1 %3119  ;;  %v2691_v24 = vrot.slane %v2437_v50, 2 }
 0x4e0   : > { %3041 = vrot.lane.b32.xlu0 %v2682_v61, %s4660_s22  ;;  %4542 = vmatmul.mubr.msk.f32.gmra.mrb[6].mxu1 %vm1624_vm12, %v3600_v5  ;;  %v3537_v30 = vsel %vm1520_vm9, %v3505_v15, %v3120_v57  ;;  %v7074_v57 = vsel %vm267_vm0, %v2314_v33, %v2315_v35 }
 0x4e1   : > { %2840 = vrot.lane.b32.xlu1 %v6988_v17, %s4658_s20  ;;  %v2524_v60 = vrot.slane %v7074_v57, 1  ;;  %v2689_v16 = vrot.slane %v7074_v57, 2 }
 0x4e2   : > { %v3026_v6 = vpop.permute.xlu0 %3025 }
 0x4e3   : > { %v7004_v29 = vpop.permute.xlu1 %2824  ;;  %v3506_v21 = vsel %vm1487_vm8, %v3474_v46, %v3026_v6  ;;  %v2523_v6 = vrot.slane %v7071_v34, 1 }
 0x4e4   : > { %2747 = vrot.lane.b32.xlu0 %v2682_v61, %s4657_s19 }
 0x4e5   : > { %3225 = vrot.lane.b32.xlu1 %v2520_v37, %s4662_s5  ;;  %v2525_v23 = vsel %vm457_vm1, %v2523_v6, %v2524_v60 }
 0x4e6   : > { %v7009_v7 = vpop.permute.xlu0 %2731 }
 0x4e7   : > { %v3210_v51 = vpop.permute.xlu1 %3209 }
 0x4e8   : > { %3137 = vrot.lane.b32.xlu0 %v6991_v13, %s4661_s27  ;;  %v3569_v56 = vsel %vm1553_vm10, %v3537_v30, %v3210_v51  ;;  %v2526_v30 = vrot.slane %v2437_v50, 1 }
 0x4e9   : > { %2942 = vrot.lane.b32.xlu1 %v2520_v37, %s4659_s21 }
 0x4ea   : > { %v3122_v38 = vpop.permute.xlu0 %3121  ;;  %v2527_v53 = vsel %vm457_vm1, %v2524_v60, %v2526_v30 }
 0x4eb   : > { %v7024_v25 = vpop.permute.xlu1 %2926  ;;  %v3538_v9 = vsel %vm1520_vm9, %v3506_v21, %v3122_v38  ;;  %v3443_v38 = vsel %vm1421_vm6, %v3411_v26, %v7004_v29  ;;  %v2692_v21 = vsel %vm623_vm2, %v2689_v16, %v2691_v24  ;;  %v8324_v24 = vld [vmem:[#allocation8_spill] sm:$0xff] }
 0x4ec   : > { %2842 = vrot.lane.b32.xlu0 %v6991_v13, %s4658_s20  ;;  %v3475_v11 = vsel %vm1454_vm7, %v3443_v38, %v7024_v25  ;;  %v8322_v38 = vld [vmem:[#allocation17_spill] sm:$0xff] }
 0x4ed   : > { %3315 = vrot.lane.b32.xlu1 %v2685_v42, %s4663_s8 }
 0x4ee   : > { %v7034_v43 = vpop.permute.xlu0 %2826 }
 0x4ef   : > { %v3300_v8 = vpop.permute.xlu1 %3299 }
 0x4f0   : > { %3227 = vrot.lane.b32.xlu0 %v2522_v14, %s4662_s5  ;;  %v3601_v31 = vsel %vm1586_vm11, %v3569_v56, %v3300_v8 }
 0x4f1   : > { %2944 = vrot.lane.b32.xlu1 %v2522_v14, %s4659_s21  ;;  %4544 = vmatprep.mubr.msk.f32.mxu1 %vm1624_vm12, %v3601_v31 }
 0x4f2   : > { %v3212_v2 = vpop.permute.xlu0 %3211 }
 0x4f3   : > { %v3028_v10 = vpop.permute.xlu1 %3027  ;;  %v3570_v62 = vsel %vm1553_vm10, %v3538_v9, %v3212_v2  ;;  %v8319_v2 = vld [vmem:[#allocation9_spill] sm:$0xff] }
 0x4f4   : > { %2584 = vrot.lane.b32.xlu0 %v2520_v37, %s4656_s18  ;;  %v3507_v54 = vsel %vm1487_vm8, %v3475_v11, %v3028_v10  ;;  %v3382_v10 = vsel %vm1359_vm4, %v8319_v2, %v8318_v32 }
 0x4f5   : > { %3317 = vrot.lane.b32.xlu1 %v2687_v48, %s4663_s8  ;;  %v3412_v22 = vsel %vm1390_vm5, %v3382_v10, %v7009_v7  ;;  %v8323_v10 = vld [vmem:[#allocation14_spill] sm:$0xff] }
 0x4f6   : > { %v7056_v59 = vpop.permute.xlu0 %2928  ;;  %v3444_v58 = vsel %vm1421_vm6, %v3412_v22, %v7034_v43 }
 0x4f7   : > { %v7060_v61 = vpop.permute.xlu1 %2733  ;;  %v3476_v45 = vsel %vm1454_vm7, %v3444_v58, %v7056_v59 }
 0x4f8   : > { %3043 = vrot.lane.b32.xlu0 %v2685_v42, %s4660_s22 }
 0x4f9   : > { %2749 = vrot.lane.b32.xlu1 %v2685_v42, %s4657_s19 }
 0x4fa   : > { %v3302_v1 = vpop.permute.xlu0 %3301 }
 0x4fb   : > { %v3602_v19 = vsel %vm1586_vm11, %v3570_v62, %v3302_v1  ;;  %v3124_v5 = vpop.permute.xlu1 %3123  ;;  %v2247_v1 = vrot.slane %v2210_v0, 1 }
 0x4fc   : > { %2586 = vrot.lane.b32.xlu0 %v2522_v14, %s4656_s18  ;;  %4545 = vmatmul.mubr.msk.f32.gmra.mrb[8].mxu1 %vm1624_vm12, %v3602_v19  ;;  %v3539_v29 = vsel %vm1520_vm9, %v3507_v54, %v3124_v5  ;;  %v2690_v14 = vsel %vm623_vm2, %v2688_v40, %v2689_v16  ;;  %v2317_v19 = vrot.slane %v2210_v0, 7 }
 0x4fd   : > { %3139 = vrot.lane.b32.xlu1 %v7071_v34, %s4661_s27 }
 0x4fe   : > { %v3030_v4 = vpop.permute.xlu0 %3029  ;;  %v7152_v60 = vsel %vm267_vm0, %v2247_v1, %v2317_v19 }
 0x4ff   : > { %v7078_v44 = vpop.permute.xlu1 %2828  ;;  %v3508_v33 = vsel %vm1487_vm8, %v3476_v45, %v3030_v4  ;;  %v2528_v41 = vrot.slane %v7152_v60, 1 }
 0x500   : > { %3045 = vrot.lane.b32.xlu0 %v2687_v48, %s4660_s22 }
 0x501   : > { %2844 = vrot.lane.b32.xlu1 %v7071_v34, %s4658_s20 }
 0x502   : > { %v7085_v37 = vpop.permute.xlu0 %2735 }
 0x503   : > { %v3214_v51 = vpop.permute.xlu1 %3213 }
 0x504   : > { %2751 = vrot.lane.b32.xlu0 %v2687_v48, %s4657_s19  ;;  %v3571_v15 = vsel %vm1553_vm10, %v3539_v29, %v3214_v51  ;;  %v2179_v48 = vmul.f32 %v6335_v55, %v8320_v28  ;;  %v3384_v28 = vsel %vm1359_vm4, %v8324_v24, %v8323_v10 }
 0x505   : > { %3229 = vrot.lane.b32.xlu1 %v2525_v23, %s4662_s5  ;;  %v3414_v22 = vsel %vm1390_vm5, %v3384_v28, %v7085_v37  ;;  %v8328_v28 = vld [vmem:[#allocation16_spill] sm:$0xff] }
 0x506   : > { %v3126_v36 = vpop.permute.xlu0 %3125  ;;  %v2211_v7 = vmax.f32 %v2179_v48, 0.0 }
 0x507   : > { %v7097_v3 = vpop.permute.xlu1 %2930  ;;  %v3540_v35 = vsel %vm1520_vm9, %v3508_v33, %v3126_v36  ;;  %v8321_v36 = vld [vmem:[#allocation13_spill] sm:$0xff] }
 0x508   : > { %3141 = vrot.lane.b32.xlu0 %v7074_v57, %s4661_s27  ;;  %v2318_v5 = vrot.slane %v2211_v7, 7  ;;  %v3383_v11 = vsel %vm1359_vm4, %v8322_v38, %v8321_v36  ;;  %v2390_v29 = vrot.slane %v2211_v7, 5  ;;  %v8325_v7 = vld [vmem:[#allocation7_spill] sm:$0xff] }
 0x509   : > { %2946 = vrot.lane.b32.xlu1 %v2525_v23, %s4659_s21  ;;  %v3413_v40 = vsel %vm1390_vm5, %v3383_v11, %v7060_v61 }
 0x50a   : > { %v7109_v42 = vpop.permute.xlu0 %2830  ;;  %v7155_v51 = vsel %vm267_vm0, %v2317_v19, %v2318_v5  ;;  %v3445_v50 = vsel %vm1421_vm6, %v3413_v40, %v7078_v44 }
 0x50b   : > { %v3304_v25 = vpop.permute.xlu1 %3303  ;;  %v2529_v26 = vrot.slane %v7155_v51, 1  ;;  %v3446_v58 = vsel %vm1421_vm6, %v3414_v22, %v7109_v42 }
 0x50c   : > { %2846 = vrot.lane.b32.xlu0 %v7074_v57, %s4658_s20  ;;  %v3603_v56 = vsel %vm1586_vm11, %v3571_v15, %v3304_v25  ;;  %v3477_v15 = vsel %vm1454_vm7, %v3445_v50, %v7097_v3 }
 0x50d   : > { %3319 = vrot.lane.b32.xlu1 %v2690_v14, %s4663_s8  ;;  %4547 = vmatprep.mubr.msk.f32.mxu1 %vm1624_vm12, %v3603_v56  ;;  %v2530_v25 = vsel %vm457_vm1, %v2528_v41, %v2529_v26 }
 0x50e   : > { %v3216_v8 = vpop.permute.xlu0 %3215 }
 0x50f   : > { %v3032_v31 = vpop.permute.xlu1 %3031  ;;  %v3572_v43 = vsel %vm1553_vm10, %v3540_v35, %v3216_v8  ;;  %v2693_v8 = vrot.slane %v7152_v60, 2  ;;  %v2180_v35 = vmul.f32 %v6335_v55, %v8325_v7 }
 0x510   : > { %3231 = vrot.lane.b32.xlu0 %v2527_v53, %s4662_s5  ;;  %v3509_v30 = vsel %vm1487_vm8, %v3477_v15, %v3032_v31  ;;  %v2438_v31 = vsel %vm267_vm0, %v2318_v5, %v2390_v29  ;;  %v8327_v15 = vld [vmem:[#allocation18_spill] sm:$0xff] }
 0x511   : > { %2948 = vrot.lane.b32.xlu1 %v2527_v53, %s4659_s21  ;;  %v2531_v2 = vrot.slane %v2438_v31, 1  ;;  %v2696_v37 = vrot.slane %v2438_v31, 2  ;;  %v2212_v5 = vmax.f32 %v2180_v35, 0.0 }
 0x512   : > { %v7132_v39 = vpop.permute.xlu0 %2932 }
 0x513   : > { %v7136_v46 = vpop.permute.xlu1 %2737  ;;  %v3478_v0 = vsel %vm1454_vm7, %v3446_v58, %v7132_v39  ;;  %v2532_v33 = vsel %vm457_vm1, %v2529_v26, %v2531_v2  ;;  %v2248_v36 = vrot.slane %v2212_v5, 1  ;;  %v2320_v38 = vrot.slane %v2212_v5, 7 }
 0x514   : > { %2588 = vrot.lane.b32.xlu0 %v2525_v23, %s4656_s18 }
 0x515   : > { %3321 = vrot.lane.b32.xlu1 %v2692_v21, %s4663_s8  ;;  %v7233_v50 = vsel %vm267_vm0, %v2248_v36, %v2320_v38 }
 0x516   : > { %v3306_v9 = vpop.permute.xlu0 %3305  ;;  %v2698_v22 = vrot.slane %v7233_v50, 2 }
 0x517   : > { %v3604_v62 = vsel %vm1586_vm11, %v3572_v43, %v3306_v9  ;;  %v3128_v59 = vpop.permute.xlu1 %3127  ;;  %v8326_v9 = vld [vmem:[#allocation11_spill] sm:$0xff] }
 0x518   : > { %3047 = vrot.lane.b32.xlu0 %v2690_v14, %s4660_s22  ;;  %4548 = vmatmul.mubr.msk.f32.gmra.mrb[10].mxu1 %vm1624_vm12, %v3604_v62  ;;  %v3541_v61 = vsel %vm1520_vm9, %v3509_v30, %v3128_v59  ;;  %v2181_v42 = vmul.f32 %v6335_v55, %v8326_v9 }
 0x519   : > { %2753 = vrot.lane.b32.xlu1 %v2690_v14, %s4657_s19 }
 0x51a   : > { %v3034_v4 = vpop.permute.xlu0 %3033 }
 0x51b   : > { %v7148_v6 = vpop.permute.xlu1 %2832  ;;  %v3510_v43 = vsel %vm1487_vm8, %v3478_v0, %v3034_v4 }
 0x51c   : > { %2590 = vrot.lane.b32.xlu0 %v2527_v53, %s4656_s18  ;;  %v2694_v53 = vrot.slane %v7155_v51, 2 }
 0x51d   : > { %3143 = vrot.lane.b32.xlu1 %v7152_v60, %s4661_s27 }
 0x51e   : > { %v7159_v52 = vpop.permute.xlu0 %2739  ;;  %v2695_v48 = vsel %vm623_vm2, %v2693_v8, %v2694_v53  ;;  %v2697_v4 = vsel %vm623_vm2, %v2694_v53, %v2696_v37  ;;  %v2533_v8 = vrot.slane %v7233_v50, 1 }
 0x51f   : > { %v3218_v23 = vpop.permute.xlu1 %3217 }
 0x520   : > { %3049 = vrot.lane.b32.xlu0 %v2692_v21, %s4660_s22  ;;  %v3573_v44 = vsel %vm1553_vm10, %v3541_v61, %v3218_v23  ;;  %v2213_v23 = vmax.f32 %v2181_v42, 0.0 }
 0x521   : > { %2848 = vrot.lane.b32.xlu1 %v7152_v60, %s4658_s20 }
 0x522   : > { %v3130_v16 = vpop.permute.xlu0 %3129  ;;  %v2321_v11 = vrot.slane %v2213_v23, 7  ;;  %v2391_v2 = vrot.slane %v2213_v23, 5 }
 0x523   : > { %v7173_v54 = vpop.permute.xlu1 %2934  ;;  %v3542_v62 = vsel %vm1520_vm9, %v3510_v43, %v3130_v16 }
 0x524   : > { %2755 = vrot.lane.b32.xlu0 %v2692_v21, %s4657_s19  ;;  %v7236_v29 = vsel %vm267_vm0, %v2320_v38, %v2321_v11  ;;  %v2439_v0 = vsel %vm267_vm0, %v2321_v11, %v2391_v2 }
 0x525   : > { %3233 = vrot.lane.b32.xlu1 %v2530_v25, %s4662_s5  ;;  %v2699_v58 = vrot.slane %v7236_v29, 2  ;;  %v2536_v37 = vrot.slane %v2439_v0, 1  ;;  %v2701_v5 = vrot.slane %v2439_v0, 2 }
 0x526   : > { %v7182_v56 = vpop.permute.xlu0 %2834 }
 0x527   : > { %v3308_v14 = vpop.permute.xlu1 %3307  ;;  %v2702_v11 = vsel %vm623_vm2, %v2699_v58, %v2701_v5 }
 0x528   : > { %3145 = vrot.lane.b32.xlu0 %v7155_v51, %s4661_s27  ;;  %v3605_v3 = vsel %vm1586_vm11, %v3573_v44, %v3308_v14 }
 0x529   : > { %2950 = vrot.lane.b32.xlu1 %v2530_v25, %s4659_s21  ;;  %4550 = vmatprep.mubr.msk.f32.mxu1 %vm1624_vm12, %v3605_v3 }
 0x52a   : > { %v3220_v63 = vpop.permute.xlu0 %3219 }
 0x52b   : > { %v3036_v32 = vpop.permute.xlu1 %3035  ;;  %v3574_v39 = vsel %vm1553_vm10, %v3542_v62, %v3220_v63 }
 0x52c   : > { %2850 = vrot.lane.b32.xlu0 %v7155_v51, %s4658_s20 }
 0x52d   : > { %3323 = vrot.lane.b32.xlu1 %v2695_v48, %s4663_s8 }
 0x52e   : > { %v7204_v45 = vpop.permute.xlu0 %2936 }
 0x52f   : > { %v7209_v21 = vpop.permute.xlu1 %2741 }
 0x530   : > { %3235 = vrot.lane.b32.xlu0 %v2532_v33, %s4662_s5 }
 0x531   : > { %2952 = vrot.lane.b32.xlu1 %v2532_v33, %s4659_s21 }
 0x532   : > { %v3310_v59 = vpop.permute.xlu0 %3309 }
 0x533   : > { %v3606_v1 = vsel %vm1586_vm11, %v3574_v39, %v3310_v59  ;;  %v3132_v19 = vpop.permute.xlu1 %3131 }
 0x534   : > { %2592 = vrot.lane.b32.xlu0 %v2530_v25, %s4656_s18  ;;  %4551 = vmatmul.mubr.msk.f32.gmra.mrb[12].mxu1 %vm1624_vm12, %v3606_v1  ;;  %v3385_v25 = vsel %vm1359_vm4, %v6510_v49, %v8327_v15  ;;  %v2534_v49 = vrot.slane %v7236_v29, 1  ;;  %v8329_v1 = vld [vmem:[#allocation3_spill] sm:$0xff] }
 0x535   : > { %3325 = vrot.lane.b32.xlu1 %v2697_v4, %s4663_s8  ;;  %v3415_v30 = vsel %vm1390_vm5, %v3385_v25, %v7136_v46 }
 0x536   : > { %v3038_v41 = vpop.permute.xlu0 %3037  ;;  %v3447_v44 = vsel %vm1421_vm6, %v3415_v30, %v7148_v6  ;;  %v2535_v10 = vsel %vm457_vm1, %v2533_v8, %v2534_v49 }
 0x537   : > { %v7225_v26 = vpop.permute.xlu1 %2836  ;;  %v3479_v3 = vsel %vm1454_vm7, %v3447_v44, %v7173_v54 }
 0x538   : > { %3051 = vrot.lane.b32.xlu0 %v2695_v48, %s4660_s22  ;;  %v3511_v53 = vsel %vm1487_vm8, %v3479_v3, %v3036_v32  ;;  %v8331_v3 = vld [vmem:[#allocation32_spill] sm:$0xff] }
 0x539   : > { %2757 = vrot.lane.b32.xlu1 %v2695_v48, %s4657_s19  ;;  %v3543_v46 = vsel %vm1520_vm9, %v3511_v53, %v3132_v19  ;;  %v3386_v48 = vsel %vm1359_vm4, %v6498_v47, %v8328_v28  ;;  %v2182_v19 = vmul.f32 %v6335_v55, %v8329_v1  ;;  %v3387_v8 = vsel %vm1359_vm4, %v6532_v27, %v8331_v3  ;;  %v8334_v3 = vld [vmem:[#allocation12_spill] sm:$0xff] }
 0x53a   : > { %v7229_v40 = vpop.permute.xlu0 %2743 }
 0x53b   : > { %v3222_v16 = vpop.permute.xlu1 %3221  ;;  %v2214_v38 = vmax.f32 %v2182_v19, 0.0 }
 0x53c   : > { %2594 = vrot.lane.b32.xlu0 %v2532_v33, %s4656_s18  ;;  %v3575_v6 = vsel %vm1553_vm10, %v3543_v46, %v3222_v16  ;;  %v3416_v33 = vsel %vm1390_vm5, %v3386_v48, %v7159_v52  ;;  %v2700_v52 = vsel %vm623_vm2, %v2698_v22, %v2699_v58  ;;  %v8332_v22 = vld [vmem:[#allocation23_spill] sm:$0xff] }
 0x53d   : > { %3147 = vrot.lane.b32.xlu1 %v7233_v50, %s4661_s27  ;;  %v3448_v7 = vsel %vm1421_vm6, %v3416_v33, %v7182_v56  ;;  %v2249_v30 = vrot.slane %v2214_v38, 1 }
 0x53e   : > { %v3134_v61 = vpop.permute.xlu0 %3133  ;;  %v3480_v47 = vsel %vm1454_vm7, %v3448_v7, %v7204_v45  ;;  %v2537_v45 = vsel %vm457_vm1, %v2534_v49, %v2536_v37  ;;  %v3417_v49 = vsel %vm1390_vm5, %v3387_v8, %v7209_v21  ;;  %v2185_v8 = vmul.f32 %v6335_v55, %v8334_v3 }
 0x53f   : > { %v7247_v14 = vpop.permute.xlu1 %2938  ;;  %v3512_v9 = vsel %vm1487_vm8, %v3480_v47, %v3038_v41  ;;  %v3449_v46 = vsel %vm1421_vm6, %v3417_v49, %v7225_v26 }
 0x540   : > { %3053 = vrot.lane.b32.xlu0 %v2697_v4, %s4660_s22  ;;  %v3544_v42 = vsel %vm1520_vm9, %v3512_v9, %v3134_v61  ;;  %v2323_v61 = vrot.slane %v2214_v38, 7 }
 0x541   : > { %2852 = vrot.lane.b32.xlu1 %v7233_v50, %s4658_s20 }
 0x542   : > { %v7258_v31 = vpop.permute.xlu0 %2838  ;;  %v7323_v2 = vsel %vm267_vm0, %v2249_v30, %v2323_v61  ;;  %v8333_v30 = vld [vmem:[#allocation4_spill] sm:$0xff] }
 0x543   : > { %v3312_v63 = vpop.permute.xlu1 %3311  ;;  %v2538_v28 = vrot.slane %v7323_v2, 1  ;;  %v2703_v1 = vrot.slane %v7323_v2, 2 }
 0x544   : > { %2759 = vrot.lane.b32.xlu0 %v2697_v4, %s4657_s19  ;;  %v3607_v54 = vsel %vm1586_vm11, %v3575_v6, %v3312_v63  ;;  %v8330_v4 = vld [vmem:[#allocation5_spill] sm:$0xff]  ;;  %v3481_v63 = vsel %vm1454_vm7, %v3449_v46, %v7247_v14 }
 0x545   : > { %3237 = vrot.lane.b32.xlu1 %v2535_v10, %s4662_s5  ;;  %4553 = vmatprep.mubr.msk.f32.mxu1 %vm1624_vm12, %v3607_v54  ;;  %v2183_v23 = vmul.f32 %v6335_v55, %v8330_v4 }
 0x546   : > { %v3224_v32 = vpop.permute.xlu0 %3223 }
 0x547   : > { %v3040_v24 = vpop.permute.xlu1 %3039  ;;  %v3576_v56 = vsel %vm1553_vm10, %v3544_v42, %v3224_v32  ;;  %v2215_v16 = vmax.f32 %v2183_v23, 0.0 }
 0x548   : > { %3149 = vrot.lane.b32.xlu0 %v7236_v29, %s4661_s27  ;;  %v3513_v54 = vsel %vm1487_vm8, %v3481_v63, %v3040_v24  ;;  %v3388_v24 = vsel %vm1359_vm4, %v6520_v20, %v8332_v22 }
 0x549   : > { %2954 = vrot.lane.b32.xlu1 %v2535_v10, %s4659_s21  ;;  %v2324_v44 = vrot.slane %v2215_v16, 7  ;;  %v3418_v58 = vsel %vm1390_vm5, %v3388_v24, %v7229_v40  ;;  %v2392_v37 = vrot.slane %v2215_v16, 5 }
 0x54a   : > { %v7279_v35 = vpop.permute.xlu0 %2940  ;;  %v3450_v33 = vsel %vm1421_vm6, %v3418_v58, %v7258_v31 }
 0x54b   : > { %v7283_v43 = vpop.permute.xlu1 %2745  ;;  %v7326_v27 = vsel %vm267_vm0, %v2323_v61, %v2324_v44  ;;  %v3482_v20 = vsel %vm1454_vm7, %v3450_v33, %v7279_v35  ;;  %v2440_v5 = vsel %vm267_vm0, %v2324_v44, %v2392_v37  ;;  %v2184_v61 = vmul.f32 %v6335_v55, %v8333_v30 }
 0x54c   : > { %2854 = vrot.lane.b32.xlu0 %v7236_v29, %s4658_s20  ;;  %v2539_v48 = vrot.slane %v7326_v27, 1  ;;  %v2704_v19 = vrot.slane %v7326_v27, 2  ;;  %v2706_v44 = vrot.slane %v2440_v5, 2 }
 0x54d   : > { %3327 = vrot.lane.b32.xlu1 %v2700_v52, %s4663_s8  ;;  %v2216_v46 = vmax.f32 %v2184_v61, 0.0 }
 0x54e   : > { %v3314_v62 = vpop.permute.xlu0 %3313  ;;  %v2540_v40 = vsel %vm457_vm1, %v2538_v28, %v2539_v48  ;;  %v2705_v38 = vsel %vm623_vm2, %v2703_v1, %v2704_v19  ;;  %v2707_v63 = vsel %vm623_vm2, %v2704_v19, %v2706_v44 }
 0x54f   : > { %v3608_v39 = vsel %vm1586_vm11, %v3576_v56, %v3314_v62  ;;  %v3136_v59 = vpop.permute.xlu1 %3135 }
 0x550   : > { %3239 = vrot.lane.b32.xlu0 %v2537_v45, %s4662_s5  ;;  %4554 = vmatmul.mubr.msk.f32.gmra.mrb[14].mxu1 %vm1624_vm12, %v3608_v39  ;;  %v3545_v21 = vsel %vm1520_vm9, %v3513_v54, %v3136_v59  ;;  %v2217_v54 = vmax.f32 %v2185_v8, 0.0 }
 0x551   : > { %2956 = vrot.lane.b32.xlu1 %v2537_v45, %s4659_s21 }
 0x552   : > { %v3042_v41 = vpop.permute.xlu0 %3041  ;;  %v2327_v28 = vrot.slane %v2217_v54, 7  ;;  %v2393_v30 = vrot.slane %v2217_v54, 5 }
 0x553   : > { %v7301_v36 = vpop.permute.xlu1 %2840  ;;  %v3514_v42 = vsel %vm1487_vm8, %v3482_v20, %v3042_v41  ;;  %v2541_v41 = vrot.slane %v2440_v5, 1 }
 0x554   : > { %2596 = vrot.lane.b32.xlu0 %v2535_v10, %s4656_s18 }
 0x555   : > { %3329 = vrot.lane.b32.xlu1 %v2702_v11, %s4663_s8  ;;  %v2542_v16 = vsel %vm457_vm1, %v2539_v48, %v2541_v41  ;;  %v8335_v48 = vld [vmem:[#allocation19_spill] sm:$0xff] }
 0x556   : > { %v7306_v15 = vpop.permute.xlu0 %2747  ;;  %v3389_v22 = vsel %vm1359_vm4, %v6554_v18, %v8335_v48 }
 0x557   : > { %v3226_v25 = vpop.permute.xlu1 %3225  ;;  %v3419_v24 = vsel %vm1390_vm5, %v3389_v22, %v7283_v43 }
 0x558   : > { %3055 = vrot.lane.b32.xlu0 %v2700_v52, %s4660_s22  ;;  %v3577_v10 = vsel %vm1553_vm10, %v3545_v21, %v3226_v25 }
 0x559   : > { %2761 = vrot.lane.b32.xlu1 %v2700_v52, %s4657_s19 }
 0x55a   : > { %v3138_v53 = vpop.permute.xlu0 %3137 }
 0x55b   : > { %v7317_v6 = vpop.permute.xlu1 %2942  ;;  %v3546_v56 = vsel %vm1520_vm9, %v3514_v42, %v3138_v53 }
 0x55c   : > { %2598 = vrot.lane.b32.xlu0 %v2537_v45, %s4656_s18 }
 0x55d   : > { %3151 = vrot.lane.b32.xlu1 %v7323_v2, %s4661_s27 }
 0x55e   : > { %v7332_v26 = vpop.permute.xlu0 %2842 }
 0x55f   : > { %v3316_v14 = vpop.permute.xlu1 %3315 }
 0x560   : > { %3057 = vrot.lane.b32.xlu0 %v2702_v11, %s4660_s22  ;;  %v3609_v32 = vsel %vm1586_vm11, %v3577_v10, %v3316_v14  ;;  %v2250_v14 = vrot.slane %v2216_v46, 1 }
 0x561   : > { %2856 = vrot.lane.b32.xlu1 %v7323_v2, %s4658_s20  ;;  %4556 = vmatprep.mubr.msk.f32.mxu1 %vm1624_vm12, %v3609_v32  ;;  %v2326_v32 = vrot.slane %v2216_v46, 7 }
 0x562   : > { %v3228_v0 = vpop.permute.xlu0 %3227 }
 0x563   : > { %v7349_v7 = vpop.f32.mrb[0].mxu1  ;;  %v7351_v47 = vpop.permute.xlu1 %2944  ;;  %v3578_v39 = vsel %vm1553_vm10, %v3546_v56, %v3228_v0  ;;  %v3451_v0 = vsel %vm1421_vm6, %v3419_v24, %v7301_v36  ;;  %v7418_v18 = vsel %vm267_vm0, %v2250_v14, %v2326_v32  ;;  %v7421_v43 = vsel %vm267_vm0, %v2326_v32, %v2327_v28  ;;  %v8337_v24 = vld [vmem:[#allocation15_spill] sm:$0xff] }
 0x564   : > { %v3955_v9 = vsel %vm1359_vm4, %v7349_v7, 0.0  ;;  %v7357_v52 = vpop.f32.mrb[1].mxu1  ;;  %2763 = vrot.lane.b32.xlu0 %v2702_v11, %s4657_s19  ;;  %v3483_v20 = vsel %vm1454_vm7, %v3451_v0, %v7317_v6  ;;  %v2543_v1 = vrot.slane %v7418_v18, 1  ;;  %v2544_v19 = vrot.slane %v7421_v43, 1 }
 0x565   : > { %v3954_v31 = vsel %vm1359_vm4, %v7357_v52, 0.0  ;;  %3241 = vrot.lane.b32.xlu1 %v2540_v40, %s4662_s5  ;;  %v2708_v46 = vrot.slane %v7418_v18, 2 }
 0x566   : > { %v3956_v62 = vadd.f32 %v3955_v9, %v3954_v31  ;;  %v7366_v35 = vpop.permute.xlu0 %2584 }
 0x567   : > { %v3318_v45 = vpop.permute.xlu1 %3317 }
 0x568   : > { %3153 = vrot.lane.b32.xlu0 %v7326_v27, %s4661_s27  ;;  %v3610_v59 = vsel %vm1586_vm11, %v3578_v39, %v3318_v45 }
 0x569   : > { %2958 = vrot.lane.b32.xlu1 %v2540_v40, %s4659_s21  ;;  %4557 = vmatmul.mubr.msk.f32.gmra.mrb[16].mxu1 %vm1624_vm12, %v3610_v59 }
 0x56a   : > { %v3044_v4 = vpop.permute.xlu0 %3043 }
 0x56b   : > { %v7377_v23 = vpop.permute.xlu1 %2749 }
 0x56c   : > { %2858 = vrot.lane.b32.xlu0 %v7326_v27, %s4658_s20 }
 0x56d   : > { %3331 = vrot.lane.b32.xlu1 %v2705_v38, %s4663_s8 }
 0x56e   : > { %v7383_v11 = vpop.permute.xlu0 %2586 }
 0x56f   : > { %v3140_v25 = vpop.permute.xlu1 %3139 }
 0x570   : > { %3243 = vrot.lane.b32.xlu0 %v2542_v16, %s4662_s5 }
 0x571   : > { %2960 = vrot.lane.b32.xlu1 %v2542_v16, %s4659_s21 }
 0x572   : > { %v3046_v49 = vpop.permute.xlu0 %3045 }
 0x573   : > { %v7392_v53 = vpop.permute.xlu1 %2844 }
 0x574   : > { %2600 = vrot.lane.b32.xlu0 %v2540_v40, %s4656_s18  ;;  %v3515_v40 = vsel %vm1487_vm8, %v3483_v20, %v3044_v4  ;;  %v8336_v4 = vld [vmem:[#allocation24_spill] sm:$0xff]  ;;  %v8338_v20 = vld [vmem:[#allocation6_spill] sm:$0xff] }
 0x575   : > { %3333 = vrot.lane.b32.xlu1 %v2707_v63, %s4663_s8  ;;  %v3547_v6 = vsel %vm1520_vm9, %v3515_v40, %v3140_v25  ;;  %v2187_v40 = vmul.f32 %v6335_v55, %v8338_v20 }
 0x576   : > { %v7397_v21 = vpop.permute.xlu0 %2751 }
 0x577   : > { %v3230_v10 = vpop.permute.xlu1 %3229 }
 0x578   : > { %3059 = vrot.lane.b32.xlu0 %v2705_v38, %s4660_s22  ;;  %v3579_v56 = vsel %vm1553_vm10, %v3547_v6, %v3230_v10 }
 0x579   : > { %2765 = vrot.lane.b32.xlu1 %v2705_v38, %s4657_s19 }
 0x57a   : > { %v3142_v58 = vpop.permute.xlu0 %3141 }
 0x57b   : > { %v7408_v33 = vpop.f32.mrb[2].mxu1  ;;  %v7410_v37 = vpop.permute.xlu1 %2946 }
 0x57c   : > { %v7414_v9 = vpop.f32.mrb[3].mxu1  ;;  %2602 = vrot.lane.b32.xlu0 %v2542_v16, %s4656_s18  ;;  %v3959_v39 = vsel %vm1359_vm4, %v7408_v33, 0.0 }
 0x57d   : > { %v3957_v36 = vsel %vm1359_vm4, %v7414_v9, 0.0  ;;  %3155 = vrot.lane.b32.xlu1 %v7418_v18, %s4661_s27 }
 0x57e   : > { %v3958_v42 = vadd.f32 %v3957_v36, %v3956_v62  ;;  %v7429_v31 = vpop.permute.xlu0 %2846  ;;  %v3390_v62 = vsel %vm1359_vm4, %v6542_v12, %v8336_v4  ;;  %v2545_v12 = vsel %vm457_vm1, %v2543_v1, %v2544_v19 }
 0x57f   : > { %v3320_v45 = vpop.permute.xlu1 %3319  ;;  %v3420_v41 = vsel %vm1390_vm5, %v3390_v62, %v7306_v15 }
 0x580   : > { %3061 = vrot.lane.b32.xlu0 %v2707_v63, %s4660_s22  ;;  %v3611_v59 = vsel %vm1586_vm11, %v3579_v56, %v3320_v45  ;;  %v3960_v5 = vadd.f32 %v3959_v39, %v3958_v42  ;;  %v3452_v16 = vsel %vm1421_vm6, %v3420_v41, %v7332_v26  ;;  %v2219_v39 = vmax.f32 %v2187_v40, 0.0 }
 0x581   : > { %2860 = vrot.lane.b32.xlu1 %v7418_v18, %s4658_s20  ;;  %4559 = vmatprep.mubr.msk.f32.mxu1 %vm1624_vm12, %v3611_v59  ;;  %v3484_v61 = vsel %vm1454_vm7, %v3452_v16, %v7351_v47  ;;  %v3391_v41 = vsel %vm1359_vm4, %v6988_v17, %v7366_v35 }
 0x582   : > { %v3232_v38 = vpop.permute.xlu0 %3231  ;;  %v3516_v44 = vsel %vm1487_vm8, %v3484_v61, %v3046_v49  ;;  %v2441_v49 = vsel %vm267_vm0, %v2327_v28, %v2393_v30  ;;  %v2330_v62 = vrot.slane %v2219_v39, 7  ;;  %v3421_v16 = vsel %vm1390_vm5, %v3391_v41, %v7377_v23 }
 0x583   : > { %v7448_v25 = vpop.permute.xlu1 %2948  ;;  %v3548_v15 = vsel %vm1520_vm9, %v3516_v44, %v3142_v58  ;;  %v2546_v14 = vrot.slane %v2441_v49, 1  ;;  %v2186_v58 = vmul.f32 %v6335_v55, %v8337_v24  ;;  %v2711_v0 = vrot.slane %v2441_v49, 2 }
 0x584   : > { %2767 = vrot.lane.b32.xlu0 %v2707_v63, %s4657_s19  ;;  %v3580_v26 = vsel %vm1553_vm10, %v3548_v15, %v3232_v38  ;;  %v2709_v63 = vrot.slane %v7421_v43, 2  ;;  %v2394_v24 = vrot.slane %v2219_v39, 5 }
 0x585   : > { %3245 = vrot.lane.b32.xlu1 %v2545_v12, %s4662_s5  ;;  %v2547_v22 = vsel %vm457_vm1, %v2544_v19, %v2546_v14  ;;  %v2218_v42 = vmax.f32 %v2186_v58, 0.0  ;;  %v3392_v14 = vsel %vm1359_vm4, %v6991_v13, %v7383_v11 }
 0x586   : > { %v7457_v3 = vpop.permute.xlu0 %2588  ;;  %v2710_v32 = vsel %vm623_vm2, %v2708_v46, %v2709_v63  ;;  %v2712_v56 = vsel %vm623_vm2, %v2709_v63, %v2711_v0 }
 0x587   : > { %v3322_v8 = vpop.permute.xlu1 %3321  ;;  %v2251_v19 = vrot.slane %v2218_v42, 1  ;;  %v2329_v55 = vrot.slane %v2218_v42, 7 }
 0x588   : > { %3157 = vrot.lane.b32.xlu0 %v7421_v43, %s4661_s27  ;;  %v3612_v47 = vsel %vm1586_vm11, %v3580_v26, %v3322_v8 }
 0x589   : > { %2962 = vrot.lane.b32.xlu1 %v2545_v12, %s4659_s21  ;;  %4560 = vmatmul.mubr.msk.f32.gmra.mrb[18].mxu1 %vm1624_vm12, %v3612_v47  ;;  %v2426_v35 = vsel %vm267_vm0, %v2251_v19, %v2329_v55  ;;  %v2331_v23 = vsel %vm267_vm0, %v2329_v55, %v2330_v62 }
 0x58a   : > { %v3048_v54 = vpop.permute.xlu0 %3047  ;;  %v2901_v63 = vrot.slane %v2426_v35, 1  ;;  %v2902_v49 = vrot.slane %v2331_v23, 1  ;;  %v3002_v40 = vrot.slane %v2426_v35, 2  ;;  %v3003_v42 = vrot.slane %v2331_v23, 2 }
 0x58b   : > { %v7468_v10 = vpop.permute.xlu1 %2753 }
 0x58c   : > { %2862 = vrot.lane.b32.xlu0 %v7421_v43, %s4658_s20  ;;  %v2903_v13 = vsel %vm457_vm1, %v2901_v63, %v2902_v49  ;;  %v3004_v19 = vsel %vm623_vm2, %v3002_v40, %v3003_v42 }
 0x58d   : > { %3335 = vrot.lane.b32.xlu1 %v2710_v32, %s4663_s8 }
 0x58e   : > { %v7474_v48 = vpop.permute.xlu0 %2590 }
 0x58f   : > { %v3144_v28 = vpop.permute.xlu1 %3143 }
 0x590   : > { %3247 = vrot.lane.b32.xlu0 %v2547_v22, %s4662_s5 }
 0x591   : > { %2964 = vrot.lane.b32.xlu1 %v2547_v22, %s4659_s21 }
 0x592   : > { %v3050_v36 = vpop.permute.xlu0 %3049 }
 0x593   : > { %v7483_v6 = vpop.permute.xlu1 %2848 }
 0x594   : > { %2604 = vrot.lane.b32.xlu0 %v2545_v12, %s4656_s18  ;;  %v3453_v12 = vsel %vm1421_vm6, %v3421_v16, %v7392_v53 }
 0x595   : > { %3337 = vrot.lane.b32.xlu1 %v2712_v56, %s4663_s8  ;;  %v3485_v17 = vsel %vm1454_vm7, %v3453_v12, %v7410_v37 }
 0x596   : > { %v7488_v45 = vpop.permute.xlu0 %2755 }
 0x597   : > { %v7490_v59 = vpop.f32.mrb[4].mxu1  ;;  %v3234_v1 = vpop.permute.xlu1 %3233 }
 0x598   : > { %v7492_v4 = vpop.f32.mrb[5].mxu1  ;;  %3063 = vrot.lane.b32.xlu0 %v2710_v32, %s4660_s22  ;;  %v3963_v44 = vsel %vm1359_vm4, %v7490_v59, 0.0 }
 0x599   : > { %v3961_v38 = vsel %vm1359_vm4, %v7492_v4, 0.0  ;;  %2769 = vrot.lane.b32.xlu1 %v2710_v32, %s4657_s19 }
 0x59a   : > { %v3962_v30 = vadd.f32 %v3961_v38, %v3960_v5  ;;  %v3146_v61 = vpop.permute.xlu0 %3145  ;;  %v3517_v5 = vsel %vm1487_vm8, %v3485_v17, %v3048_v54  ;;  %v3422_v54 = vsel %vm1390_vm5, %v3392_v14, %v7397_v21 }
 0x59b   : > { %v7507_v15 = vpop.permute.xlu1 %2950  ;;  %v3549_v53 = vsel %vm1520_vm9, %v3517_v5, %v3144_v28 }
 0x59c   : > { %2606 = vrot.lane.b32.xlu0 %v2547_v22, %s4656_s18  ;;  %v3964_v26 = vadd.f32 %v3963_v44, %v3962_v30  ;;  %v3581_v47 = vsel %vm1553_vm10, %v3549_v53, %v3234_v1  ;;  %v3454_v22 = vsel %vm1421_vm6, %v3422_v54, %v7429_v31 }
 0x59d   : > { %3159 = vrot.lane.b32.xlu1 %v2426_v35, %s4661_s27  ;;  %v3486_v58 = vsel %vm1454_vm7, %v3454_v22, %v7448_v25 }
 0x59e   : > { %v7517_v8 = vpop.permute.xlu0 %2850  ;;  %v3518_v11 = vsel %vm1487_vm8, %v3486_v58, %v3050_v36 }
 0x59f   : > { %v3324_v46 = vpop.permute.xlu1 %3323  ;;  %v3550_v21 = vsel %vm1520_vm9, %v3518_v11, %v3146_v61 }
 0x5a0   : > { %3065 = vrot.lane.b32.xlu0 %v2712_v56, %s4660_s22  ;;  %v3613_v37 = vsel %vm1586_vm11, %v3581_v47, %v3324_v46  ;;  %v3393_v46 = vsel %vm1359_vm4, %v7071_v34, %v7457_v3  ;;  %v3394_v3 = vsel %vm1359_vm4, %v7074_v57, %v7474_v48 }
 0x5a1   : > { %2864 = vrot.lane.b32.xlu1 %v2426_v35, %s4658_s20  ;;  %4562 = vmatprep.mubr.msk.f32.mxu1 %vm1624_vm12, %v3613_v37  ;;  %v3423_v63 = vsel %vm1390_vm5, %v3393_v46, %v7468_v10  ;;  %v3424_v10 = vsel %vm1390_vm5, %v3394_v3, %v7488_v45 }
 0x5a2   : > { %v3236_v32 = vpop.permute.xlu0 %3235 }
 0x5a3   : > { %v7531_v28 = vpop.permute.xlu1 %2952  ;;  %v3582_v31 = vsel %vm1553_vm10, %v3550_v21, %v3236_v32 }
 0x5a4   : > { %2771 = vrot.lane.b32.xlu0 %v2712_v56, %s4657_s19  ;;  %v2442_v56 = vsel %vm267_vm0, %v2330_v62, %v2394_v24 }
 0x5a5   : > { %3249 = vrot.lane.b32.xlu1 %v2903_v13, %s4662_s5  ;;  %v2904_v1 = vrot.slane %v2442_v56, 1  ;;  %v3005_v62 = vrot.slane %v2442_v56, 2 }
 0x5a6   : > { %v7540_v0 = vpop.permute.xlu0 %2592 }
 0x5a7   : > { %v3326_v20 = vpop.permute.xlu1 %3325  ;;  %v2905_v41 = vsel %vm457_vm1, %v2902_v49, %v2904_v1  ;;  %v3006_v44 = vsel %vm623_vm2, %v3003_v42, %v3005_v62  ;;  %v3455_v49 = vsel %vm1421_vm6, %v3423_v63, %v7483_v6 }
 0x5a8   : > { %3161 = vrot.lane.b32.xlu0 %v2331_v23, %s4661_s27  ;;  %v3614_v25 = vsel %vm1586_vm11, %v3582_v31, %v3326_v20  ;;  %v3487_v14 = vsel %vm1454_vm7, %v3455_v49, %v7507_v15  ;;  %v3456_v15 = vsel %vm1421_vm6, %v3424_v10, %v7517_v8 }
 0x5a9   : > { %2966 = vrot.lane.b32.xlu1 %v2903_v13, %s4659_s21  ;;  %4563 = vmatmul.mubr.msk.f32.gmra.mrb[20].mxu1 %vm1624_vm12, %v3614_v25  ;;  %v3488_v11 = vsel %vm1454_vm7, %v3456_v15, %v7531_v28 }
 0x5aa   : > { %v3052_v36 = vpop.permute.xlu0 %3051 }
 0x5ab   : > { %v7548_v39 = vpop.permute.xlu1 %2757  ;;  %v3519_v54 = vsel %vm1487_vm8, %v3487_v14, %v3052_v36 }
 0x5ac   : > { %2866 = vrot.lane.b32.xlu0 %v2331_v23, %s4658_s20  ;;  %s8007_s20 = scalar_lea.vmem %s8135_s3, %s4388_s14 }
 0x5ad   : > { %3339 = vrot.lane.b32.xlu1 %v3004_v19, %s4663_s8 }
 0x5ae   : > { %v7553_v55 = vpop.permute.xlu0 %2594 }
 0x5af   : > { %v3148_v38 = vpop.permute.xlu1 %3147 }
 0x5b0   : > { %3251 = vrot.lane.b32.xlu0 %v2905_v41, %s4662_s5  ;;  %v3551_v32 = vsel %vm1520_vm9, %v3519_v54, %v3148_v38 }
 0x5b1   : > { %3067 = vrot.lane.b32.xlu1 %v3004_v19, %s4660_s22 }
 0x5b2   : > { %v3054_v16 = vpop.permute.xlu0 %3053 }
 0x5b3   : > { %v7558_v30 = vpop.f32.mrb[6].mxu1  ;;  %v2853_v61 = vpop.permute.xlu1 %2852  ;;  %v3520_v21 = vsel %vm1487_vm8, %v3488_v11, %v3054_v16 }
 0x5b4   : > { %v7560_v12 = vpop.f32.mrb[7].mxu1  ;;  %2968 = vrot.lane.b32.xlu0 %v2905_v41, %s4659_s21  ;;  %v3967_v5 = vsel %vm1359_vm4, %v7558_v30, 0.0 }
 0x5b5   : > { %v3965_v17 = vsel %vm1359_vm4, %v7560_v12, 0.0  ;;  %3069 = vrot.lane.b32.xlu1 %v3006_v44, %s4660_s22 }
 0x5b6   : > { %v3966_v35 = vadd.f32 %v3965_v17, %v3964_v26  ;;  %v2760_v23 = vpop.permute.xlu0 %2759  ;;  %v3395_v17 = vsel %vm1359_vm4, %v7152_v60, %v7540_v0  ;;  %v3396_v60 = vsel %vm1359_vm4, %v7155_v51, %v7553_v55 }
 0x5b7   : > { %v3238_v53 = vpop.permute.xlu1 %3237  ;;  %v3426_v0 = vsel %vm1390_vm5, %v3396_v60, %v2760_v23 }
 0x5b8   : > { %3341 = vrot.lane.b32.xlu0 %v3006_v44, %s4663_s8  ;;  %v3968_v47 = vadd.f32 %v3967_v5, %v3966_v35  ;;  %v3583_v24 = vsel %vm1553_vm10, %v3551_v32, %v3238_v53  ;;  %v3425_v35 = vsel %vm1390_vm5, %v3395_v17, %v7548_v39 }
 0x5b9   : > { %v3457_v53 = vsel %vm1421_vm6, %v3425_v35, %v2853_v61 }
 0x5ba   : > { %v3150_v37 = vpop.permute.xlu0 %3149 }
 0x5bb   : > { %v2955_v26 = vpop.permute.xlu1 %2954  ;;  %v3552_v31 = vsel %vm1520_vm9, %v3520_v21, %v3150_v37 }
 0x5be   : > { %v2855_v22 = vpop.permute.xlu0 %2854 }
 0x5bf   : > { %v3328_v58 = vpop.permute.xlu1 %3327  ;;  %v3458_v61 = vsel %vm1421_vm6, %v3426_v0, %v2855_v22 }
 0x5c0   : > { %v3615_v34 = vsel %vm1586_vm11, %v3583_v24, %v3328_v58 }
 0x5c1   : > { %4565 = vmatprep.mubr.msk.f32.mxu1 %vm1624_vm12, %v3615_v34 }
 0x5c2   : > { %v3240_v6 = vpop.permute.xlu0 %3239 }
 0x5c3   : > { %v2957_v13 = vpop.permute.xlu1 %2956  ;;  %v3584_v57 = vsel %vm1553_vm10, %v3552_v31, %v3240_v6 }
 0x5c4   : > { %v3490_v24 = vsel %vm1454_vm7, %v3458_v61, %v2957_v13 }
 0x5c6   : > { %v2597_v20 = vpop.permute.xlu0 %2596 }
 0x5c7   : > { %v3330_v48 = vpop.permute.xlu1 %3329 }
 0x5c8   : > { %v3616_v40 = vsel %vm1586_vm11, %v3584_v57, %v3330_v48 }
 0x5c9   : > { %4566 = vmatmul.mubr.msk.f32.gmra.mrb[22].mxu1 %vm1624_vm12, %v3616_v40 }
 0x5ca   : > { %v3056_v45 = vpop.permute.xlu0 %3055 }
 0x5cb   : > { %v2762_v25 = vpop.permute.xlu1 %2761 }
 0x5ce   : > { %v7598_v42 = vpop.permute.xlu0 %2598 }
 0x5cf   : > { %v7600_v8 = vpop.f32.mrb[8].mxu1  ;;  %v3152_v56 = vpop.permute.xlu1 %3151 }
 0x5d0   : > { %v7602_v28 = vpop.f32.mrb[9].mxu1  ;;  %v3971_v41 = vsel %vm1359_vm4, %v7600_v8, 0.0 }
 0x5d1   : > { %v3969_v36 = vsel %vm1359_vm4, %v7602_v28, 0.0 }
 0x5d2   : > { %v3970_v1 = vadd.f32 %v3969_v36, %v3968_v47  ;;  %v3058_v19 = vpop.permute.xlu0 %3057  ;;  %v3489_v47 = vsel %vm1454_vm7, %v3457_v53, %v2955_v26 }
 0x5d3   : > { %v2857_v38 = vpop.permute.xlu1 %2856  ;;  %v3521_v63 = vsel %vm1487_vm8, %v3489_v47, %v3056_v45  ;;  %v3522_v58 = vsel %vm1487_vm8, %v3490_v24, %v3058_v19 }
 0x5d4   : > { %v3972_v62 = vadd.f32 %v3971_v41, %v3970_v1  ;;  %v3553_v37 = vsel %vm1520_vm9, %v3521_v63, %v3152_v56  ;;  %v3397_v1 = vsel %vm1359_vm4, %v7233_v50, %v2597_v20  ;;  %v3398_v20 = vsel %vm1359_vm4, %v7236_v29, %v7598_v42 }
 0x5d5   : > { %v3427_v19 = vsel %vm1390_vm5, %v3397_v1, %v2762_v25 }
 0x5d6   : > { %v2764_v16 = vpop.permute.xlu0 %2763 }
 0x5d7   : > { %v3242_v44 = vpop.permute.xlu1 %3241  ;;  %v3428_v25 = vsel %vm1390_vm5, %v3398_v20, %v2764_v16 }
 0x5d8   : > { %v3585_v14 = vsel %vm1553_vm10, %v3553_v37, %v3242_v44 }
 0x5da   : > { %v3154_v5 = vpop.permute.xlu0 %3153 }
 0x5db   : > { %v2959_v46 = vpop.permute.xlu1 %2958  ;;  %v3554_v34 = vsel %vm1520_vm9, %v3522_v58, %v3154_v5 }
 0x5de   : > { %v2859_v49 = vpop.permute.xlu0 %2858 }
 0x5df   : > { %v3332_v54 = vpop.permute.xlu1 %3331 }
 0x5e0   : > { %v3617_v32 = vsel %vm1586_vm11, %v3585_v14, %v3332_v54 }
 0x5e1   : > { %4568 = vmatprep.mubr.msk.f32.mxu1 %vm1624_vm12, %v3617_v32 }
 0x5e2   : > { %v3244_v39 = vpop.permute.xlu0 %3243 }
 0x5e3   : > { %v2961_v26 = vpop.permute.xlu1 %2960  ;;  %v3586_v10 = vsel %vm1553_vm10, %v3554_v34, %v3244_v39 }
 0x5e6   : > { %v2601_v3 = vpop.permute.xlu0 %2600 }
 0x5e7   : > { %v3334_v6 = vpop.permute.xlu1 %3333 }
 0x5e8   : > { %v3618_v51 = vsel %vm1586_vm11, %v3586_v10, %v3334_v6 }
 0x5e9   : > { %4569 = vmatmul.mubr.msk.f32.gmra.mrb[24].mxu1 %vm1624_vm12, %v3618_v51 }
 0x5ea   : > { %v3060_v55 = vpop.permute.xlu0 %3059 }
 0x5eb   : > { %v7631_v23 = vpop.f32.mrb[10].mxu1  ;;  %v2766_v15 = vpop.permute.xlu1 %2765 }
 0x5ec   : > { %v7633_v22 = vpop.f32.mrb[11].mxu1  ;;  %v3975_v31 = vsel %vm1359_vm4, %v7631_v23, 0.0 }
 0x5ed   : > { %v3973_v13 = vsel %vm1359_vm4, %v7633_v22, 0.0 }
 0x5ee   : > { %v3974_v11 = vadd.f32 %v3973_v13, %v3972_v62  ;;  %v7637_v21 = vpop.permute.xlu0 %2602  ;;  %v3459_v62 = vsel %vm1421_vm6, %v3427_v19, %v2857_v38 }
 0x5ef   : > { %v7641_v57 = vpop.permute.xlu1 %3155  ;;  %v3491_v17 = vsel %vm1454_vm7, %v3459_v62, %v2959_v46  ;;  %v3460_v46 = vsel %vm1421_vm6, %v3428_v25, %v2859_v49 }
 0x5f0   : > { %v3976_v48 = vadd.f32 %v3975_v31, %v3974_v11  ;;  %v3523_v35 = vsel %vm1487_vm8, %v3491_v17, %v3060_v55  ;;  %v3492_v14 = vsel %vm1454_vm7, %v3460_v46, %v2961_v26  ;;  %v3399_v31 = vsel %vm1359_vm4, %v7323_v2, %v2601_v3 }
 0x5f1   : > { %v3555_v5 = vsel %vm1520_vm9, %v3523_v35, %v7641_v57 }
 0x5f2   : > { %v3062_v40 = vpop.permute.xlu0 %3061 }
 0x5f3   : > { %v2861_v45 = vpop.permute.xlu1 %2860  ;;  %v3524_v54 = vsel %vm1487_vm8, %v3492_v14, %v3062_v40  ;;  %v3429_v40 = vsel %vm1390_vm5, %v3399_v31, %v2766_v15  ;;  %v3400_v14 = vsel %vm1359_vm4, %v7326_v27, %v7637_v21 }
 0x5f6   : > { %v7643_v56 = vpop.permute.xlu0 %2767 }
 0x5f7   : > { %v7645_v36 = vpop.permute.xlu1 %3245 }
 0x5f8   : > { %v3587_v47 = vsel %vm1553_vm10, %v3555_v5, %v7645_v36 }
 0x5fa   : > { %v7650_v41 = vpop.permute.xlu0 %3157 }
 0x5fb   : > { %v2963_v44 = vpop.permute.xlu1 %2962  ;;  %v3556_v32 = vsel %vm1520_vm9, %v3524_v54, %v7650_v41 }
 0x5fe   : > { %v2863_v53 = vpop.permute.xlu0 %2862 }
 0x5ff   : > { %v7659_v63 = vpop.permute.xlu1 %3335 }
 0x600   : > { %v3619_v50 = vsel %vm1586_vm11, %v3587_v47, %v7659_v63 }
 0x601   : > { %4571 = vmatprep.mubr.msk.f32.mxu1 %vm1624_vm12, %v3619_v50 }
 0x602   : > { %v7668_v38 = vpop.permute.xlu0 %3247 }
 0x603   : > { %v2965_v37 = vpop.permute.xlu1 %2964  ;;  %v3588_v29 = vsel %vm1553_vm10, %v3556_v32, %v7668_v38 }
 0x606   : > { %v2605_v60 = vpop.permute.xlu0 %2604 }
 0x607   : > { %v7677_v42 = vpop.f32.mrb[12].mxu1  ;;  %v7679_v0 = vpop.permute.xlu1 %3337  ;;  %v3401_v20 = vsel %vm1359_vm4, %v7418_v18, %v2605_v60  ;;  %v3430_v60 = vsel %vm1390_vm5, %v3400_v14, %v7643_v56 }
 0x608   : > { %v7681_v16 = vpop.f32.mrb[13].mxu1  ;;  %v3620_v49 = vsel %vm1586_vm11, %v3588_v29, %v7679_v0  ;;  %v3979_v24 = vsel %vm1359_vm4, %v7677_v42, 0.0 }
 0x609   : > { %v3977_v39 = vsel %vm1359_vm4, %v7681_v16, 0.0  ;;  %4572 = vmatmul.mubr.msk.f32.gmra.mrb[26].mxu1 %vm1624_vm12, %v3620_v49 }
 0x60a   : > { %v3978_v61 = vadd.f32 %v3977_v39, %v3976_v48  ;;  %v3064_v26 = vpop.permute.xlu0 %3063  ;;  %v3461_v48 = vsel %vm1421_vm6, %v3429_v40, %v2861_v45  ;;  %v3462_v39 = vsel %vm1421_vm6, %v3430_v60, %v2863_v53 }
 0x60b   : > { %v2770_v58 = vpop.permute.xlu1 %2769  ;;  %v3493_v62 = vsel %vm1454_vm7, %v3461_v48, %v2963_v44 }
 0x60c   : > { %v3980_v34 = vadd.f32 %v3979_v24, %v3978_v61  ;;  %v3525_v17 = vsel %vm1487_vm8, %v3493_v62, %v3064_v26  ;;  %v3431_v3 = vsel %vm1390_vm5, %v3401_v20, %v2770_v58  ;;  %v3494_v26 = vsel %vm1454_vm7, %v3462_v39, %v2965_v37 }
 0x60e   : > { %v2607_v10 = vpop.permute.xlu0 %2606 }
 0x60f   : > { %v3160_v6 = vpop.permute.xlu1 %3159  ;;  %v3402_v18 = vsel %vm1359_vm4, %v7421_v43, %v2607_v10 }
 0x610   : > { %v3557_v35 = vsel %vm1520_vm9, %v3525_v17, %v3160_v6 }
 0x612   : > { %v3066_v51 = vpop.permute.xlu0 %3065 }
 0x613   : > { %v2865_v55 = vpop.permute.xlu1 %2864  ;;  %v3526_v10 = vsel %vm1487_vm8, %v3494_v26, %v3066_v51 }
 0x614   : > { %v3463_v15 = vsel %vm1421_vm6, %v3431_v3, %v2865_v55 }
 0x616   : > { %v2772_v13 = vpop.permute.xlu0 %2771 }
 0x617   : > { %v3250_v11 = vpop.permute.xlu1 %3249  ;;  %v3432_v29 = vsel %vm1390_vm5, %v3402_v18, %v2772_v13 }
 0x618   : > { %v3589_v47 = vsel %vm1553_vm10, %v3557_v35, %v3250_v11 }
 0x61a   : > { %v3162_v1 = vpop.permute.xlu0 %3161 }
 0x61b   : > { %v2967_v19 = vpop.permute.xlu1 %2966  ;;  %v3558_v55 = vsel %vm1520_vm9, %v3526_v10, %v3162_v1 }
 0x61c   : > { %v3495_v44 = vsel %vm1454_vm7, %v3463_v15, %v2967_v19 }
 0x61e   : > { %v2867_v5 = vpop.permute.xlu0 %2866 }
 0x61f   : > { %v3340_v50 = vpop.permute.xlu1 %3339  ;;  %v3464_v61 = vsel %vm1421_vm6, %v3432_v29, %v2867_v5 }
 0x620   : > { %v3621_v2 = vsel %vm1586_vm11, %v3589_v47, %v3340_v50 }
 0x621   : > { %4574 = vmatprep.mubr.msk.f32.mxu1 %vm1624_vm12, %v3621_v2 }
 0x622   : > { %v3252_v45 = vpop.permute.xlu0 %3251 }
 0x623   : > { %v7705_v25 = vpop.f32.mrb[14].mxu1  ;;  %v3068_v46 = vpop.permute.xlu1 %3067  ;;  %v3590_v37 = vsel %vm1553_vm10, %v3558_v55, %v3252_v45 }
 0x624   : > { %v7712_v54 = vpop.f32.mrb[15].mxu1  ;;  %v3527_v32 = vsel %vm1487_vm8, %v3495_v44, %v3068_v46  ;;  %v3983_v24 = vsel %vm1359_vm4, %v7705_v25, 0.0 }
 0x625   : > { %v3981_v49 = vsel %vm1359_vm4, %v7712_v54, 0.0  ;;  %v3559_v43 = vsel %vm1520_vm9, %v3527_v32, %v7641_v57 }
 0x626   : > { %v3982_v27 = vadd.f32 %v3981_v49, %v3980_v34  ;;  %v2969_v21 = vpop.permute.xlu0 %2968  ;;  %v3591_v57 = vsel %vm1553_vm10, %v3559_v43, %v7645_v36 }
 0x627   : > { %v3496_v56 = vsel %vm1454_vm7, %v3464_v61, %v2969_v21  ;;  %v3070_v58 = vpop.permute.xlu1 %3069  ;;  %v3623_v51 = vsel %vm1586_vm11, %v3591_v57, %v7659_v63 }
 0x628   : > { %v3528_v6 = vsel %vm1487_vm8, %v3496_v56, %v3070_v58  ;;  %v3984_v53 = vadd.f32 %v3983_v24, %v3982_v27 }
 0x629   : > { %v3560_v34 = vsel %vm1520_vm9, %v3528_v6, %v7650_v41 }
 0x62a   : > { %v3342_v13 = vpop.permute.xlu0 %3341  ;;  %v3592_v11 = vsel %vm1553_vm10, %v3560_v34, %v7668_v38 }
 0x62b   : > { %v3622_v31 = vsel %vm1586_vm11, %v3590_v37, %v3342_v13  ;;  %v3624_v41 = vsel %vm1586_vm11, %v3592_v11, %v7679_v0 }
 0x62c   : > { %4575 = vmatmul.mubr.msk.f32.gmra.mrb[28].mxu1 %vm1624_vm12, %v3622_v31 }
 0x62d   : > { %4577 = vmatprep.mubr.msk.f32.mxu1 %vm1624_vm12, %v3623_v51 }
 0x630   : > { %4578 = vmatmul.mubr.msk.f32.gmra.mrb[30].mxu1 %vm1624_vm12, %v3624_v41 }
 0x63c   : > { %v7746_v36 = vpop.f32.mrb[16].mxu1 }
 0x63d   : > { %v7748_v40 = vpop.f32.mrb[17].mxu1  ;;  %v3987_v48 = vsel %vm1359_vm4, %v7746_v36, 0.0 }
 0x63e   : > { %v3985_v38 = vsel %vm1359_vm4, %v7748_v40, 0.0 }
 0x63f   : > { %v3986_v1 = vadd.f32 %v3985_v38, %v3984_v53 }
 0x641   : > { %v3988_v19 = vadd.f32 %v3987_v48, %v3986_v1 }
 0x65c   : > { %v7754_v63 = vpop.f32.mrb[18].mxu1 }
 0x65d   : > { %v7756_v62 = vpop.f32.mrb[19].mxu1  ;;  %v3991_v35 = vsel %vm1359_vm4, %v7754_v63, 0.0 }
 0x65e   : > { %v3989_v0 = vsel %vm1359_vm4, %v7756_v62, 0.0 }
 0x65f   : > { %v3990_v17 = vadd.f32 %v3989_v0, %v3988_v19 }
 0x661   : > { %v3992_v5 = vadd.f32 %v3991_v35, %v3990_v17 }
 0x67c   : > { %v7762_v47 = vpop.f32.mrb[20].mxu1 }
 0x67d   : > { %v3895_v50 = vpop.f32.mrb[21].mxu1  ;;  %v3995_v3 = vsel %vm1359_vm4, %v7762_v47, 0.0 }
 0x67e   : > { %v3993_v20 = vsel %vm1359_vm4, %v3895_v50, 0.0 }
 0x67f   : > { %v3994_v2 = vadd.f32 %v3993_v20, %v3992_v5 }
 0x681   : > { %v3996_v15 = vadd.f32 %v3995_v3, %v3994_v2 }
 0x69c   : > { %v4567_v45 = vpop.f32.mrb[22].mxu1 }
 0x69d   : > { %v3905_v44 = vpop.f32.mrb[23].mxu1  ;;  %v3999_v18 = vsel %vm1359_vm4, %v4567_v45, 0.0 }
 0x69e   : > { %v3997_v46 = vsel %vm1359_vm4, %v3905_v44, 0.0 }
 0x69f   : > { %v3998_v14 = vadd.f32 %v3997_v46, %v3996_v15 }
 0x6a1   : > { %v4000_v32 = vadd.f32 %v3999_v18, %v3998_v14 }
 0x6bc   : > { %v4570_v60 = vpop.f32.mrb[24].mxu1 }
 0x6bd   : > { %v3915_v29 = vpop.f32.mrb[25].mxu1  ;;  %v4003_v61 = vsel %vm1359_vm4, %v4570_v60, 0.0 }
 0x6be   : > { %v4001_v49 = vsel %vm1359_vm4, %v3915_v29, 0.0 }
 0x6bf   : > { %v4002_v39 = vadd.f32 %v4001_v49, %v4000_v32 }
 0x6c1   : > { %v4004_v27 = vadd.f32 %v4003_v61, %v4002_v39 }
 0x6dc   : > { %v4573_v43 = vpop.f32.mrb[26].mxu1 }
 0x6dd   : > { %v3925_v21 = vpop.f32.mrb[27].mxu1  ;;  %v4007_v56 = vsel %vm1359_vm4, %v4573_v43, 0.0 }
 0x6de   : > { %v4005_v26 = vsel %vm1359_vm4, %v3925_v21, 0.0 }
 0x6df   : > { %v4006_v24 = vadd.f32 %v4005_v26, %v4004_v27 }
 0x6e1   : > { %v4008_v58 = vadd.f32 %v4007_v56, %v4006_v24 }
 0x6ff   : > { %v4576_v10 = vpop.f32.mrb[28].mxu1 }
 0x700   : > { %v3935_v6 = vpop.f32.mrb[29].mxu1  ;;  %v4011_v34 = vsel %vm1359_vm4, %v4576_v10, 0.0 }
 0x701   : > { %v4009_v53 = vsel %vm1359_vm4, %v3935_v6, 0.0 }
 0x702   : > { %v4010_v55 = vadd.f32 %v4009_v53, %v4008_v58 }
 0x703   : > { %v4579_v57 = vpop.f32.mrb[30].mxu1 }
 0x704   : > { %v3945_v37 = vpop.f32.mrb[31].mxu1  ;;  %v4012_v13 = vadd.f32 %v4011_v34, %v4010_v55  ;;  %v4015_v51 = vsel %vm1359_vm4, %v4579_v57, 0.0 }
 0x705   : > { %v4013_v11 = vsel %vm1359_vm4, %v3945_v37, 0.0 }
 0x706   : > { %v4014_v31 = vadd.f32 %v4013_v11, %v4012_v13 }
 0x708   : > { %v4016_v41 = vadd.f32 %v4015_v51, %v4014_v31 }
 0x70a   : > { %v4017_v38 = vrot.slane %v4016_v41, 4 }
 0x70c   : > { %v4018_v1 = vadd.f32 %v4017_v38, %v4016_v41 }
 0x70e   : > { %v4019_v48 = vrot.slane %v4018_v1, 2 }
 0x710   : > { %v4020_v19 = vadd.f32 %v4019_v48, %v4018_v1 }
 0x712   : > { %v4021_v0 = vrot.slane %v4020_v19, 1 }
 0x714   : > { %v4022_v17 = vadd.f32 %v4021_v0, %v4020_v19 }
 0x716   : > { %v4023_v35 = vmul.f32 0.00390625, %v4022_v17 }
 0x718   : > { %v7778_v5 = vsub.f32 %v7357_v52, %v4023_v35  ;;  %v7781_v20 = vsub.f32 %v7349_v7, %v4023_v35  ;;  %v7784_v2 = vsub.f32 %v7414_v9, %v4023_v35  ;;  %v7787_v3 = vsub.f32 %v7408_v33, %v4023_v35 }
 0x719   : > { %v7790_v15 = vsub.f32 %v7492_v4, %v4023_v35  ;;  %v7793_v46 = vsub.f32 %v7490_v59, %v4023_v35  ;;  %v7796_v14 = vsub.f32 %v7560_v12, %v4023_v35  ;;  %v7799_v52 = vsub.f32 %v7558_v30, %v4023_v35 }
 0x71a   : > { %v7802_v7 = vsub.f32 %v7602_v28, %v4023_v35  ;;  %v7805_v9 = vsub.f32 %v7600_v8, %v4023_v35  ;;  %v7808_v33 = vsub.f32 %v7633_v22, %v4023_v35  ;;  %v7811_v4 = vsub.f32 %v7631_v23, %v4023_v35 }
 0x71b   : > { %v7814_v59 = vsub.f32 %v7681_v16, %v4023_v35  ;;  %v7817_v12 = vsub.f32 %v7677_v42, %v4023_v35  ;;  %v7820_v30 = vsub.f32 %v7712_v54, %v4023_v35  ;;  %v7823_v28 = vsub.f32 %v7705_v25, %v4023_v35 }
 0x71c   : > { %v7826_v8 = vsub.f32 %v7748_v40, %v4023_v35  ;;  %v7829_v22 = vsub.f32 %v7746_v36, %v4023_v35  ;;  %v7832_v23 = vsub.f32 %v7756_v62, %v4023_v35  ;;  %v7835_v16 = vsub.f32 %v7754_v63, %v4023_v35 }
 0x71d   : > { %v7837_v42 = vsub.f32 %v3895_v50, %v4023_v35  ;;  %v7840_v54 = vsub.f32 %v7762_v47, %v4023_v35  ;;  %v7842_v18 = vsub.f32 %v3905_v44, %v4023_v35  ;;  %v7844_v25 = vsub.f32 %v4567_v45, %v4023_v35 }
 0x71e   : > { %v7846_v40 = vsub.f32 %v3915_v29, %v4023_v35  ;;  %v7848_v32 = vsub.f32 %v4570_v60, %v4023_v35  ;;  %v7850_v36 = vsub.f32 %v3925_v21, %v4023_v35  ;;  %v7852_v62 = vsub.f32 %v4573_v43, %v4023_v35 }
 0x71f   : > { %v7854_v49 = vsub.f32 %v3935_v6, %v4023_v35  ;;  %v7856_v63 = vsub.f32 %v4576_v10, %v4023_v35  ;;  %v7858_v50 = vsub.f32 %v3945_v37, %v4023_v35  ;;  %v7860_v47 = vsub.f32 %v4579_v57, %v4023_v35 }
 0x720   : > { %v4056_v45 = vmul.f32 %v7778_v5, %v7778_v5  ;;  %v4057_v44 = vmul.f32 %v7781_v20, %v7781_v20  ;;  %v4058_v60 = vmul.f32 %v7784_v2, %v7784_v2  ;;  %v4059_v29 = vmul.f32 %v7787_v3, %v7787_v3 }
 0x721   : > { %v4060_v43 = vmul.f32 %v7790_v15, %v7790_v15  ;;  %v4061_v24 = vmul.f32 %v7793_v46, %v7793_v46  ;;  %v4062_v10 = vmul.f32 %v7796_v14, %v7796_v14  ;;  %v4063_v55 = vmul.f32 %v7799_v52, %v7799_v52 }
 0x722   : > { %v4088_v39 = vsel %vm1359_vm4, %v4056_v45, 0.0  ;;  %v4089_v61 = vsel %vm1359_vm4, %v4057_v44, 0.0  ;;  %v4091_v21 = vsel %vm1359_vm4, %v4058_v60, 0.0  ;;  %v4093_v56 = vsel %vm1359_vm4, %v4059_v29, 0.0 }
 0x723   : > { %v4090_v27 = vadd.f32 %v4089_v61, %v4088_v39  ;;  %v4095_v6 = vsel %vm1359_vm4, %v4060_v43, 0.0  ;;  %v4097_v34 = vsel %vm1359_vm4, %v4061_v24, 0.0  ;;  %v4064_v37 = vmul.f32 %v7802_v7, %v7802_v7 }
 0x724   : > { %v4099_v13 = vsel %vm1359_vm4, %v4062_v10, 0.0  ;;  %v4065_v31 = vmul.f32 %v7805_v9, %v7805_v9  ;;  %v4101_v51 = vsel %vm1359_vm4, %v4063_v55, 0.0  ;;  %v4066_v38 = vmul.f32 %v7808_v33, %v7808_v33 }
 0x725   : > { %v4092_v26 = vadd.f32 %v4091_v21, %v4090_v27  ;;  %v4103_v1 = vsel %vm1359_vm4, %v4064_v37, 0.0  ;;  %v4067_v19 = vmul.f32 %v7811_v4, %v7811_v4  ;;  %v4068_v35 = vmul.f32 %v7814_v59, %v7814_v59 }
 0x726   : > { %v4105_v0 = vsel %vm1359_vm4, %v4065_v31, 0.0  ;;  %v4107_v45 = vsel %vm1359_vm4, %v4066_v38, 0.0  ;;  %v4069_v60 = vmul.f32 %v7817_v12, %v7817_v12  ;;  %v4070_v61 = vmul.f32 %v7820_v30, %v7820_v30 }
 0x727   : > { %v4094_v58 = vadd.f32 %v4093_v56, %v4092_v26  ;;  %v4109_v29 = vsel %vm1359_vm4, %v4067_v19, 0.0  ;;  %v4111_v27 = vsel %vm1359_vm4, %v4068_v35, 0.0  ;;  %v4071_v21 = vmul.f32 %v7823_v28, %v7823_v28 }
 0x728   : > { %v4113_v26 = vsel %vm1359_vm4, %v4069_v60, 0.0  ;;  %v4072_v56 = vmul.f32 %v7826_v8, %v7826_v8 }
 0x729   : > { %v4096_v53 = vadd.f32 %v4095_v6, %v4094_v58  ;;  %v4115_v58 = vsel %vm1359_vm4, %v4070_v61, 0.0  ;;  %v4073_v6 = vmul.f32 %v7829_v22, %v7829_v22 }
 0x72b   : > { %v4098_v57 = vadd.f32 %v4097_v34, %v4096_v53  ;;  %v4117_v53 = vsel %vm1359_vm4, %v4071_v21, 0.0  ;;  %v4074_v34 = vmul.f32 %v7832_v23, %v7832_v23 }
 0x72d   : > { %v4100_v11 = vadd.f32 %v4099_v13, %v4098_v57  ;;  %v4119_v57 = vsel %vm1359_vm4, %v4072_v56, 0.0  ;;  %v4075_v13 = vmul.f32 %v7835_v16, %v7835_v16 }
 0x72f   : > { %v4102_v41 = vadd.f32 %v4101_v51, %v4100_v11  ;;  %v4121_v11 = vsel %vm1359_vm4, %v4073_v6, 0.0  ;;  %v4076_v51 = vmul.f32 %v7837_v42, %v7837_v42 }
 0x731   : > { %v4104_v48 = vadd.f32 %v4103_v1, %v4102_v41  ;;  %v4123_v41 = vsel %vm1359_vm4, %v4074_v34, 0.0  ;;  %v4077_v1 = vmul.f32 %v7840_v54, %v7840_v54 }
 0x733   : > { %v4106_v17 = vadd.f32 %v4105_v0, %v4104_v48  ;;  %v4125_v48 = vsel %vm1359_vm4, %v4075_v13, 0.0  ;;  %v4078_v0 = vmul.f32 %v7842_v18, %v7842_v18 }
 0x735   : > { %v4108_v44 = vadd.f32 %v4107_v45, %v4106_v17  ;;  %v4127_v17 = vsel %vm1359_vm4, %v4076_v51, 0.0  ;;  %v4079_v45 = vmul.f32 %v7844_v25, %v7844_v25 }
 0x737   : > { %v4110_v39 = vadd.f32 %v4109_v29, %v4108_v44  ;;  %v4129_v44 = vsel %vm1359_vm4, %v4077_v1, 0.0  ;;  %v4080_v29 = vmul.f32 %v7846_v40, %v7846_v40 }
 0x739   : > { %v4112_v43 = vadd.f32 %v4111_v27, %v4110_v39  ;;  %v4131_v39 = vsel %vm1359_vm4, %v4078_v0, 0.0  ;;  %v4081_v27 = vmul.f32 %v7848_v32, %v7848_v32 }
 0x73b   : > { %v4114_v24 = vadd.f32 %v4113_v26, %v4112_v43  ;;  %v4133_v43 = vsel %vm1359_vm4, %v4079_v45, 0.0  ;;  %v4082_v26 = vmul.f32 %v7850_v36, %v7850_v36 }
 0x73d   : > { %v4116_v10 = vadd.f32 %v4115_v58, %v4114_v24  ;;  %v4135_v24 = vsel %vm1359_vm4, %v4080_v29, 0.0  ;;  %v4083_v58 = vmul.f32 %v7852_v62, %v7852_v62 }
 0x73f   : > { %v4118_v55 = vadd.f32 %v4117_v53, %v4116_v10  ;;  %v4137_v10 = vsel %vm1359_vm4, %v4081_v27, 0.0  ;;  %v4084_v53 = vmul.f32 %v7854_v49, %v7854_v49 }
 0x741   : > { %v4120_v37 = vadd.f32 %v4119_v57, %v4118_v55  ;;  %v4139_v55 = vsel %vm1359_vm4, %v4082_v26, 0.0  ;;  %v4085_v57 = vmul.f32 %v7856_v63, %v7856_v63 }
 0x743   : > { %v4122_v31 = vadd.f32 %v4121_v11, %v4120_v37  ;;  %v4141_v37 = vsel %vm1359_vm4, %v4083_v58, 0.0  ;;  %v4086_v11 = vmul.f32 %v7858_v50, %v7858_v50 }
 0x745   : > { %v4124_v38 = vadd.f32 %v4123_v41, %v4122_v31  ;;  %v4143_v31 = vsel %vm1359_vm4, %v4084_v53, 0.0  ;;  %v4087_v41 = vmul.f32 %v7860_v47, %v7860_v47 }
 0x747   : > { %v4126_v19 = vadd.f32 %v4125_v48, %v4124_v38  ;;  %v4145_v38 = vsel %vm1359_vm4, %v4085_v57, 0.0  ;;  %v4147_v48 = vsel %vm1359_vm4, %v4086_v11, 0.0  ;;  %v4149_v0 = vsel %vm1359_vm4, %v4087_v41, 0.0  ;;  %v4620_v57 = vld [vmem:[%s4700_s17 + $0x20] sm:$0xff] }
 0x748   : > { %v4624_v41 = vld [vmem:[%s4700_s17 + $0x40] sm:$0xff] }
 0x749   : > { %v4128_v35 = vadd.f32 %v4127_v17, %v4126_v19 }
 0x74b   : > { %v4130_v60 = vadd.f32 %v4129_v44, %v4128_v35 }
 0x74d   : > { %v4132_v61 = vadd.f32 %v4131_v39, %v4130_v60 }
 0x74f   : > { %v4134_v21 = vadd.f32 %v4133_v43, %v4132_v61 }
 0x751   : > { %v4136_v56 = vadd.f32 %v4135_v24, %v4134_v21 }
 0x753   : > { %v4138_v6 = vadd.f32 %v4137_v10, %v4136_v56 }
 0x755   : > { %v4140_v34 = vadd.f32 %v4139_v55, %v4138_v6 }
 0x757   : > { %v4142_v13 = vadd.f32 %v4141_v37, %v4140_v34  ;;  %v4621_v37 = vld [vmem:[%s4700_s17 + $0x28] sm:$0xff] }
 0x759   : > { %v4144_v51 = vadd.f32 %v4143_v31, %v4142_v13  ;;  %v4622_v13 = vld [vmem:[%s4700_s17 + $0x30] sm:$0xff]  ;;  %v4623_v31 = vld [vmem:[%s4700_s17 + $0x38] sm:$0xff] }
 0x75b   : > { %v4146_v1 = vadd.f32 %v4145_v38, %v4144_v51 }
 0x75d   : > { %v4148_v19 = vadd.f32 %v4147_v48, %v4146_v1  ;;  %v4625_v1 = vld [vmem:[%s4700_s17 + $0x48] sm:$0xff] }
 0x75f   : > { %v4150_v17 = vadd.f32 %v4149_v0, %v4148_v19  ;;  %v4626_v19 = vld [vmem:[%s4700_s17 + $0x50] sm:$0xff] }
 0x761   : > { %v4151_v35 = vrot.slane %v4150_v17, 4 }
 0x763   : > { %v4152_v45 = vadd.f32 %v4151_v35, %v4150_v17  ;;  %v4627_v17 = vld [vmem:[%s4700_s17 + $0x58] sm:$0xff] }
 0x765   : > { %v4153_v44 = vrot.slane %v4152_v45, 2 }
 0x767   : > { %v4154_v60 = vadd.f32 %v4153_v44, %v4152_v45  ;;  %v4628_v45 = vld [vmem:[%s4700_s17 + $0x60] sm:$0xff] }
 0x769   : > { %v4155_v29 = vrot.slane %v4154_v60, 1 }
 0x76b   : > { %v4156_v39 = vadd.f32 %v4155_v29, %v4154_v60  ;;  %v4629_v60 = vld [vmem:[%s4700_s17 + $0x68] sm:$0xff] }
 0x76d   : > { %v4157_v61 = vmul.f32 0.00390625, %v4156_v39  ;;  %v4630_v39 = vld [vmem:[%s4700_s17 + $0x70] sm:$0xff] }
 0x76f   : > { %v4158_v27 = vadd.f32 1e-05, %v4157_v61 }
 0x771   : > { %4614 = vrsqrt.f32 %v4158_v27  ;;  %v4631_v27 = vld [vmem:[%s4700_s17 + $0x78] sm:$0xff] }
 0x77b   : > { %v4615_v43 = vpop.eup %4614 }
 0x77c   : > { %v4160_v21 = vmul.f32 %v4615_v43, %v7778_v5  ;;  %v4161_v26 = vmul.f32 %v4615_v43, %v7781_v20  ;;  %v4162_v24 = vmul.f32 %v4615_v43, %v7784_v2  ;;  %v4163_v56 = vmul.f32 %v4615_v43, %v7787_v3 }
 0x77d   : > { %v4164_v58 = vmul.f32 %v4615_v43, %v7790_v15  ;;  %v4165_v10 = vmul.f32 %v4615_v43, %v7793_v46  ;;  %v4166_v6 = vmul.f32 %v4615_v43, %v7796_v14  ;;  %v4167_v53 = vmul.f32 %v4615_v43, %v7799_v52 }
 0x77e   : > { %v4168_v55 = vmul.f32 %v4615_v43, %v7802_v7  ;;  %v4169_v34 = vmul.f32 %v4615_v43, %v7805_v9  ;;  %v4170_v5 = vmul.f32 %v4615_v43, %v7808_v33  ;;  %v4171_v20 = vmul.f32 %v4615_v43, %v7811_v4 }
 0x77f   : > { %v4172_v2 = vmul.f32 %v4615_v43, %v7814_v59  ;;  %v4173_v3 = vmul.f32 %v4615_v43, %v7817_v12  ;;  %v4174_v15 = vmul.f32 %v4615_v43, %v7820_v30  ;;  %v4175_v46 = vmul.f32 %v4615_v43, %v7823_v28 }
 0x780   : > { %v4176_v14 = vmul.f32 %v4615_v43, %v7826_v8  ;;  %v4177_v52 = vmul.f32 %v4615_v43, %v7829_v22  ;;  %v4178_v7 = vmul.f32 %v4615_v43, %v7832_v23  ;;  %v4179_v9 = vmul.f32 %v4615_v43, %v7835_v16 }
 0x781   : > { %v7979_v33 = vmul.f32 %v4615_v43, %v7837_v42  ;;  %v7982_v4 = vmul.f32 %v4615_v43, %v7840_v54  ;;  %v7985_v59 = vmul.f32 %v4615_v43, %v7842_v18  ;;  %v7988_v12 = vmul.f32 %v4615_v43, %v7844_v25  ;;  %v4616_v18 = vld [vmem:[%s4700_s17] sm:$0xff] }
 0x782   : > { %v7991_v30 = vmul.f32 %v4615_v43, %v7846_v40  ;;  %v7994_v28 = vmul.f32 %v4615_v43, %v7848_v32  ;;  %v7997_v8 = vmul.f32 %v4615_v43, %v7850_v36  ;;  %v8000_v22 = vmul.f32 %v4615_v43, %v7852_v62  ;;  %v4617_v40 = vld [vmem:[%s4700_s17 + $0x8] sm:$0xff]  ;;  %v4618_v36 = vld [vmem:[%s4700_s17 + $0x10] sm:$0xff] }
 0x783   : > { %v8010_v23 = vmul.f32 %v4615_v43, %v7854_v49  ;;  %v8013_v16 = vmul.f32 %v4615_v43, %v7856_v63  ;;  %v8016_v42 = vmul.f32 %v4615_v43, %v7858_v50  ;;  %v8019_v54 = vmul.f32 %v4615_v43, %v7860_v47  ;;  %v4619_v49 = vld [vmem:[%s4700_s17 + $0x18] sm:$0xff] }
 0x784   : > { %v4192_v25 = vadd.f32 %v4616_v18, %v4160_v21  ;;  %v4193_v32 = vadd.f32 %v4617_v40, %v4161_v26  ;;  %v4194_v62 = vadd.f32 %v4618_v36, %v4162_v24  ;;  %v4195_v63 = vadd.f32 %v4619_v49, %v4163_v56  ;;  %v4632_v21 = vld [vmem:[%s4700_s17 + $0x80] sm:$0xff]  ;;  %v4633_v24 = vld [vmem:[%s4700_s17 + $0x88] sm:$0xff]  ;;  %v4646_v18 = vld [vmem:[%s4700_s17 + $0xf0] sm:$0xff] }
 0x785   : > { %v4196_v50 = vadd.f32 %v4620_v57, %v4164_v58  ;;  %v4197_v47 = vadd.f32 %v4621_v37, %v4165_v10  ;;  %v4198_v11 = vadd.f32 %v4622_v13, %v4166_v6  ;;  %v4199_v51 = vadd.f32 %v4623_v31, %v4167_v53  ;;  %v4634_v58 = vld [vmem:[%s4700_s17 + $0x90] sm:$0xff]  ;;  %v4635_v6 = vld [vmem:[%s4700_s17 + $0x98] sm:$0xff] }
 0x786   : > { %v4200_v38 = vadd.f32 %v4624_v41, %v4168_v55  ;;  %v4201_v48 = vadd.f32 %v4625_v1, %v4169_v34  ;;  %v4202_v0 = vadd.f32 %v4626_v19, %v4170_v5  ;;  %v4203_v35 = vadd.f32 %v4627_v17, %v4171_v20  ;;  %4224 = vst.msk [vmem:[%s8007_s20] sm:$0xff] %vm1359_vm4, %v4192_v25  ;;  %v4636_v55 = vld [vmem:[%s4700_s17 + $0xa0] sm:$0xff]  ;;  %v4637_v5 = vld [vmem:[%s4700_s17 + $0xa8] sm:$0xff]  ;;  %v4647_v40 = vld [vmem:[%s4700_s17 + $0xf8] sm:$0xff] }
 0x787   : > { %4225 = vst.msk [vmem:[%s8007_s20 + $0x8] sm:$0xff] %vm1359_vm4, %v4193_v32  ;;  %4226 = vst.msk [vmem:[%s8007_s20 + $0x10] sm:$0xff] %vm1359_vm4, %v4194_v62  ;;  %v4204_v44 = vadd.f32 %v4628_v45, %v4172_v2  ;;  %v4205_v29 = vadd.f32 %v4629_v60, %v4173_v3  ;;  %v4206_v61 = vadd.f32 %v4630_v39, %v4174_v15  ;;  %v4638_v2 = vld [vmem:[%s4700_s17 + $0xb0] sm:$0xff]  ;;  %v4639_v15 = vld [vmem:[%s4700_s17 + $0xb8] sm:$0xff] }
 0x788   : > { %4227 = vst.msk [vmem:[%s8007_s20 + $0x18] sm:$0xff] %vm1359_vm4, %v4195_v63  ;;  %v4207_v43 = vadd.f32 %v4631_v27, %v4175_v46  ;;  %4228 = vst.msk [vmem:[%s8007_s20 + $0x20] sm:$0xff] %vm1359_vm4, %v4196_v50  ;;  %v4208_v26 = vadd.f32 %v4632_v21, %v4176_v14  ;;  %v4209_v56 = vadd.f32 %v4633_v24, %v4177_v52  ;;  %v4640_v14 = vld [vmem:[%s4700_s17 + $0xc0] sm:$0xff] }
 0x789   : > { %4229 = vst.msk [vmem:[%s8007_s20 + $0x28] sm:$0xff] %vm1359_vm4, %v4197_v47  ;;  %4230 = vst.msk [vmem:[%s8007_s20 + $0x30] sm:$0xff] %vm1359_vm4, %v4198_v11  ;;  %v4210_v10 = vadd.f32 %v4634_v58, %v4178_v7  ;;  %v4211_v53 = vadd.f32 %v4635_v6, %v4179_v9  ;;  %v4212_v34 = vadd.f32 %v4636_v55, %v7979_v33  ;;  %v4641_v7 = vld [vmem:[%s4700_s17 + $0xc8] sm:$0xff]  ;;  %v4642_v33 = vld [vmem:[%s4700_s17 + $0xd0] sm:$0xff] }
 0x78a   : > { %4231 = vst.msk [vmem:[%s8007_s20 + $0x38] sm:$0xff] %vm1359_vm4, %v4199_v51  ;;  %4232 = vst.msk [vmem:[%s8007_s20 + $0x40] sm:$0xff] %vm1359_vm4, %v4200_v38  ;;  %v4213_v20 = vadd.f32 %v4637_v5, %v7982_v4  ;;  %v4214_v3 = vadd.f32 %v4638_v2, %v7985_v59  ;;  %v4215_v46 = vadd.f32 %v4639_v15, %v7988_v12  ;;  %v4643_v59 = vld [vmem:[%s4700_s17 + $0xd8] sm:$0xff] }
 0x78b   : > { %4233 = vst.msk [vmem:[%s8007_s20 + $0x48] sm:$0xff] %vm1359_vm4, %v4201_v48  ;;  %4234 = vst.msk [vmem:[%s8007_s20 + $0x50] sm:$0xff] %vm1359_vm4, %v4202_v0  ;;  %v4216_v52 = vadd.f32 %v4640_v14, %v7991_v30  ;;  %v4217_v9 = vadd.f32 %v4641_v7, %v7994_v28  ;;  %v4218_v4 = vadd.f32 %v4642_v33, %v7997_v8  ;;  %v4644_v30 = vld [vmem:[%s4700_s17 + $0xe0] sm:$0xff]  ;;  %v4645_v8 = vld [vmem:[%s4700_s17 + $0xe8] sm:$0xff] }
 0x78c   : > { %4235 = vst.msk [vmem:[%s8007_s20 + $0x58] sm:$0xff] %vm1359_vm4, %v4203_v35  ;;  %4236 = vst.msk [vmem:[%s8007_s20 + $0x60] sm:$0xff] %vm1359_vm4, %v4204_v44  ;;  %v4219_v12 = vadd.f32 %v4643_v59, %v8000_v22  ;;  %v4220_v28 = vadd.f32 %v4644_v30, %v8010_v23  ;;  %v4221_v22 = vadd.f32 %v4645_v8, %v8013_v16 }
 0x78d   : > { %4237 = vst.msk [vmem:[%s8007_s20 + $0x68] sm:$0xff] %vm1359_vm4, %v4205_v29  ;;  %4238 = vst.msk [vmem:[%s8007_s20 + $0x70] sm:$0xff] %vm1359_vm4, %v4206_v61  ;;  %v4222_v25 = vadd.f32 %v4646_v18, %v8016_v42  ;;  %v4223_v32 = vadd.f32 %v4647_v40, %v8019_v54 }
 0x78e   : > { %4239 = vst.msk [vmem:[%s8007_s20 + $0x78] sm:$0xff] %vm1359_vm4, %v4207_v43  ;;  %4240 = vst.msk [vmem:[%s8007_s20 + $0x80] sm:$0xff] %vm1359_vm4, %v4208_v26 }
 0x78f   : > { %4241 = vst.msk [vmem:[%s8007_s20 + $0x88] sm:$0xff] %vm1359_vm4, %v4209_v56  ;;  %4242 = vst.msk [vmem:[%s8007_s20 + $0x90] sm:$0xff] %vm1359_vm4, %v4210_v10 }
 0x790   : > { %4243 = vst.msk [vmem:[%s8007_s20 + $0x98] sm:$0xff] %vm1359_vm4, %v4211_v53  ;;  %4244 = vst.msk [vmem:[%s8007_s20 + $0xa0] sm:$0xff] %vm1359_vm4, %v4212_v34 }
 0x791   : > { %4245 = vst.msk [vmem:[%s8007_s20 + $0xa8] sm:$0xff] %vm1359_vm4, %v4213_v20  ;;  %4246 = vst.msk [vmem:[%s8007_s20 + $0xb0] sm:$0xff] %vm1359_vm4, %v4214_v3 }
 0x792   : > { %4247 = vst.msk [vmem:[%s8007_s20 + $0xb8] sm:$0xff] %vm1359_vm4, %v4215_v46  ;;  %4248 = vst.msk [vmem:[%s8007_s20 + $0xc0] sm:$0xff] %vm1359_vm4, %v4216_v52 }
 0x793   : > { %4249 = vst.msk [vmem:[%s8007_s20 + $0xc8] sm:$0xff] %vm1359_vm4, %v4217_v9  ;;  %4250 = vst.msk [vmem:[%s8007_s20 + $0xd0] sm:$0xff] %vm1359_vm4, %v4218_v4 }
 0x794   : > { %4251 = vst.msk [vmem:[%s8007_s20 + $0xd8] sm:$0xff] %vm1359_vm4, %v4219_v12  ;;  %4252 = vst.msk [vmem:[%s8007_s20 + $0xe0] sm:$0xff] %vm1359_vm4, %v4220_v28 }
 0x795   : > { %4253 = vst.msk [vmem:[%s8007_s20 + $0xe8] sm:$0xff] %vm1359_vm4, %v4221_v22  ;;  %4254 = vst.msk [vmem:[%s8007_s20 + $0xf0] sm:$0xff] %vm1359_vm4, %v4222_v25 }
 0x796   : > { %4255 = vst.msk [vmem:[%s8007_s20 + $0xf8] sm:$0xff] %vm1359_vm4, %v4223_v32 }
 0x797 PF: > { %s13_s12 = sadd.s32 1, %s4654_s12  }
 0x798   : > { %p10_p4 = scmp.ge.s32.totalorder %s13_s12, 6  }
 0x79a   :  { %12 = sbr.rel (!%p10_p4) target bundleno = 1 (0x1), region = 62 }

</bundles_post_ra>
